<compile_context>
chip_gen: v7x
topology: tpu7x:2x2x1
jax: 0.10.0
libtpu: 0.0.40
codegen_flags: <defaults>
</compile_context>

<pallas_src>
import functools
import numpy as np
import jax
import jax.numpy as jnp
from jax.experimental import pallas as pl
from jax.experimental.pallas import tpu as pltpu


LANE = 128   # TPU lane width; key/prob dims are padded to a multiple of this.


# ----------------------------- config ---------------------------------------
class Config:
    n_dec_vocab = 9          # must be <= n_dec_seq + 1 (see pos_emb note below)
    n_dec_seq = 8
    n_enc_seq = 8
    d_hidn = 32
    n_head = 2
    d_head = 16
    d_ff = 64
    n_layer = 2
    i_pad = 0
    layer_norm_epsilon = 1e-6
    dropout = 0.0            # dropout layers act as identity (inference)


# ----------------------- sinusoid position table -----------------------------
def get_sinusoid_table(n_seq, d_hidn):
    pos = np.arange(n_seq)[:, None].astype(np.float64)
    i = np.arange(d_hidn)[None, :]
    angle = pos / np.power(10000, 2 * (i // 2) / d_hidn)
    table = np.zeros((n_seq, d_hidn), dtype=np.float32)
    table[:, 0::2] = np.sin(angle[:, 0::2])
    table[:, 1::2] = np.cos(angle[:, 1::2])
    return table


# ------------------------ exact-GELU helpers (in-kernel) ---------------------
# f32 erf rational approximation (same coefficients XLA / Eigen use), kept for
# parity with torch's erf-form F.gelu (tanh-form would change numerics).
_ERF_ALPHA = (-2.72614225801306e-10, 2.77068142495902e-08, -2.10102402082508e-06,
              -5.69250639462346e-05, -7.34990630326855e-04, -2.95459980854025e-03,
              -1.60960333262415e-02)
_ERF_BETA = (-1.45660718464996e-05, -2.13374055278905e-04, -1.68282697438203e-03,
             -7.37332916720468e-03, -1.42647390514189e-02)


def _erf_f32(x):
    x = jnp.clip(x, -4.0, 4.0)
    x2 = x * x
    p = jnp.full_like(x, _ERF_ALPHA[0])
    for c in _ERF_ALPHA[1:]:
        p = p * x2 + c
    q = jnp.full_like(x, _ERF_BETA[0])
    for c in _ERF_BETA[1:]:
        q = q * x2 + c
    return x * p / q


def _gelu_exact(x):
    return x * 0.5 * (1.0 + _erf_f32(x * np.float32(1.0 / np.sqrt(2.0))))


# ------------------------------ Pallas kernel --------------------------------
def _decoder_stack_kernel(
    dec_ref, enc_ref, smask_ref, emask_ref,
    w_qkv_s, b_qkv_s, w_o_s, b_o_s,
    w_q_c, b_q_c, w_kv_c, b_kv_c, w_o_c, b_o_c,
    w_ff1, b_ff1, w_ff2, b_ff2, ln_g, ln_b,
    out_ref, sprob_ref, eprob_ref,
    qg_ref, kg_ref, vg_ref, smaskg_ref, emaskg_ref,
    *, n_layer, n_head, d_head, eps, lk_pad):
    B, S, D = dec_ref.shape
    Se = enc_ref.shape[1]
    Hd = n_head * d_head
    G = n_head * B                       # head-folded batch dim, g = h*B + b
    N = B * S
    scale = np.float32(1.0 / np.sqrt(d_head))
    f32 = jnp.float32

    # Flatten activations once; all linear layers work on 2-D slabs.
    x2 = dec_ref[...].reshape(N, D)
    enc2 = enc_ref[...].reshape(B * Se, D)

    # ---- hoisted once per kernel: zero K/V lane-padding, additive masks ----
    kg_ref[...] = jnp.zeros(kg_ref.shape, f32)
    vg_ref[...] = jnp.zeros(vg_ref.shape, f32)

    col = jax.lax.broadcasted_iota(jnp.int32, (B, S, lk_pad), 2)
    # Real masked keys get -1e9 (same constant as the reference). Lane padding
    # beyond the true key length gets a far larger penalty so it can never
    # receive probability mass (even for pathological fully-masked rows).
    smask_add = smask_ref[...] * f32(-1e9) + jnp.where(col >= S, f32(-1e30), f32(0.0))
    emask_add = emask_ref[...] * f32(-1e9) + jnp.where(col >= Se, f32(-1e30), f32(0.0))
    for h in range(n_head):
        smaskg_ref[h * B:(h + 1) * B] = smask_add
        emaskg_ref[h * B:(h + 1) * B] = emask_add

    def layer_norm(v, g, b):
        mu = jnp.mean(v, axis=-1, keepdims=True)
        var = jnp.mean((v - mu) ** 2, axis=-1, keepdims=True)   # biased (torch)
        return (v - mu) * jax.lax.rsqrt(var + eps) * g + b

    def attend(q3, k3, v3, Lk, maskg_ref, w_o_h, b_o_l, prob_ref, layer_idx):
        # q3: (B, S, Hd); k3/v3: (B, Lk, Hd).  Fold heads into the leading dim
        # (g = h*B + b) via scratch sub-stores — no transposes, no lane concats.
        for h in range(n_head):
            sl = slice(h * d_head, (h + 1) * d_head)
            qg_ref[h * B:(h + 1) * B] = q3[:, :, sl]
            kg_ref[h * B:(h + 1) * B, :Lk, :] = k3[:, :, sl]
            vg_ref[h * B:(h + 1) * B, :Lk, :] = v3[:, :, sl]
        qg = qg_ref[...] * scale             # (G, S, dh)
        kg = kg_ref[...]                     # (G, lk_pad, dh), zero-padded keys
        vg = vg_ref[...]                     # (G, lk_pad, dh), zero-padded values

        scores = jnp.einsum('gqd,gkd->gqk', qg, kg,
                            preferred_element_type=f32) + maskg_ref[...]
        m = jnp.max(scores, axis=-1, keepdims=True)
        e = jnp.exp(scores - m)
        p = e * pl.reciprocal(jnp.sum(e, axis=-1, keepdims=True), approx=True)

        prob_ref[layer_idx] = p              # (G, S, lk_pad): one lane-dense store

        ctx = jnp.einsum('gqk,gkd->gqd', p, vg, preferred_element_type=f32)
        # (G, S, dh) -> (H, N, dh): leading-dim split + leading->sublane merge.
        ctx_h = ctx.reshape(n_head, B, S, d_head).reshape(n_head, N, d_head)
        o = jnp.einsum('hnd,hde->hne', ctx_h, w_o_h, preferred_element_type=f32)
        out = o[0]
        for h in range(1, n_head):
            out = out + o[h]
        return out + b_o_l

    # Static unrolled loop over decoder layers; activations never leave VMEM.
    for l in range(n_layer):
        g_all = ln_g[l]          # (3, D)
        b_all = ln_b[l]

        # --- masked self attention (single packed QKV matmul) ---
        qkv = jnp.dot(x2, w_qkv_s[l], preferred_element_type=f32) + b_qkv_s[l]
        q3 = qkv[:, :Hd].reshape(B, S, Hd)
        k3 = qkv[:, Hd:2 * Hd].reshape(B, S, Hd)
        v3 = qkv[:, 2 * Hd:].reshape(B, S, Hd)
        att = attend(q3, k3, v3, S, smaskg_ref, w_o_s[l], b_o_s[l], sprob_ref, l)
        y1 = layer_norm(att + x2, g_all[0:1], b_all[0:1])

        # --- decoder-encoder attention (packed KV matmul) ---
        qc = jnp.dot(y1, w_q_c[l], preferred_element_type=f32) + b_q_c[l]
        kvc = jnp.dot(enc2, w_kv_c[l], preferred_element_type=f32) + b_kv_c[l]
        q3c = qc.reshape(B, S, Hd)
        k3c = kvc[:, :Hd].reshape(B, Se, Hd)
        v3c = kvc[:, Hd:].reshape(B, Se, Hd)
        cross = attend(q3c, k3c, v3c, Se, emaskg_ref, w_o_c[l], b_o_c[l], eprob_ref, l)
        y2 = layer_norm(cross + y1, g_all[1:2], b_all[1:2])

        # --- position-wise FFN (Conv1d k=1 == Linear) ---
        h1 = _gelu_exact(jnp.dot(y2, w_ff1[l], preferred_element_type=f32) + b_ff1[l])
        ff = jnp.dot(h1, w_ff2[l], preferred_element_type=f32) + b_ff2[l]
        x2 = layer_norm(ff + y2, g_all[2:3], b_all[2:3])

    out_ref[...] = x2.reshape(B, S, D)


def decoder_stack_pallas(dec_x, enc_x, smask_p, emask_p, packed, cfg):
    """Single pallas_call for the whole decoder stack (all layers, all batch)."""
    B, S, D = dec_x.shape
    Se = enc_x.shape[1]
    L, H, dh, F = cfg.n_layer, cfg.n_head, cfg.d_head, cfg.d_ff
    Hd = H * dh
    G = H * B
    lk_pad = smask_p.shape[-1]

    kernel = functools.partial(
        _decoder_stack_kernel,
        n_layer=L, n_head=H, d_head=dh,
        eps=np.float32(cfg.layer_norm_epsilon), lk_pad=lk_pad)

    vmem_spec = pl.BlockSpec(memory_space=pltpu.MemorySpace.VMEM)
    n_inputs = 4 + len(packed)

    # Advisory cost hint so XLA schedules the surrounding glue ops well.
    N = B * S
    attn_flops = 2 * (2 * G * S * lk_pad * dh) + 2 * H * N * dh * D
    per_layer_flops = (2 * N * D * 3 * Hd                # self QKV proj
                       + 2 * N * D * Hd                  # cross Q proj
                       + 2 * (B * Se) * D * 2 * Hd       # cross KV proj
                       + 2 * attn_flops                  # two attention blocks
                       + 4 * N * D * F)                  # FFN
    out_shapes = ((B, S, D), (L, G, S, lk_pad), (L, G, S, lk_pad))
    in_bytes = 4 * (int(np.prod(dec_x.shape)) + int(np.prod(enc_x.shape)) +
                    int(np.prod(smask_p.shape)) + int(np.prod(emask_p.shape)) +
                    sum(int(np.prod(w.shape)) for w in packed))
    out_bytes = 4 * sum(int(np.prod(s)) for s in out_shapes)
    cost = pl.CostEstimate(
        flops=int(L * per_layer_flops),
        transcendentals=int(L * (2 * G * S * lk_pad + N * F)),
        bytes_accessed=int(in_bytes + out_bytes))

    out, sprob, eprob = pl.pallas_call(
        kernel,
        out_shape=(
            jax.ShapeDtypeStruct((B, S, D), jnp.float32),
            jax.ShapeDtypeStruct((L, G, S, lk_pad), jnp.float32),   # self probs
            jax.ShapeDtypeStruct((L, G, S, lk_pad), jnp.float32),   # cross probs
        ),
        in_specs=[vmem_spec] * n_inputs,
        out_specs=(vmem_spec, vmem_spec, vmem_spec),
        scratch_shapes=[
            pltpu.VMEM((G, S, dh), jnp.float32),        # head-folded Q
            pltpu.VMEM((G, lk_pad, dh), jnp.float32),   # zero-padded head-folded K
            pltpu.VMEM((G, lk_pad, dh), jnp.float32),   # zero-padded head-folded V
            pltpu.VMEM((G, S, lk_pad), jnp.float32),    # additive self-attn mask
            pltpu.VMEM((G, S, lk_pad), jnp.float32),    # additive cross-attn mask
        ],
        cost_estimate=cost,
    )(dec_x, enc_x, smask_p, emask_p, *packed)
    return out, sprob, eprob


# ----------------------- weight packing (host side) ---------------------------
def pack_decoder_weights(params, cfg):
    layers = params['layers']
    L, H, dh, D = cfg.n_layer, cfg.n_head, cfg.d_head, cfg.d_hidn

    def stack(fn):
        return jnp.stack([fn(layers[l]) for l in range(L)], axis=0)

    w_qkv_s = stack(lambda p: jnp.concatenate([p['wq1'], p['wk1'], p['wv1']], axis=1))
    b_qkv_s = stack(lambda p: jnp.concatenate([p['bq1'], p['bk1'], p['bv1']], axis=1))
    w_o_s = stack(lambda p: p['wo1'].reshape(H, dh, D))      # head-major rows
    b_o_s = stack(lambda p: p['bo1'])
    w_q_c = stack(lambda p: p['wq2'])
    b_q_c = stack(lambda p: p['bq2'])
    w_kv_c = stack(lambda p: jnp.concatenate([p['wk2'], p['wv2']], axis=1))
    b_kv_c = stack(lambda p: jnp.concatenate([p['bk2'], p['bv2']], axis=1))
    w_o_c = stack(lambda p: p['wo2'].reshape(H, dh, D))
    b_o_c = stack(lambda p: p['bo2'])
    w_ff1 = stack(lambda p: p['wf1'])
    b_ff1 = stack(lambda p: p['bf1'])
    w_ff2 = stack(lambda p: p['wf2'])
    b_ff2 = stack(lambda p: p['bf2'])
    ln_g = stack(lambda p: jnp.concatenate([p['g1'], p['g2'], p['g3']], axis=0))
    ln_b = stack(lambda p: jnp.concatenate([p['be1'], p['be2'], p['be3']], axis=0))
    return (w_qkv_s, b_qkv_s, w_o_s, b_o_s, w_q_c, b_q_c, w_kv_c, b_kv_c,
            w_o_c, b_o_c, w_ff1, b_ff1, w_ff2, b_ff2, ln_g, ln_b)


# --------------------------- glue (plain JAX, jitted) --------------------------
def get_attn_pad_mask(seq_q, seq_k, i_pad):
    B, Lq = seq_q.shape
    Lk = seq_k.shape[1]
    pad = (seq_k == i_pad).astype(jnp.int32)[:, None, :]
    return jnp.broadcast_to(pad, (B, Lq, Lk))


def get_attn_decoder_mask(seq):
    B, L = seq.shape
    m = jnp.triu(jnp.ones((L, L), dtype=jnp.int32), k=1)
    return jnp.broadcast_to(m[None], (B, L, L))


def decoder_forward(dec_inputs, enc_inputs, enc_outputs, params, cfg):
    # NOTE: the reference code computes `positions` but then indexes pos_emb
    # with dec_inputs (token ids) — we reproduce that behavior exactly.  That
    # silently requires n_dec_vocab <= n_dec_seq + 1, so assert it explicitly.
    assert cfg.n_dec_vocab <= cfg.n_dec_seq + 1, \
        "pos_emb is indexed by token ids (reference bug); vocab must fit table"
    B, S = dec_inputs.shape
    Se = enc_inputs.shape[1]
    lk_pad = LANE * int(np.ceil(max(S, Se) / LANE))

    dec_outputs = (jnp.take(params['dec_emb'], dec_inputs, axis=0) +
                   jnp.take(params['pos_emb'], dec_inputs, axis=0))

    pad_mask = get_attn_pad_mask(dec_inputs, dec_inputs, cfg.i_pad)
    dec_mask = get_attn_decoder_mask(dec_inputs)
    smask = ((pad_mask + dec_mask) > 0).astype(jnp.float32)          # (B,S,S)
    emask = get_attn_pad_mask(dec_inputs, enc_inputs,
                              cfg.i_pad).astype(jnp.float32)         # (B,S,Se)

    # Pad the key dim of both 0/1 masks to the 128-lane width (padding counts
    # as "masked"), so in-kernel scores / probs / stores are lane-dense.
    smask_p = jnp.concatenate(
        [smask, jnp.ones((B, S, lk_pad - S), jnp.float32)], axis=-1)
    emask_p = jnp.concatenate(
        [emask, jnp.ones((B, S, lk_pad - Se), jnp.float32)], axis=-1)

    packed = pack_decoder_weights(params, cfg)
    out, sprob, eprob = decoder_stack_pallas(
        dec_outputs, enc_outputs, smask_p, emask_p, packed, cfg)

    # Un-pad / un-fold the lane-dense prob slabs (free layout plumbing under
    # jit): kernel layout is (L, H*B, S, lk_pad) with g = h*B + b.
    L, H = cfg.n_layer, cfg.n_head
    sp = sprob[:, :, :, :S].reshape(L, H, B, S, S)
    ep = eprob[:, :, :, :Se].reshape(L, H, B, S, Se)
    self_attn_probs = [jnp.transpose(sp[l], (1, 0, 2, 3)) for l in range(L)]
    dec_enc_attn_probs = [jnp.transpose(ep[l], (1, 0, 2, 3)) for l in range(L)]
    return out, self_attn_probs, dec_enc_attn_probs


# --------------------- pure-JAX reference (correctness check) -----------------
def _ref_decoder_forward(dec_inputs, enc_inputs, enc_outputs, params, cfg):
    eps = cfg.layer_norm_epsilon
    x = (jnp.take(params['dec_emb'], dec_inputs, axis=0) +
         jnp.take(params['pos_emb'], dec_inputs, axis=0))
    pad_mask = get_attn_pad_mask(dec_inputs, dec_inputs, cfg.i_pad)
    dec_mask = get_attn_decoder_mask(dec_inputs)
    smask = ((pad_mask + dec_mask) > 0).astype(jnp.float32)
    emask = get_attn_pad_mask(dec_inputs, enc_inputs, cfg.i_pad).astype(jnp.float32)

    def ln(v, g, b):
        mu = v.mean(-1, keepdims=True)
        var = ((v - mu) ** 2).mean(-1, keepdims=True)
        return (v - mu) / jnp.sqrt(var + eps) * g + b

    def mha(q_in, kv_in, mask, wq, bq, wk, bk, wv, bv, wo, bo):
        H, dh = cfg.n_head, cfg.d_head
        B, Lq, _ = q_in.shape
        Lk = kv_in.shape[1]
        q = (q_in @ wq + bq).reshape(B, Lq, H, dh).transpose(0, 2, 1, 3)
        k = (kv_in @ wk + bk).reshape(B, Lk, H, dh).transpose(0, 2, 1, 3)
        v = (kv_in @ wv + bv).reshape(B, Lk, H, dh).transpose(0, 2, 1, 3)
        s = jnp.einsum('bhqd,bhkd->bhqk', q, k) / np.float32(np.sqrt(dh))
        s = jnp.where(mask[:, None] > 0.5, jnp.float32(-1e9), s)
        p = jax.nn.softmax(s, axis=-1)
        ctx = jnp.einsum('bhqk,bhkd->bhqd', p, v).transpose(0, 2, 1, 3)
        ctx = ctx.reshape(B, Lq, H * dh)
        return ctx @ wo + bo, p

    sprobs, eprobs = [], []
    for lp in params['layers']:
        att, sp = mha(x, x, smask, lp['wq1'], lp['bq1'], lp['wk1'], lp['bk1'],
                      lp['wv1'], lp['bv1'], lp['wo1'], lp['bo1'])
        y1 = ln(att + x, lp['g1'], lp['be1'])
        cross, ep = mha(y1, enc_outputs, emask, lp['wq2'], lp['bq2'], lp['wk2'],
                        lp['bk2'], lp['wv2'], lp['bv2'], lp['wo2'], lp['bo2'])
        y2 = ln(cross + y1, lp['g2'], lp['be2'])
        h1 = jax.nn.gelu(y2 @ lp['wf1'] + lp['bf1'], approximate=False)
        ff = h1 @ lp['wf2'] + lp['bf2']
        x = ln(ff + y2, lp['g3'], lp['be3'])
        sprobs.append(sp)
        eprobs.append(ep)
    return x, sprobs, eprobs


# --------------------------- deterministic init -------------------------------
def init_params(cfg, key):
    D, H, dh, F = cfg.d_hidn, cfg.n_head, cfg.d_head, cfg.d_ff
    keys = jax.random.split(key, cfg.n_layer + 1)

    def lin(kk, din, dout):
        return jax.random.normal(kk, (din, dout), jnp.float32) * 0.02

    def bias(kk, dout):
        return jax.random.normal(kk, (1, dout), jnp.float32) * 0.02

    params = {
        'dec_emb': jax.random.normal(keys[0], (cfg.n_dec_vocab, D), jnp.float32) * 0.02,
        'pos_emb': jnp.asarray(get_sinusoid_table(cfg.n_dec_seq + 1, D)),
        'layers': [],
    }
    for li in range(cfg.n_layer):
        k = jax.random.split(keys[li + 1], 20)
        layer = {
            'wq1': lin(k[0], D, H * dh), 'bq1': bias(k[1], H * dh),
            'wk1': lin(k[2], D, H * dh), 'bk1': bias(k[3], H * dh),
            'wv1': lin(k[4], D, H * dh), 'bv1': bias(k[5], H * dh),
            'wo1': lin(k[6], H * dh, D), 'bo1': bias(k[7], D),
            'g1': jnp.ones((1, D), jnp.float32), 'be1': jnp.zeros((1, D), jnp.float32),
            'wq2': lin(k[8], D, H * dh), 'bq2': bias(k[9], H * dh),
            'wk2': lin(k[10], D, H * dh), 'bk2': bias(k[11], H * dh),
            'wv2': lin(k[12], D, H * dh), 'bv2': bias(k[13], H * dh),
            'wo2': lin(k[14], H * dh, D), 'bo2': bias(k[15], D),
            'g2': jnp.ones((1, D), jnp.float32), 'be2': jnp.zeros((1, D), jnp.float32),
            'wf1': lin(k[16], D, F), 'bf1': bias(k[17], F),
            'wf2': lin(k[18], F, D), 'bf2': bias(k[19], D),
            'g3': jnp.ones((1, D), jnp.float32), 'be3': jnp.zeros((1, D), jnp.float32),
        }
        params['layers'].append(layer)
    return params


# ---------------------------------- main --------------------------------------
if __name__ == "__main__":
    cfg = Config()
    key = jax.random.PRNGKey(0)
    kp, kd, ke, ko = jax.random.split(key, 4)
    params = init_params(cfg, kp)

    B = 2
    dec_inputs = jax.random.randint(kd, (B, cfg.n_dec_seq), 0, cfg.n_dec_vocab,
                                    dtype=jnp.int32)
    # First token forced non-pad: a fully-masked query row is degenerate and
    # the additive -1e9 mask (perf review) intentionally differs there from
    # the reference's masked_fill.  Last token pad to exercise pad masking.
    dec_inputs = dec_inputs.at[:, 0].set(1)
    dec_inputs = dec_inputs.at[:, -1].set(cfg.i_pad)
    enc_inputs = jax.random.randint(ke, (B, cfg.n_enc_seq), 0, cfg.n_dec_vocab,
                                    dtype=jnp.int32)
    enc_inputs = enc_inputs.at[:, 0].set(1)
    enc_inputs = enc_inputs.at[:, -2:].set(cfg.i_pad)
    enc_outputs = jax.random.normal(ko, (B, cfg.n_enc_seq, cfg.d_hidn), jnp.float32)

    fwd = jax.jit(functools.partial(decoder_forward, cfg=cfg))
    dec_out, self_probs, enc_probs = fwd(dec_inputs, enc_inputs, enc_outputs, params)
    jax.block_until_ready(dec_out)
    for p in self_probs + enc_probs:
        jax.block_until_ready(p)

    assert dec_out.shape == (B, cfg.n_dec_seq, cfg.d_hidn)
    assert self_probs[0].shape == (B, cfg.n_head, cfg.n_dec_seq, cfg.n_dec_seq)
    assert enc_probs[0].shape == (B, cfg.n_head, cfg.n_dec_seq, cfg.n_enc_seq)
    assert bool(jnp.all(jnp.isfinite(dec_out)))

    # Numerical check against a pure-JAX reference of the same forward pass.
    ref_out, ref_sp, ref_ep = _ref_decoder_forward(
        dec_inputs, enc_inputs, enc_outputs, params, cfg)
    assert bool(jnp.allclose(dec_out, ref_out, atol=2e-3, rtol=2e-3))
    for a, b in zip(self_probs, ref_sp):
        assert bool(jnp.allclose(a, b, atol=2e-3, rtol=2e-3))
    for a, b in zip(enc_probs, ref_ep):
        assert bool(jnp.allclose(a, b, atol=2e-3, rtol=2e-3))

    print("KERNEL_OK")
</pallas_src>

<mosaic_0001>
module attributes {stable_mosaic.version = 11 : i64} {
  func.func @_decoder_stack_kernel(%arg0: memref<2x8x32xf32, #tpu.memory_space<vmem>>, %arg1: memref<2x8x32xf32, #tpu.memory_space<vmem>>, %arg2: memref<2x8x128xf32, #tpu.memory_space<vmem>>, %arg3: memref<2x8x128xf32, #tpu.memory_space<vmem>>, %arg4: memref<2x32x96xf32, #tpu.memory_space<vmem>>, %arg5: memref<2x1x96xf32, #tpu.memory_space<vmem>>, %arg6: memref<2x2x16x32xf32, #tpu.memory_space<vmem>>, %arg7: memref<2x1x32xf32, #tpu.memory_space<vmem>>, %arg8: memref<2x32x32xf32, #tpu.memory_space<vmem>>, %arg9: memref<2x1x32xf32, #tpu.memory_space<vmem>>, %arg10: memref<2x32x64xf32, #tpu.memory_space<vmem>>, %arg11: memref<2x1x64xf32, #tpu.memory_space<vmem>>, %arg12: memref<2x2x16x32xf32, #tpu.memory_space<vmem>>, %arg13: memref<2x1x32xf32, #tpu.memory_space<vmem>>, %arg14: memref<2x32x64xf32, #tpu.memory_space<vmem>>, %arg15: memref<2x1x64xf32, #tpu.memory_space<vmem>>, %arg16: memref<2x64x32xf32, #tpu.memory_space<vmem>>, %arg17: memref<2x1x32xf32, #tpu.memory_space<vmem>>, %arg18: memref<2x3x32xf32, #tpu.memory_space<vmem>>, %arg19: memref<2x3x32xf32, #tpu.memory_space<vmem>>, %arg20: memref<2x8x32xf32, #tpu.memory_space<vmem>>, %arg21: memref<2x4x8x128xf32, #tpu.memory_space<vmem>>, %arg22: memref<2x4x8x128xf32, #tpu.memory_space<vmem>>, %arg23: memref<4x8x16xf32, #tpu.memory_space<vmem>>, %arg24: memref<4x128x16xf32, #tpu.memory_space<vmem>>, %arg25: memref<4x128x16xf32, #tpu.memory_space<vmem>>, %arg26: memref<4x8x128xf32, #tpu.memory_space<vmem>>, %arg27: memref<4x8x128xf32, #tpu.memory_space<vmem>>) attributes {dimension_semantics = [], scalar_prefetch = 0 : i64, scratch_operands = 5 : i64, tpu.core_type = #tpu.core_type<tc>} {
    %c0 = arith.constant 0 : index
    %c0_0 = arith.constant 0 : index
    %c0_1 = arith.constant 0 : index
    %0 = vector.load %arg0[%c0, %c0_0, %c0_1] : memref<2x8x32xf32, #tpu.memory_space<vmem>>, vector<2x8x32xf32>
    %1 = vector.shape_cast %0 : vector<2x8x32xf32> to vector<16x32xf32>
    %c0_2 = arith.constant 0 : index
    %c0_3 = arith.constant 0 : index
    %c0_4 = arith.constant 0 : index
    %2 = vector.load %arg1[%c0_2, %c0_3, %c0_4] : memref<2x8x32xf32, #tpu.memory_space<vmem>>, vector<2x8x32xf32>
    %3 = vector.shape_cast %2 : vector<2x8x32xf32> to vector<16x32xf32>
    %cst = arith.constant 0.000000e+00 : f32
    %4 = vector.broadcast %cst : f32 to vector<4x128x16xf32>
    %c0_5 = arith.constant 0 : index
    %c0_6 = arith.constant 0 : index
    %c0_7 = arith.constant 0 : index
    %5 = vector.load %arg24[%c0_5, %c0_6, %c0_7] : memref<4x128x16xf32, #tpu.memory_space<vmem>>, vector<4x128x16xf32>
    tpu.vector_store %arg24[%c0_5, %c0_6, %c0_7], %4 {strides = array<i32>} : memref<4x128x16xf32, #tpu.memory_space<vmem>>, vector<4x128x16xf32>,
    %cst_8 = arith.constant 0.000000e+00 : f32
    %6 = vector.broadcast %cst_8 : f32 to vector<4x128x16xf32>
    %c0_9 = arith.constant 0 : index
    %c0_10 = arith.constant 0 : index
    %c0_11 = arith.constant 0 : index
    %7 = vector.load %arg25[%c0_9, %c0_10, %c0_11] : memref<4x128x16xf32, #tpu.memory_space<vmem>>, vector<4x128x16xf32>
    tpu.vector_store %arg25[%c0_9, %c0_10, %c0_11], %6 {strides = array<i32>} : memref<4x128x16xf32, #tpu.memory_space<vmem>>, vector<4x128x16xf32>,
    %8 = tpu.iota {dimensions = array<i32: 2>} : vector<2x8x128xi32>
    %c0_12 = arith.constant 0 : index
    %c0_13 = arith.constant 0 : index
    %c0_14 = arith.constant 0 : index
    %9 = vector.load %arg2[%c0_12, %c0_13, %c0_14] : memref<2x8x128xf32, #tpu.memory_space<vmem>>, vector<2x8x128xf32>
    %cst_15 = arith.constant -1.000000e+09 : f32
    %10 = vector.broadcast %cst_15 : f32 to vector<2x8x128xf32>
    %11 = arith.mulf %9, %10 : vector<2x8x128xf32>
    %c8_i32 = arith.constant 8 : i32
    %12 = vector.broadcast %c8_i32 : i32 to vector<2x8x128xi32>
    %13 = arith.cmpi sge, %8, %12 : vector<2x8x128xi32>
    %cst_16 = arith.constant -1.000000e+30 : f32
    %cst_17 = arith.constant 0.000000e+00 : f32
    %14 = vector.broadcast %cst_16 : f32 to vector<2x8x128xf32>
    %15 = vector.broadcast %cst_17 : f32 to vector<2x8x128xf32>
    %16 = arith.select %13, %14, %15 : vector<2x8x128xi1>, vector<2x8x128xf32>
    %17 = arith.addf %11, %16 : vector<2x8x128xf32>
    %c0_18 = arith.constant 0 : index
    %c0_19 = arith.constant 0 : index
    %c0_20 = arith.constant 0 : index
    %18 = vector.load %arg3[%c0_18, %c0_19, %c0_20] : memref<2x8x128xf32, #tpu.memory_space<vmem>>, vector<2x8x128xf32>
    %cst_21 = arith.constant -1.000000e+09 : f32
    %19 = vector.broadcast %cst_21 : f32 to vector<2x8x128xf32>
    %20 = arith.mulf %18, %19 : vector<2x8x128xf32>
    %c8_i32_22 = arith.constant 8 : i32
    %21 = vector.broadcast %c8_i32_22 : i32 to vector<2x8x128xi32>
    %22 = arith.cmpi sge, %8, %21 : vector<2x8x128xi32>
    %cst_23 = arith.constant -1.000000e+30 : f32
    %cst_24 = arith.constant 0.000000e+00 : f32
    %23 = vector.broadcast %cst_23 : f32 to vector<2x8x128xf32>
    %24 = vector.broadcast %cst_24 : f32 to vector<2x8x128xf32>
    %25 = arith.select %22, %23, %24 : vector<2x8x128xi1>, vector<2x8x128xf32>
    %26 = arith.addf %20, %25 : vector<2x8x128xf32>
    %c0_25 = arith.constant 0 : index
    %c0_26 = arith.constant 0 : index
    %c0_27 = arith.constant 0 : index
    %27 = vector.load %arg26[%c0_25, %c0_26, %c0_27] : memref<4x8x128xf32, #tpu.memory_space<vmem>>, vector<2x8x128xf32>
    tpu.vector_store %arg26[%c0_25, %c0_26, %c0_27], %17 {strides = array<i32>} : memref<4x8x128xf32, #tpu.memory_space<vmem>>, vector<2x8x128xf32>,
    %c0_28 = arith.constant 0 : index
    %c0_29 = arith.constant 0 : index
    %c0_30 = arith.constant 0 : index
    %28 = vector.load %arg27[%c0_28, %c0_29, %c0_30] : memref<4x8x128xf32, #tpu.memory_space<vmem>>, vector<2x8x128xf32>
    tpu.vector_store %arg27[%c0_28, %c0_29, %c0_30], %26 {strides = array<i32>} : memref<4x8x128xf32, #tpu.memory_space<vmem>>, vector<2x8x128xf32>,
    %c2 = arith.constant 2 : index
    %c0_31 = arith.constant 0 : index
    %c0_32 = arith.constant 0 : index
    %29 = vector.load %arg26[%c2, %c0_31, %c0_32] : memref<4x8x128xf32, #tpu.memory_space<vmem>>, vector<2x8x128xf32>
    tpu.vector_store %arg26[%c2, %c0_31, %c0_32], %17 {strides = array<i32>} : memref<4x8x128xf32, #tpu.memory_space<vmem>>, vector<2x8x128xf32>,
    %c2_33 = arith.constant 2 : index
    %c0_34 = arith.constant 0 : index
    %c0_35 = arith.constant 0 : index
    %30 = vector.load %arg27[%c2_33, %c0_34, %c0_35] : memref<4x8x128xf32, #tpu.memory_space<vmem>>, vector<2x8x128xf32>
    tpu.vector_store %arg27[%c2_33, %c0_34, %c0_35], %26 {strides = array<i32>} : memref<4x8x128xf32, #tpu.memory_space<vmem>>, vector<2x8x128xf32>,
    %c0_36 = arith.constant 0 : index
    %c0_37 = arith.constant 0 : index
    %c0_38 = arith.constant 0 : index
    %31 = vector.load %arg18[%c0_36, %c0_37, %c0_38] : memref<2x3x32xf32, #tpu.memory_space<vmem>>, vector<1x3x32xf32>
    %32 = vector.shape_cast %31 : vector<1x3x32xf32> to vector<3x32xf32>
    %c0_39 = arith.constant 0 : index
    %c0_40 = arith.constant 0 : index
    %c0_41 = arith.constant 0 : index
    %33 = vector.load %arg19[%c0_39, %c0_40, %c0_41] : memref<2x3x32xf32, #tpu.memory_space<vmem>>, vector<1x3x32xf32>
    %34 = vector.shape_cast %33 : vector<1x3x32xf32> to vector<3x32xf32>
    %c0_42 = arith.constant 0 : index
    %c0_43 = arith.constant 0 : index
    %c0_44 = arith.constant 0 : index
    %35 = vector.load %arg4[%c0_42, %c0_43, %c0_44] : memref<2x32x96xf32, #tpu.memory_space<vmem>>, vector<1x32x96xf32>
    %36 = vector.shape_cast %35 : vector<1x32x96xf32> to vector<32x96xf32>
    %cst_45 = arith.constant dense<0.000000e+00> : vector<16x96xf32>
    %37 = tpu.matmul %1, %36, %cst_45 {dimension_numbers = #tpu.dot_dimension_numbers<[1], [0], [0], [1], [0, 0, 1, 1], [], []>} : vector<16x32xf32>, vector<32x96xf32>, vector<16x96xf32> -> vector<16x96xf32>
    %c0_46 = arith.constant 0 : index
    %c0_47 = arith.constant 0 : index
    %c0_48 = arith.constant 0 : index
    %38 = vector.load %arg5[%c0_46, %c0_47, %c0_48] : memref<2x1x96xf32, #tpu.memory_space<vmem>>, vector<1x1x96xf32>
    %39 = vector.shape_cast %38 : vector<1x1x96xf32> to vector<1x96xf32>
    %40 = vector.broadcast %39 : vector<1x96xf32> to vector<16x96xf32>
    %41 = arith.addf %37, %40 : vector<16x96xf32>
    %42 = vector.extract_strided_slice %41 {offsets = [0, 0], sizes = [16, 32], strides = [1, 1]} : vector<16x96xf32> to vector<16x32xf32>
    %43 = vector.shape_cast %42 : vector<16x32xf32> to vector<2x8x32xf32>
    %44 = vector.extract_strided_slice %41 {offsets = [0, 32], sizes = [16, 32], strides = [1, 1]} : vector<16x96xf32> to vector<16x32xf32>
    %45 = vector.shape_cast %44 : vector<16x32xf32> to vector<2x8x32xf32>
    %46 = vector.extract_strided_slice %41 {offsets = [0, 64], sizes = [16, 32], strides = [1, 1]} : vector<16x96xf32> to vector<16x32xf32>
    %47 = vector.shape_cast %46 : vector<16x32xf32> to vector<2x8x32xf32>
    %c0_49 = arith.constant 0 : index
    %c0_50 = arith.constant 0 : index
    %c0_51 = arith.constant 0 : index
    %c0_52 = arith.constant 0 : index
    %48 = vector.load %arg6[%c0_49, %c0_50, %c0_51, %c0_52] : memref<2x2x16x32xf32, #tpu.memory_space<vmem>>, vector<1x2x16x32xf32>
    %49 = vector.shape_cast %48 : vector<1x2x16x32xf32> to vector<2x16x32xf32>
    %c0_53 = arith.constant 0 : index
    %c0_54 = arith.constant 0 : index
    %c0_55 = arith.constant 0 : index
    %50 = vector.load %arg7[%c0_53, %c0_54, %c0_55] : memref<2x1x32xf32, #tpu.memory_space<vmem>>, vector<1x1x32xf32>
    %51 = vector.shape_cast %50 : vector<1x1x32xf32> to vector<1x32xf32>
    %52 = vector.extract_strided_slice %43 {offsets = [0, 0, 0], sizes = [2, 8, 16], strides = [1, 1, 1]} : vector<2x8x32xf32> to vector<2x8x16xf32>
    %c0_56 = arith.constant 0 : index
    %c0_57 = arith.constant 0 : index
    %c0_58 = arith.constant 0 : index
    %53 = vector.load %arg23[%c0_56, %c0_57, %c0_58] : memref<4x8x16xf32, #tpu.memory_space<vmem>>, vector<2x8x16xf32>
    tpu.vector_store %arg23[%c0_56, %c0_57, %c0_58], %52 {strides = array<i32>} : memref<4x8x16xf32, #tpu.memory_space<vmem>>, vector<2x8x16xf32>,
    %54 = vector.extract_strided_slice %45 {offsets = [0, 0, 0], sizes = [2, 8, 16], strides = [1, 1, 1]} : vector<2x8x32xf32> to vector<2x8x16xf32>
    %c0_59 = arith.constant 0 : index
    %c0_60 = arith.constant 0 : index
    %c0_61 = arith.constant 0 : index
    %55 = vector.load %arg24[%c0_59, %c0_60, %c0_61] : memref<4x128x16xf32, #tpu.memory_space<vmem>>, vector<2x8x16xf32>
    tpu.vector_store %arg24[%c0_59, %c0_60, %c0_61], %54 {strides = array<i32>} : memref<4x128x16xf32, #tpu.memory_space<vmem>>, vector<2x8x16xf32>,
    %56 = vector.extract_strided_slice %47 {offsets = [0, 0, 0], sizes = [2, 8, 16], strides = [1, 1, 1]} : vector<2x8x32xf32> to vector<2x8x16xf32>
    %c0_62 = arith.constant 0 : index
    %c0_63 = arith.constant 0 : index
    %c0_64 = arith.constant 0 : index
    %57 = vector.load %arg25[%c0_62, %c0_63, %c0_64] : memref<4x128x16xf32, #tpu.memory_space<vmem>>, vector<2x8x16xf32>
    tpu.vector_store %arg25[%c0_62, %c0_63, %c0_64], %56 {strides = array<i32>} : memref<4x128x16xf32, #tpu.memory_space<vmem>>, vector<2x8x16xf32>,
    %58 = vector.extract_strided_slice %43 {offsets = [0, 0, 16], sizes = [2, 8, 16], strides = [1, 1, 1]} : vector<2x8x32xf32> to vector<2x8x16xf32>
    %c2_65 = arith.constant 2 : index
    %c0_66 = arith.constant 0 : index
    %c0_67 = arith.constant 0 : index
    %59 = vector.load %arg23[%c2_65, %c0_66, %c0_67] : memref<4x8x16xf32, #tpu.memory_space<vmem>>, vector<2x8x16xf32>
    tpu.vector_store %arg23[%c2_65, %c0_66, %c0_67], %58 {strides = array<i32>} : memref<4x8x16xf32, #tpu.memory_space<vmem>>, vector<2x8x16xf32>,
    %60 = vector.extract_strided_slice %45 {offsets = [0, 0, 16], sizes = [2, 8, 16], strides = [1, 1, 1]} : vector<2x8x32xf32> to vector<2x8x16xf32>
    %c2_68 = arith.constant 2 : index
    %c0_69 = arith.constant 0 : index
    %c0_70 = arith.constant 0 : index
    %61 = vector.load %arg24[%c2_68, %c0_69, %c0_70] : memref<4x128x16xf32, #tpu.memory_space<vmem>>, vector<2x8x16xf32>
    tpu.vector_store %arg24[%c2_68, %c0_69, %c0_70], %60 {strides = array<i32>} : memref<4x128x16xf32, #tpu.memory_space<vmem>>, vector<2x8x16xf32>,
    %62 = vector.extract_strided_slice %47 {offsets = [0, 0, 16], sizes = [2, 8, 16], strides = [1, 1, 1]} : vector<2x8x32xf32> to vector<2x8x16xf32>
    %c2_71 = arith.constant 2 : index
    %c0_72 = arith.constant 0 : index
    %c0_73 = arith.constant 0 : index
    %63 = vector.load %arg25[%c2_71, %c0_72, %c0_73] : memref<4x128x16xf32, #tpu.memory_space<vmem>>, vector<2x8x16xf32>
    tpu.vector_store %arg25[%c2_71, %c0_72, %c0_73], %62 {strides = array<i32>} : memref<4x128x16xf32, #tpu.memory_space<vmem>>, vector<2x8x16xf32>,
    %c0_74 = arith.constant 0 : index
    %c0_75 = arith.constant 0 : index
    %c0_76 = arith.constant 0 : index
    %64 = vector.load %arg23[%c0_74, %c0_75, %c0_76] : memref<4x8x16xf32, #tpu.memory_space<vmem>>, vector<4x8x16xf32>
    %cst_77 = arith.constant 2.500000e-01 : f32
    %65 = vector.broadcast %cst_77 : f32 to vector<4x8x16xf32>
    %66 = arith.mulf %64, %65 : vector<4x8x16xf32>
    %c0_78 = arith.constant 0 : index
    %c0_79 = arith.constant 0 : index
    %c0_80 = arith.constant 0 : index
    %67 = vector.load %arg24[%c0_78, %c0_79, %c0_80] : memref<4x128x16xf32, #tpu.memory_space<vmem>>, vector<4x128x16xf32>
    %c0_81 = arith.constant 0 : index
    %c0_82 = arith.constant 0 : index
    %c0_83 = arith.constant 0 : index
    %68 = vector.load %arg25[%c0_81, %c0_82, %c0_83] : memref<4x128x16xf32, #tpu.memory_space<vmem>>, vector<4x128x16xf32>
    "tpu.trace_start"() <{level = 10 : i32, message = "gqd,gkd->gqk"}> : () -> ()
    %cst_84 = arith.constant dense<0.000000e+00> : vector<4x8x128xf32>
    %69 = tpu.matmul %66, %67, %cst_84 {dimension_numbers = #tpu.dot_dimension_numbers<[2], [2], [1], [1], [0, 0, 0, 1, 1, 1], [0], [0]>} : vector<4x8x16xf32>, vector<4x128x16xf32>, vector<4x8x128xf32> -> vector<4x8x128xf32>
    "tpu.trace_stop"() : () -> ()
    %c0_85 = arith.constant 0 : index
    %c0_86 = arith.constant 0 : index
    %c0_87 = arith.constant 0 : index
    %70 = vector.load %arg26[%c0_85, %c0_86, %c0_87] : memref<4x8x128xf32, #tpu.memory_space<vmem>>, vector<4x8x128xf32>
    %71 = arith.addf %69, %70 : vector<4x8x128xf32>
    %cst_88 = arith.constant dense<0xFF800000> : vector<4x8xf32>
    %72 = vector.multi_reduction <maximumf>, %71, %cst_88 [2] : vector<4x8x128xf32> to vector<4x8xf32>
    %73 = vector.shape_cast %72 : vector<4x8xf32> to vector<4x8x1xf32>
    %74 = vector.broadcast %73 : vector<4x8x1xf32> to vector<4x8x128xf32>
    %75 = arith.subf %71, %74 : vector<4x8x128xf32>
    %76 = math.exp %75 : vector<4x8x128xf32>
    %cst_89 = arith.constant dense<0.000000e+00> : vector<4x8xf32>
    %77 = vector.multi_reduction <add>, %76, %cst_89 [2] : vector<4x8x128xf32> to vector<4x8xf32>
    %78 = vector.shape_cast %77 : vector<4x8xf32> to vector<4x8x1xf32>
    %79 = tpu.reciprocal %78 {approx = true} : vector<4x8x1xf32> -> vector<4x8x1xf32>
    %80 = vector.broadcast %79 : vector<4x8x1xf32> to vector<4x8x128xf32>
    %81 = arith.mulf %76, %80 : vector<4x8x128xf32>
    %c0_90 = arith.constant 0 : index
    %c0_91 = arith.constant 0 : index
    %c0_92 = arith.constant 0 : index
    %c0_93 = arith.constant 0 : index
    %82 = vector.load %arg21[%c0_90, %c0_91, %c0_92, %c0_93] : memref<2x4x8x128xf32, #tpu.memory_space<vmem>>, vector<1x4x8x128xf32>
    %83 = vector.shape_cast %82 : vector<1x4x8x128xf32> to vector<4x8x128xf32>
    %84 = vector.shape_cast %81 : vector<4x8x128xf32> to vector<1x4x8x128xf32>
    tpu.vector_store %arg21[%c0_90, %c0_91, %c0_92, %c0_93], %84 {strides = array<i32>} : memref<2x4x8x128xf32, #tpu.memory_space<vmem>>, vector<1x4x8x128xf32>,
    "tpu.trace_start"() <{level = 10 : i32, message = "gqk,gkd->gqd"}> : () -> ()
    %cst_94 = arith.constant dense<0.000000e+00> : vector<4x8x16xf32>
    %85 = tpu.matmul %81, %68, %cst_94 {dimension_numbers = #tpu.dot_dimension_numbers<[2], [1], [1], [2], [0, 0, 0, 1, 1, 2], [0], [0]>} : vector<4x8x128xf32>, vector<4x128x16xf32>, vector<4x8x16xf32> -> vector<4x8x16xf32>
    "tpu.trace_stop"() : () -> ()
    %86 = vector.shape_cast %85 : vector<4x8x16xf32> to vector<2x2x8x16xf32>
    %87 = vector.shape_cast %86 : vector<2x2x8x16xf32> to vector<2x16x16xf32>
    "tpu.trace_start"() <{level = 10 : i32, message = "hnd,hde->hne"}> : () -> ()
    %cst_95 = arith.constant dense<0.000000e+00> : vector<2x16x32xf32>
    %88 = tpu.matmul %87, %49, %cst_95 {dimension_numbers = #tpu.dot_dimension_numbers<[2], [1], [1], [2], [0, 0, 0, 1, 1, 2], [0], [0]>} : vector<2x16x16xf32>, vector<2x16x32xf32>, vector<2x16x32xf32> -> vector<2x16x32xf32>
    "tpu.trace_stop"() : () -> ()
    %89 = vector.extract_strided_slice %88 {offsets = [0, 0, 0], sizes = [1, 16, 32], strides = [1, 1, 1]} : vector<2x16x32xf32> to vector<1x16x32xf32>
    %90 = vector.shape_cast %89 : vector<1x16x32xf32> to vector<16x32xf32>
    %91 = vector.extract_strided_slice %88 {offsets = [1, 0, 0], sizes = [1, 16, 32], strides = [1, 1, 1]} : vector<2x16x32xf32> to vector<1x16x32xf32>
    %92 = vector.shape_cast %91 : vector<1x16x32xf32> to vector<16x32xf32>
    %93 = arith.addf %90, %92 : vector<16x32xf32>
    %94 = vector.broadcast %51 : vector<1x32xf32> to vector<16x32xf32>
    %95 = arith.addf %93, %94 : vector<16x32xf32>
    %96 = arith.addf %95, %1 : vector<16x32xf32>
    %97 = vector.extract_strided_slice %32 {offsets = [0, 0], sizes = [1, 32], strides = [1, 1]} : vector<3x32xf32> to vector<1x32xf32>
    %98 = vector.extract_strided_slice %34 {offsets = [0, 0], sizes = [1, 32], strides = [1, 1]} : vector<3x32xf32> to vector<1x32xf32>
    %cst_96 = arith.constant dense<0.000000e+00> : vector<16xf32>
    %99 = vector.multi_reduction <add>, %96, %cst_96 [1] : vector<16x32xf32> to vector<16xf32>
    %100 = vector.shape_cast %99 : vector<16xf32> to vector<16x1xf32>
    %cst_97 = arith.constant 3.200000e+01 : f32
    %101 = vector.broadcast %cst_97 : f32 to vector<16x1xf32>
    %102 = arith.divf %100, %101 : vector<16x1xf32>
    %103 = vector.broadcast %102 : vector<16x1xf32> to vector<16x32xf32>
    %104 = arith.subf %96, %103 : vector<16x32xf32>
    %105 = arith.mulf %104, %104 : vector<16x32xf32>
    %cst_98 = arith.constant dense<0.000000e+00> : vector<16xf32>
    %106 = vector.multi_reduction <add>, %105, %cst_98 [1] : vector<16x32xf32> to vector<16xf32>
    %107 = vector.shape_cast %106 : vector<16xf32> to vector<16x1xf32>
    %cst_99 = arith.constant 3.200000e+01 : f32
    %108 = vector.broadcast %cst_99 : f32 to vector<16x1xf32>
    %109 = arith.divf %107, %108 : vector<16x1xf32>
    %110 = vector.broadcast %102 : vector<16x1xf32> to vector<16x32xf32>
    %111 = arith.subf %96, %110 : vector<16x32xf32>
    %cst_100 = arith.constant 9.99999997E-7 : f32
    %112 = vector.broadcast %cst_100 : f32 to vector<16x1xf32>
    %113 = arith.addf %109, %112 : vector<16x1xf32>
    %114 = math.rsqrt %113 : vector<16x1xf32>
    %115 = vector.broadcast %114 : vector<16x1xf32> to vector<16x32xf32>
    %116 = arith.mulf %111, %115 : vector<16x32xf32>
    %117 = vector.broadcast %97 : vector<1x32xf32> to vector<16x32xf32>
    %118 = arith.mulf %116, %117 : vector<16x32xf32>
    %119 = vector.broadcast %98 : vector<1x32xf32> to vector<16x32xf32>
    %120 = arith.addf %118, %119 : vector<16x32xf32>
    %c0_101 = arith.constant 0 : index
    %c0_102 = arith.constant 0 : index
    %c0_103 = arith.constant 0 : index
    %121 = vector.load %arg8[%c0_101, %c0_102, %c0_103] : memref<2x32x32xf32, #tpu.memory_space<vmem>>, vector<1x32x32xf32>
    %122 = vector.shape_cast %121 : vector<1x32x32xf32> to vector<32x32xf32>
    %cst_104 = arith.constant dense<0.000000e+00> : vector<16x32xf32>
    %123 = tpu.matmul %120, %122, %cst_104 {dimension_numbers = #tpu.dot_dimension_numbers<[1], [0], [0], [1], [0, 0, 1, 1], [], []>} : vector<16x32xf32>, vector<32x32xf32>, vector<16x32xf32> -> vector<16x32xf32>
    %c0_105 = arith.constant 0 : index
    %c0_106 = arith.constant 0 : index
    %c0_107 = arith.constant 0 : index
    %124 = vector.load %arg9[%c0_105, %c0_106, %c0_107] : memref<2x1x32xf32, #tpu.memory_space<vmem>>, vector<1x1x32xf32>
    %125 = vector.shape_cast %124 : vector<1x1x32xf32> to vector<1x32xf32>
    %126 = vector.broadcast %125 : vector<1x32xf32> to vector<16x32xf32>
    %127 = arith.addf %123, %126 : vector<16x32xf32>
    %c0_108 = arith.constant 0 : index
    %c0_109 = arith.constant 0 : index
    %c0_110 = arith.constant 0 : index
    %128 = vector.load %arg10[%c0_108, %c0_109, %c0_110] : memref<2x32x64xf32, #tpu.memory_space<vmem>>, vector<1x32x64xf32>
    %129 = vector.shape_cast %128 : vector<1x32x64xf32> to vector<32x64xf32>
    %cst_111 = arith.constant dense<0.000000e+00> : vector<16x64xf32>
    %130 = tpu.matmul %3, %129, %cst_111 {dimension_numbers = #tpu.dot_dimension_numbers<[1], [0], [0], [1], [0, 0, 1, 1], [], []>} : vector<16x32xf32>, vector<32x64xf32>, vector<16x64xf32> -> vector<16x64xf32>
    %c0_112 = arith.constant 0 : index
    %c0_113 = arith.constant 0 : index
    %c0_114 = arith.constant 0 : index
    %131 = vector.load %arg11[%c0_112, %c0_113, %c0_114] : memref<2x1x64xf32, #tpu.memory_space<vmem>>, vector<1x1x64xf32>
    %132 = vector.shape_cast %131 : vector<1x1x64xf32> to vector<1x64xf32>
    %133 = vector.broadcast %132 : vector<1x64xf32> to vector<16x64xf32>
    %134 = arith.addf %130, %133 : vector<16x64xf32>
    %135 = vector.shape_cast %127 : vector<16x32xf32> to vector<2x8x32xf32>
    %136 = vector.extract_strided_slice %134 {offsets = [0, 0], sizes = [16, 32], strides = [1, 1]} : vector<16x64xf32> to vector<16x32xf32>
    %137 = vector.shape_cast %136 : vector<16x32xf32> to vector<2x8x32xf32>
    %138 = vector.extract_strided_slice %134 {offsets = [0, 32], sizes = [16, 32], strides = [1, 1]} : vector<16x64xf32> to vector<16x32xf32>
    %139 = vector.shape_cast %138 : vector<16x32xf32> to vector<2x8x32xf32>
    %c0_115 = arith.constant 0 : index
    %c0_116 = arith.constant 0 : index
    %c0_117 = arith.constant 0 : index
    %c0_118 = arith.constant 0 : index
    %140 = vector.load %arg12[%c0_115, %c0_116, %c0_117, %c0_118] : memref<2x2x16x32xf32, #tpu.memory_space<vmem>>, vector<1x2x16x32xf32>
    %141 = vector.shape_cast %140 : vector<1x2x16x32xf32> to vector<2x16x32xf32>
    %c0_119 = arith.constant 0 : index
    %c0_120 = arith.constant 0 : index
    %c0_121 = arith.constant 0 : index
    %142 = vector.load %arg13[%c0_119, %c0_120, %c0_121] : memref<2x1x32xf32, #tpu.memory_space<vmem>>, vector<1x1x32xf32>
    %143 = vector.shape_cast %142 : vector<1x1x32xf32> to vector<1x32xf32>
    %144 = vector.extract_strided_slice %135 {offsets = [0, 0, 0], sizes = [2, 8, 16], strides = [1, 1, 1]} : vector<2x8x32xf32> to vector<2x8x16xf32>
    %c0_122 = arith.constant 0 : index
    %c0_123 = arith.constant 0 : index
    %c0_124 = arith.constant 0 : index
    %145 = vector.load %arg23[%c0_122, %c0_123, %c0_124] : memref<4x8x16xf32, #tpu.memory_space<vmem>>, vector<2x8x16xf32>
    tpu.vector_store %arg23[%c0_122, %c0_123, %c0_124], %144 {strides = array<i32>} : memref<4x8x16xf32, #tpu.memory_space<vmem>>, vector<2x8x16xf32>,
    %146 = vector.extract_strided_slice %137 {offsets = [0, 0, 0], sizes = [2, 8, 16], strides = [1, 1, 1]} : vector<2x8x32xf32> to vector<2x8x16xf32>
    %c0_125 = arith.constant 0 : index
    %c0_126 = arith.constant 0 : index
    %c0_127 = arith.constant 0 : index
    %147 = vector.load %arg24[%c0_125, %c0_126, %c0_127] : memref<4x128x16xf32, #tpu.memory_space<vmem>>, vector<2x8x16xf32>
    tpu.vector_store %arg24[%c0_125, %c0_126, %c0_127], %146 {strides = array<i32>} : memref<4x128x16xf32, #tpu.memory_space<vmem>>, vector<2x8x16xf32>,
    %148 = vector.extract_strided_slice %139 {offsets = [0, 0, 0], sizes = [2, 8, 16], strides = [1, 1, 1]} : vector<2x8x32xf32> to vector<2x8x16xf32>
    %c0_128 = arith.constant 0 : index
    %c0_129 = arith.constant 0 : index
    %c0_130 = arith.constant 0 : index
    %149 = vector.load %arg25[%c0_128, %c0_129, %c0_130] : memref<4x128x16xf32, #tpu.memory_space<vmem>>, vector<2x8x16xf32>
    tpu.vector_store %arg25[%c0_128, %c0_129, %c0_130], %148 {strides = array<i32>} : memref<4x128x16xf32, #tpu.memory_space<vmem>>, vector<2x8x16xf32>,
    %150 = vector.extract_strided_slice %135 {offsets = [0, 0, 16], sizes = [2, 8, 16], strides = [1, 1, 1]} : vector<2x8x32xf32> to vector<2x8x16xf32>
    %c2_131 = arith.constant 2 : index
    %c0_132 = arith.constant 0 : index
    %c0_133 = arith.constant 0 : index
    %151 = vector.load %arg23[%c2_131, %c0_132, %c0_133] : memref<4x8x16xf32, #tpu.memory_space<vmem>>, vector<2x8x16xf32>
    tpu.vector_store %arg23[%c2_131, %c0_132, %c0_133], %150 {strides = array<i32>} : memref<4x8x16xf32, #tpu.memory_space<vmem>>, vector<2x8x16xf32>,
    %152 = vector.extract_strided_slice %137 {offsets = [0, 0, 16], sizes = [2, 8, 16], strides = [1, 1, 1]} : vector<2x8x32xf32> to vector<2x8x16xf32>
    %c2_134 = arith.constant 2 : index
    %c0_135 = arith.constant 0 : index
    %c0_136 = arith.constant 0 : index
    %153 = vector.load %arg24[%c2_134, %c0_135, %c0_136] : memref<4x128x16xf32, #tpu.memory_space<vmem>>, vector<2x8x16xf32>
    tpu.vector_store %arg24[%c2_134, %c0_135, %c0_136], %152 {strides = array<i32>} : memref<4x128x16xf32, #tpu.memory_space<vmem>>, vector<2x8x16xf32>,
    %154 = vector.extract_strided_slice %139 {offsets = [0, 0, 16], sizes = [2, 8, 16], strides = [1, 1, 1]} : vector<2x8x32xf32> to vector<2x8x16xf32>
    %c2_137 = arith.constant 2 : index
    %c0_138 = arith.constant 0 : index
    %c0_139 = arith.constant 0 : index
    %155 = vector.load %arg25[%c2_137, %c0_138, %c0_139] : memref<4x128x16xf32, #tpu.memory_space<vmem>>, vector<2x8x16xf32>
    tpu.vector_store %arg25[%c2_137, %c0_138, %c0_139], %154 {strides = array<i32>} : memref<4x128x16xf32, #tpu.memory_space<vmem>>, vector<2x8x16xf32>,
    %c0_140 = arith.constant 0 : index
    %c0_141 = arith.constant 0 : index
    %c0_142 = arith.constant 0 : index
    %156 = vector.load %arg23[%c0_140, %c0_141, %c0_142] : memref<4x8x16xf32, #tpu.memory_space<vmem>>, vector<4x8x16xf32>
    %cst_143 = arith.constant 2.500000e-01 : f32
    %157 = vector.broadcast %cst_143 : f32 to vector<4x8x16xf32>
    %158 = arith.mulf %156, %157 : vector<4x8x16xf32>
    %c0_144 = arith.constant 0 : index
    %c0_145 = arith.constant 0 : index
    %c0_146 = arith.constant 0 : index
    %159 = vector.load %arg24[%c0_144, %c0_145, %c0_146] : memref<4x128x16xf32, #tpu.memory_space<vmem>>, vector<4x128x16xf32>
    %c0_147 = arith.constant 0 : index
    %c0_148 = arith.constant 0 : index
    %c0_149 = arith.constant 0 : index
    %160 = vector.load %arg25[%c0_147, %c0_148, %c0_149] : memref<4x128x16xf32, #tpu.memory_space<vmem>>, vector<4x128x16xf32>
    "tpu.trace_start"() <{level = 10 : i32, message = "gqd,gkd->gqk"}> : () -> ()
    %cst_150 = arith.constant dense<0.000000e+00> : vector<4x8x128xf32>
    %161 = tpu.matmul %158, %159, %cst_150 {dimension_numbers = #tpu.dot_dimension_numbers<[2], [2], [1], [1], [0, 0, 0, 1, 1, 1], [0], [0]>} : vector<4x8x16xf32>, vector<4x128x16xf32>, vector<4x8x128xf32> -> vector<4x8x128xf32>
    "tpu.trace_stop"() : () -> ()
    %c0_151 = arith.constant 0 : index
    %c0_152 = arith.constant 0 : index
    %c0_153 = arith.constant 0 : index
    %162 = vector.load %arg27[%c0_151, %c0_152, %c0_153] : memref<4x8x128xf32, #tpu.memory_space<vmem>>, vector<4x8x128xf32>
    %163 = arith.addf %161, %162 : vector<4x8x128xf32>
    %cst_154 = arith.constant dense<0xFF800000> : vector<4x8xf32>
    %164 = vector.multi_reduction <maximumf>, %163, %cst_154 [2] : vector<4x8x128xf32> to vector<4x8xf32>
    %165 = vector.shape_cast %164 : vector<4x8xf32> to vector<4x8x1xf32>
    %166 = vector.broadcast %165 : vector<4x8x1xf32> to vector<4x8x128xf32>
    %167 = arith.subf %163, %166 : vector<4x8x128xf32>
    %168 = math.exp %167 : vector<4x8x128xf32>
    %cst_155 = arith.constant dense<0.000000e+00> : vector<4x8xf32>
    %169 = vector.multi_reduction <add>, %168, %cst_155 [2] : vector<4x8x128xf32> to vector<4x8xf32>
    %170 = vector.shape_cast %169 : vector<4x8xf32> to vector<4x8x1xf32>
    %171 = tpu.reciprocal %170 {approx = true} : vector<4x8x1xf32> -> vector<4x8x1xf32>
    %172 = vector.broadcast %171 : vector<4x8x1xf32> to vector<4x8x128xf32>
    %173 = arith.mulf %168, %172 : vector<4x8x128xf32>
    %c0_156 = arith.constant 0 : index
    %c0_157 = arith.constant 0 : index
    %c0_158 = arith.constant 0 : index
    %c0_159 = arith.constant 0 : index
    %174 = vector.load %arg22[%c0_156, %c0_157, %c0_158, %c0_159] : memref<2x4x8x128xf32, #tpu.memory_space<vmem>>, vector<1x4x8x128xf32>
    %175 = vector.shape_cast %174 : vector<1x4x8x128xf32> to vector<4x8x128xf32>
    %176 = vector.shape_cast %173 : vector<4x8x128xf32> to vector<1x4x8x128xf32>
    tpu.vector_store %arg22[%c0_156, %c0_157, %c0_158, %c0_159], %176 {strides = array<i32>} : memref<2x4x8x128xf32, #tpu.memory_space<vmem>>, vector<1x4x8x128xf32>,
    "tpu.trace_start"() <{level = 10 : i32, message = "gqk,gkd->gqd"}> : () -> ()
    %cst_160 = arith.constant dense<0.000000e+00> : vector<4x8x16xf32>
    %177 = tpu.matmul %173, %160, %cst_160 {dimension_numbers = #tpu.dot_dimension_numbers<[2], [1], [1], [2], [0, 0, 0, 1, 1, 2], [0], [0]>} : vector<4x8x128xf32>, vector<4x128x16xf32>, vector<4x8x16xf32> -> vector<4x8x16xf32>
    "tpu.trace_stop"() : () -> ()
    %178 = vector.shape_cast %177 : vector<4x8x16xf32> to vector<2x2x8x16xf32>
    %179 = vector.shape_cast %178 : vector<2x2x8x16xf32> to vector<2x16x16xf32>
    "tpu.trace_start"() <{level = 10 : i32, message = "hnd,hde->hne"}> : () -> ()
    %cst_161 = arith.constant dense<0.000000e+00> : vector<2x16x32xf32>
    %180 = tpu.matmul %179, %141, %cst_161 {dimension_numbers = #tpu.dot_dimension_numbers<[2], [1], [1], [2], [0, 0, 0, 1, 1, 2], [0], [0]>} : vector<2x16x16xf32>, vector<2x16x32xf32>, vector<2x16x32xf32> -> vector<2x16x32xf32>
    "tpu.trace_stop"() : () -> ()
    %181 = vector.extract_strided_slice %180 {offsets = [0, 0, 0], sizes = [1, 16, 32], strides = [1, 1, 1]} : vector<2x16x32xf32> to vector<1x16x32xf32>
    %182 = vector.shape_cast %181 : vector<1x16x32xf32> to vector<16x32xf32>
    %183 = vector.extract_strided_slice %180 {offsets = [1, 0, 0], sizes = [1, 16, 32], strides = [1, 1, 1]} : vector<2x16x32xf32> to vector<1x16x32xf32>
    %184 = vector.shape_cast %183 : vector<1x16x32xf32> to vector<16x32xf32>
    %185 = arith.addf %182, %184 : vector<16x32xf32>
    %186 = vector.broadcast %143 : vector<1x32xf32> to vector<16x32xf32>
    %187 = arith.addf %185, %186 : vector<16x32xf32>
    %188 = arith.addf %187, %120 : vector<16x32xf32>
    %189 = vector.extract_strided_slice %32 {offsets = [1, 0], sizes = [1, 32], strides = [1, 1]} : vector<3x32xf32> to vector<1x32xf32>
    %190 = vector.extract_strided_slice %34 {offsets = [1, 0], sizes = [1, 32], strides = [1, 1]} : vector<3x32xf32> to vector<1x32xf32>
    %cst_162 = arith.constant dense<0.000000e+00> : vector<16xf32>
    %191 = vector.multi_reduction <add>, %188, %cst_162 [1] : vector<16x32xf32> to vector<16xf32>
    %192 = vector.shape_cast %191 : vector<16xf32> to vector<16x1xf32>
    %cst_163 = arith.constant 3.200000e+01 : f32
    %193 = vector.broadcast %cst_163 : f32 to vector<16x1xf32>
    %194 = arith.divf %192, %193 : vector<16x1xf32>
    %195 = vector.broadcast %194 : vector<16x1xf32> to vector<16x32xf32>
    %196 = arith.subf %188, %195 : vector<16x32xf32>
    %197 = arith.mulf %196, %196 : vector<16x32xf32>
    %cst_164 = arith.constant dense<0.000000e+00> : vector<16xf32>
    %198 = vector.multi_reduction <add>, %197, %cst_164 [1] : vector<16x32xf32> to vector<16xf32>
    %199 = vector.shape_cast %198 : vector<16xf32> to vector<16x1xf32>
    %cst_165 = arith.constant 3.200000e+01 : f32
    %200 = vector.broadcast %cst_165 : f32 to vector<16x1xf32>
    %201 = arith.divf %199, %200 : vector<16x1xf32>
    %202 = vector.broadcast %194 : vector<16x1xf32> to vector<16x32xf32>
    %203 = arith.subf %188, %202 : vector<16x32xf32>
    %cst_166 = arith.constant 9.99999997E-7 : f32
    %204 = vector.broadcast %cst_166 : f32 to vector<16x1xf32>
    %205 = arith.addf %201, %204 : vector<16x1xf32>
    %206 = math.rsqrt %205 : vector<16x1xf32>
    %207 = vector.broadcast %206 : vector<16x1xf32> to vector<16x32xf32>
    %208 = arith.mulf %203, %207 : vector<16x32xf32>
    %209 = vector.broadcast %189 : vector<1x32xf32> to vector<16x32xf32>
    %210 = arith.mulf %208, %209 : vector<16x32xf32>
    %211 = vector.broadcast %190 : vector<1x32xf32> to vector<16x32xf32>
    %212 = arith.addf %210, %211 : vector<16x32xf32>
    %c0_167 = arith.constant 0 : index
    %c0_168 = arith.constant 0 : index
    %c0_169 = arith.constant 0 : index
    %213 = vector.load %arg14[%c0_167, %c0_168, %c0_169] : memref<2x32x64xf32, #tpu.memory_space<vmem>>, vector<1x32x64xf32>
    %214 = vector.shape_cast %213 : vector<1x32x64xf32> to vector<32x64xf32>
    %cst_170 = arith.constant dense<0.000000e+00> : vector<16x64xf32>
    %215 = tpu.matmul %212, %214, %cst_170 {dimension_numbers = #tpu.dot_dimension_numbers<[1], [0], [0], [1], [0, 0, 1, 1], [], []>} : vector<16x32xf32>, vector<32x64xf32>, vector<16x64xf32> -> vector<16x64xf32>
    %c0_171 = arith.constant 0 : index
    %c0_172 = arith.constant 0 : index
    %c0_173 = arith.constant 0 : index
    %216 = vector.load %arg15[%c0_171, %c0_172, %c0_173] : memref<2x1x64xf32, #tpu.memory_space<vmem>>, vector<1x1x64xf32>
    %217 = vector.shape_cast %216 : vector<1x1x64xf32> to vector<1x64xf32>
    %218 = vector.broadcast %217 : vector<1x64xf32> to vector<16x64xf32>
    %219 = arith.addf %215, %218 : vector<16x64xf32>
    %cst_174 = arith.constant 5.000000e-01 : f32
    %220 = vector.broadcast %cst_174 : f32 to vector<16x64xf32>
    %221 = arith.mulf %219, %220 : vector<16x64xf32>
    %cst_175 = arith.constant 0.707106769 : f32
    %222 = vector.broadcast %cst_175 : f32 to vector<16x64xf32>
    %223 = arith.mulf %219, %222 : vector<16x64xf32>
    %cst_176 = arith.constant -4.000000e+00 : f32
    %cst_177 = arith.constant 4.000000e+00 : f32
    %224 = vector.broadcast %cst_176 : f32 to vector<16x64xf32>
    %225 = arith.maximumf %224, %223 : vector<16x64xf32>
    %226 = vector.broadcast %cst_177 : f32 to vector<16x64xf32>
    %227 = arith.minimumf %226, %225 : vector<16x64xf32>
    %228 = arith.mulf %227, %227 : vector<16x64xf32>
    %cst_178 = arith.constant -2.72614237E-10 : f32
    %229 = vector.broadcast %cst_178 : f32 to vector<16x64xf32>
    %230 = arith.mulf %229, %228 : vector<16x64xf32>
    %cst_179 = arith.constant 2.77068146E-8 : f32
    %231 = vector.broadcast %cst_179 : f32 to vector<16x64xf32>
    %232 = arith.addf %230, %231 : vector<16x64xf32>
    %233 = arith.mulf %232, %228 : vector<16x64xf32>
    %cst_180 = arith.constant -2.10102394E-6 : f32
    %234 = vector.broadcast %cst_180 : f32 to vector<16x64xf32>
    %235 = arith.addf %233, %234 : vector<16x64xf32>
    %236 = arith.mulf %235, %228 : vector<16x64xf32>
    %cst_181 = arith.constant -5.69250624E-5 : f32
    %237 = vector.broadcast %cst_181 : f32 to vector<16x64xf32>
    %238 = arith.addf %236, %237 : vector<16x64xf32>
    %239 = arith.mulf %238, %228 : vector<16x64xf32>
    %cst_182 = arith.constant -7.34990637E-4 : f32
    %240 = vector.broadcast %cst_182 : f32 to vector<16x64xf32>
    %241 = arith.addf %239, %240 : vector<16x64xf32>
    %242 = arith.mulf %241, %228 : vector<16x64xf32>
    %cst_183 = arith.constant -2.954600e-03 : f32
    %243 = vector.broadcast %cst_183 : f32 to vector<16x64xf32>
    %244 = arith.addf %242, %243 : vector<16x64xf32>
    %245 = arith.mulf %244, %228 : vector<16x64xf32>
    %cst_184 = arith.constant -0.0160960332 : f32
    %246 = vector.broadcast %cst_184 : f32 to vector<16x64xf32>
    %247 = arith.addf %245, %246 : vector<16x64xf32>
    %cst_185 = arith.constant -1.45660715E-5 : f32
    %248 = vector.broadcast %cst_185 : f32 to vector<16x64xf32>
    %249 = arith.mulf %248, %228 : vector<16x64xf32>
    %cst_186 = arith.constant -2.13374049E-4 : f32
    %250 = vector.broadcast %cst_186 : f32 to vector<16x64xf32>
    %251 = arith.addf %249, %250 : vector<16x64xf32>
    %252 = arith.mulf %251, %228 : vector<16x64xf32>
    %cst_187 = arith.constant -0.00168282702 : f32
    %253 = vector.broadcast %cst_187 : f32 to vector<16x64xf32>
    %254 = arith.addf %252, %253 : vector<16x64xf32>
    %255 = arith.mulf %254, %228 : vector<16x64xf32>
    %cst_188 = arith.constant -0.00737332925 : f32
    %256 = vector.broadcast %cst_188 : f32 to vector<16x64xf32>
    %257 = arith.addf %255, %256 : vector<16x64xf32>
    %258 = arith.mulf %257, %228 : vector<16x64xf32>
    %cst_189 = arith.constant -0.0142647391 : f32
    %259 = vector.broadcast %cst_189 : f32 to vector<16x64xf32>
    %260 = arith.addf %258, %259 : vector<16x64xf32>
    %261 = arith.mulf %227, %247 : vector<16x64xf32>
    %262 = arith.divf %261, %260 : vector<16x64xf32>
    %cst_190 = arith.constant 1.000000e+00 : f32
    %263 = vector.broadcast %cst_190 : f32 to vector<16x64xf32>
    %264 = arith.addf %263, %262 : vector<16x64xf32>
    %265 = arith.mulf %221, %264 : vector<16x64xf32>
    %c0_191 = arith.constant 0 : index
    %c0_192 = arith.constant 0 : index
    %c0_193 = arith.constant 0 : index
    %266 = vector.load %arg16[%c0_191, %c0_192, %c0_193] : memref<2x64x32xf32, #tpu.memory_space<vmem>>, vector<1x64x32xf32>
    %267 = vector.shape_cast %266 : vector<1x64x32xf32> to vector<64x32xf32>
    %cst_194 = arith.constant dense<0.000000e+00> : vector<16x32xf32>
    %268 = tpu.matmul %265, %267, %cst_194 {dimension_numbers = #tpu.dot_dimension_numbers<[1], [0], [0], [1], [0, 0, 1, 1], [], []>} : vector<16x64xf32>, vector<64x32xf32>, vector<16x32xf32> -> vector<16x32xf32>
    %c0_195 = arith.constant 0 : index
    %c0_196 = arith.constant 0 : index
    %c0_197 = arith.constant 0 : index
    %269 = vector.load %arg17[%c0_195, %c0_196, %c0_197] : memref<2x1x32xf32, #tpu.memory_space<vmem>>, vector<1x1x32xf32>
    %270 = vector.shape_cast %269 : vector<1x1x32xf32> to vector<1x32xf32>
    %271 = vector.broadcast %270 : vector<1x32xf32> to vector<16x32xf32>
    %272 = arith.addf %268, %271 : vector<16x32xf32>
    %273 = arith.addf %272, %212 : vector<16x32xf32>
    %274 = vector.extract_strided_slice %32 {offsets = [2, 0], sizes = [1, 32], strides = [1, 1]} : vector<3x32xf32> to vector<1x32xf32>
    %275 = vector.extract_strided_slice %34 {offsets = [2, 0], sizes = [1, 32], strides = [1, 1]} : vector<3x32xf32> to vector<1x32xf32>
    %cst_198 = arith.constant dense<0.000000e+00> : vector<16xf32>
    %276 = vector.multi_reduction <add>, %273, %cst_198 [1] : vector<16x32xf32> to vector<16xf32>
    %277 = vector.shape_cast %276 : vector<16xf32> to vector<16x1xf32>
    %cst_199 = arith.constant 3.200000e+01 : f32
    %278 = vector.broadcast %cst_199 : f32 to vector<16x1xf32>
    %279 = arith.divf %277, %278 : vector<16x1xf32>
    %280 = vector.broadcast %279 : vector<16x1xf32> to vector<16x32xf32>
    %281 = arith.subf %273, %280 : vector<16x32xf32>
    %282 = arith.mulf %281, %281 : vector<16x32xf32>
    %cst_200 = arith.constant dense<0.000000e+00> : vector<16xf32>
    %283 = vector.multi_reduction <add>, %282, %cst_200 [1] : vector<16x32xf32> to vector<16xf32>
    %284 = vector.shape_cast %283 : vector<16xf32> to vector<16x1xf32>
    %cst_201 = arith.constant 3.200000e+01 : f32
    %285 = vector.broadcast %cst_201 : f32 to vector<16x1xf32>
    %286 = arith.divf %284, %285 : vector<16x1xf32>
    %287 = vector.broadcast %279 : vector<16x1xf32> to vector<16x32xf32>
    %288 = arith.subf %273, %287 : vector<16x32xf32>
    %cst_202 = arith.constant 9.99999997E-7 : f32
    %289 = vector.broadcast %cst_202 : f32 to vector<16x1xf32>
    %290 = arith.addf %286, %289 : vector<16x1xf32>
    %291 = math.rsqrt %290 : vector<16x1xf32>
    %292 = vector.broadcast %291 : vector<16x1xf32> to vector<16x32xf32>
    %293 = arith.mulf %288, %292 : vector<16x32xf32>
    %294 = vector.broadcast %274 : vector<1x32xf32> to vector<16x32xf32>
    %295 = arith.mulf %293, %294 : vector<16x32xf32>
    %296 = vector.broadcast %275 : vector<1x32xf32> to vector<16x32xf32>
    %297 = arith.addf %295, %296 : vector<16x32xf32>
    %c1 = arith.constant 1 : index
    %c0_203 = arith.constant 0 : index
    %c0_204 = arith.constant 0 : index
    %298 = vector.load %arg18[%c1, %c0_203, %c0_204] : memref<2x3x32xf32, #tpu.memory_space<vmem>>, vector<1x3x32xf32>
    %299 = vector.shape_cast %298 : vector<1x3x32xf32> to vector<3x32xf32>
    %c1_205 = arith.constant 1 : index
    %c0_206 = arith.constant 0 : index
    %c0_207 = arith.constant 0 : index
    %300 = vector.load %arg19[%c1_205, %c0_206, %c0_207] : memref<2x3x32xf32, #tpu.memory_space<vmem>>, vector<1x3x32xf32>
    %301 = vector.shape_cast %300 : vector<1x3x32xf32> to vector<3x32xf32>
    %c1_208 = arith.constant 1 : index
    %c0_209 = arith.constant 0 : index
    %c0_210 = arith.constant 0 : index
    %302 = vector.load %arg4[%c1_208, %c0_209, %c0_210] : memref<2x32x96xf32, #tpu.memory_space<vmem>>, vector<1x32x96xf32>
    %303 = vector.shape_cast %302 : vector<1x32x96xf32> to vector<32x96xf32>
    %cst_211 = arith.constant dense<0.000000e+00> : vector<16x96xf32>
    %304 = tpu.matmul %297, %303, %cst_211 {dimension_numbers = #tpu.dot_dimension_numbers<[1], [0], [0], [1], [0, 0, 1, 1], [], []>} : vector<16x32xf32>, vector<32x96xf32>, vector<16x96xf32> -> vector<16x96xf32>
    %c1_212 = arith.constant 1 : index
    %c0_213 = arith.constant 0 : index
    %c0_214 = arith.constant 0 : index
    %305 = vector.load %arg5[%c1_212, %c0_213, %c0_214] : memref<2x1x96xf32, #tpu.memory_space<vmem>>, vector<1x1x96xf32>
    %306 = vector.shape_cast %305 : vector<1x1x96xf32> to vector<1x96xf32>
    %307 = vector.broadcast %306 : vector<1x96xf32> to vector<16x96xf32>
    %308 = arith.addf %304, %307 : vector<16x96xf32>
    %309 = vector.extract_strided_slice %308 {offsets = [0, 0], sizes = [16, 32], strides = [1, 1]} : vector<16x96xf32> to vector<16x32xf32>
    %310 = vector.shape_cast %309 : vector<16x32xf32> to vector<2x8x32xf32>
    %311 = vector.extract_strided_slice %308 {offsets = [0, 32], sizes = [16, 32], strides = [1, 1]} : vector<16x96xf32> to vector<16x32xf32>
    %312 = vector.shape_cast %311 : vector<16x32xf32> to vector<2x8x32xf32>
    %313 = vector.extract_strided_slice %308 {offsets = [0, 64], sizes = [16, 32], strides = [1, 1]} : vector<16x96xf32> to vector<16x32xf32>
    %314 = vector.shape_cast %313 : vector<16x32xf32> to vector<2x8x32xf32>
    %c1_215 = arith.constant 1 : index
    %c0_216 = arith.constant 0 : index
    %c0_217 = arith.constant 0 : index
    %c0_218 = arith.constant 0 : index
    %315 = vector.load %arg6[%c1_215, %c0_216, %c0_217, %c0_218] : memref<2x2x16x32xf32, #tpu.memory_space<vmem>>, vector<1x2x16x32xf32>
    %316 = vector.shape_cast %315 : vector<1x2x16x32xf32> to vector<2x16x32xf32>
    %c1_219 = arith.constant 1 : index
    %c0_220 = arith.constant 0 : index
    %c0_221 = arith.constant 0 : index
    %317 = vector.load %arg7[%c1_219, %c0_220, %c0_221] : memref<2x1x32xf32, #tpu.memory_space<vmem>>, vector<1x1x32xf32>
    %318 = vector.shape_cast %317 : vector<1x1x32xf32> to vector<1x32xf32>
    %319 = vector.extract_strided_slice %310 {offsets = [0, 0, 0], sizes = [2, 8, 16], strides = [1, 1, 1]} : vector<2x8x32xf32> to vector<2x8x16xf32>
    %c0_222 = arith.constant 0 : index
    %c0_223 = arith.constant 0 : index
    %c0_224 = arith.constant 0 : index
    %320 = vector.load %arg23[%c0_222, %c0_223, %c0_224] : memref<4x8x16xf32, #tpu.memory_space<vmem>>, vector<2x8x16xf32>
    tpu.vector_store %arg23[%c0_222, %c0_223, %c0_224], %319 {strides = array<i32>} : memref<4x8x16xf32, #tpu.memory_space<vmem>>, vector<2x8x16xf32>,
    %321 = vector.extract_strided_slice %312 {offsets = [0, 0, 0], sizes = [2, 8, 16], strides = [1, 1, 1]} : vector<2x8x32xf32> to vector<2x8x16xf32>
    %c0_225 = arith.constant 0 : index
    %c0_226 = arith.constant 0 : index
    %c0_227 = arith.constant 0 : index
    %322 = vector.load %arg24[%c0_225, %c0_226, %c0_227] : memref<4x128x16xf32, #tpu.memory_space<vmem>>, vector<2x8x16xf32>
    tpu.vector_store %arg24[%c0_225, %c0_226, %c0_227], %321 {strides = array<i32>} : memref<4x128x16xf32, #tpu.memory_space<vmem>>, vector<2x8x16xf32>,
    %323 = vector.extract_strided_slice %314 {offsets = [0, 0, 0], sizes = [2, 8, 16], strides = [1, 1, 1]} : vector<2x8x32xf32> to vector<2x8x16xf32>
    %c0_228 = arith.constant 0 : index
    %c0_229 = arith.constant 0 : index
    %c0_230 = arith.constant 0 : index
    %324 = vector.load %arg25[%c0_228, %c0_229, %c0_230] : memref<4x128x16xf32, #tpu.memory_space<vmem>>, vector<2x8x16xf32>
    tpu.vector_store %arg25[%c0_228, %c0_229, %c0_230], %323 {strides = array<i32>} : memref<4x128x16xf32, #tpu.memory_space<vmem>>, vector<2x8x16xf32>,
    %325 = vector.extract_strided_slice %310 {offsets = [0, 0, 16], sizes = [2, 8, 16], strides = [1, 1, 1]} : vector<2x8x32xf32> to vector<2x8x16xf32>
    %c2_231 = arith.constant 2 : index
    %c0_232 = arith.constant 0 : index
    %c0_233 = arith.constant 0 : index
    %326 = vector.load %arg23[%c2_231, %c0_232, %c0_233] : memref<4x8x16xf32, #tpu.memory_space<vmem>>, vector<2x8x16xf32>
    tpu.vector_store %arg23[%c2_231, %c0_232, %c0_233], %325 {strides = array<i32>} : memref<4x8x16xf32, #tpu.memory_space<vmem>>, vector<2x8x16xf32>,
    %327 = vector.extract_strided_slice %312 {offsets = [0, 0, 16], sizes = [2, 8, 16], strides = [1, 1, 1]} : vector<2x8x32xf32> to vector<2x8x16xf32>
    %c2_234 = arith.constant 2 : index
    %c0_235 = arith.constant 0 : index
    %c0_236 = arith.constant 0 : index
    %328 = vector.load %arg24[%c2_234, %c0_235, %c0_236] : memref<4x128x16xf32, #tpu.memory_space<vmem>>, vector<2x8x16xf32>
    tpu.vector_store %arg24[%c2_234, %c0_235, %c0_236], %327 {strides = array<i32>} : memref<4x128x16xf32, #tpu.memory_space<vmem>>, vector<2x8x16xf32>,
    %329 = vector.extract_strided_slice %314 {offsets = [0, 0, 16], sizes = [2, 8, 16], strides = [1, 1, 1]} : vector<2x8x32xf32> to vector<2x8x16xf32>
    %c2_237 = arith.constant 2 : index
    %c0_238 = arith.constant 0 : index
    %c0_239 = arith.constant 0 : index
    %330 = vector.load %arg25[%c2_237, %c0_238, %c0_239] : memref<4x128x16xf32, #tpu.memory_space<vmem>>, vector<2x8x16xf32>
    tpu.vector_store %arg25[%c2_237, %c0_238, %c0_239], %329 {strides = array<i32>} : memref<4x128x16xf32, #tpu.memory_space<vmem>>, vector<2x8x16xf32>,
    %c0_240 = arith.constant 0 : index
    %c0_241 = arith.constant 0 : index
    %c0_242 = arith.constant 0 : index
    %331 = vector.load %arg23[%c0_240, %c0_241, %c0_242] : memref<4x8x16xf32, #tpu.memory_space<vmem>>, vector<4x8x16xf32>
    %cst_243 = arith.constant 2.500000e-01 : f32
    %332 = vector.broadcast %cst_243 : f32 to vector<4x8x16xf32>
    %333 = arith.mulf %331, %332 : vector<4x8x16xf32>
    %c0_244 = arith.constant 0 : index
    %c0_245 = arith.constant 0 : index
    %c0_246 = arith.constant 0 : index
    %334 = vector.load %arg24[%c0_244, %c0_245, %c0_246] : memref<4x128x16xf32, #tpu.memory_space<vmem>>, vector<4x128x16xf32>
    %c0_247 = arith.constant 0 : index
    %c0_248 = arith.constant 0 : index
    %c0_249 = arith.constant 0 : index
    %335 = vector.load %arg25[%c0_247, %c0_248, %c0_249] : memref<4x128x16xf32, #tpu.memory_space<vmem>>, vector<4x128x16xf32>
    "tpu.trace_start"() <{level = 10 : i32, message = "gqd,gkd->gqk"}> : () -> ()
    %cst_250 = arith.constant dense<0.000000e+00> : vector<4x8x128xf32>
    %336 = tpu.matmul %333, %334, %cst_250 {dimension_numbers = #tpu.dot_dimension_numbers<[2], [2], [1], [1], [0, 0, 0, 1, 1, 1], [0], [0]>} : vector<4x8x16xf32>, vector<4x128x16xf32>, vector<4x8x128xf32> -> vector<4x8x128xf32>
    "tpu.trace_stop"() : () -> ()
    %c0_251 = arith.constant 0 : index
    %c0_252 = arith.constant 0 : index
    %c0_253 = arith.constant 0 : index
    %337 = vector.load %arg26[%c0_251, %c0_252, %c0_253] : memref<4x8x128xf32, #tpu.memory_space<vmem>>, vector<4x8x128xf32>
    %338 = arith.addf %336, %337 : vector<4x8x128xf32>
    %cst_254 = arith.constant dense<0xFF800000> : vector<4x8xf32>
    %339 = vector.multi_reduction <maximumf>, %338, %cst_254 [2] : vector<4x8x128xf32> to vector<4x8xf32>
    %340 = vector.shape_cast %339 : vector<4x8xf32> to vector<4x8x1xf32>
    %341 = vector.broadcast %340 : vector<4x8x1xf32> to vector<4x8x128xf32>
    %342 = arith.subf %338, %341 : vector<4x8x128xf32>
    %343 = math.exp %342 : vector<4x8x128xf32>
    %cst_255 = arith.constant dense<0.000000e+00> : vector<4x8xf32>
    %344 = vector.multi_reduction <add>, %343, %cst_255 [2] : vector<4x8x128xf32> to vector<4x8xf32>
    %345 = vector.shape_cast %344 : vector<4x8xf32> to vector<4x8x1xf32>
    %346 = tpu.reciprocal %345 {approx = true} : vector<4x8x1xf32> -> vector<4x8x1xf32>
    %347 = vector.broadcast %346 : vector<4x8x1xf32> to vector<4x8x128xf32>
    %348 = arith.mulf %343, %347 : vector<4x8x128xf32>
    %c1_256 = arith.constant 1 : index
    %c0_257 = arith.constant 0 : index
    %c0_258 = arith.constant 0 : index
    %c0_259 = arith.constant 0 : index
    %349 = vector.load %arg21[%c1_256, %c0_257, %c0_258, %c0_259] : memref<2x4x8x128xf32, #tpu.memory_space<vmem>>, vector<1x4x8x128xf32>
    %350 = vector.shape_cast %349 : vector<1x4x8x128xf32> to vector<4x8x128xf32>
    %351 = vector.shape_cast %348 : vector<4x8x128xf32> to vector<1x4x8x128xf32>
    tpu.vector_store %arg21[%c1_256, %c0_257, %c0_258, %c0_259], %351 {strides = array<i32>} : memref<2x4x8x128xf32, #tpu.memory_space<vmem>>, vector<1x4x8x128xf32>,
    "tpu.trace_start"() <{level = 10 : i32, message = "gqk,gkd->gqd"}> : () -> ()
    %cst_260 = arith.constant dense<0.000000e+00> : vector<4x8x16xf32>
    %352 = tpu.matmul %348, %335, %cst_260 {dimension_numbers = #tpu.dot_dimension_numbers<[2], [1], [1], [2], [0, 0, 0, 1, 1, 2], [0], [0]>} : vector<4x8x128xf32>, vector<4x128x16xf32>, vector<4x8x16xf32> -> vector<4x8x16xf32>
    "tpu.trace_stop"() : () -> ()
    %353 = vector.shape_cast %352 : vector<4x8x16xf32> to vector<2x2x8x16xf32>
    %354 = vector.shape_cast %353 : vector<2x2x8x16xf32> to vector<2x16x16xf32>
    "tpu.trace_start"() <{level = 10 : i32, message = "hnd,hde->hne"}> : () -> ()
    %cst_261 = arith.constant dense<0.000000e+00> : vector<2x16x32xf32>
    %355 = tpu.matmul %354, %316, %cst_261 {dimension_numbers = #tpu.dot_dimension_numbers<[2], [1], [1], [2], [0, 0, 0, 1, 1, 2], [0], [0]>} : vector<2x16x16xf32>, vector<2x16x32xf32>, vector<2x16x32xf32> -> vector<2x16x32xf32>
    "tpu.trace_stop"() : () -> ()
    %356 = vector.extract_strided_slice %355 {offsets = [0, 0, 0], sizes = [1, 16, 32], strides = [1, 1, 1]} : vector<2x16x32xf32> to vector<1x16x32xf32>
    %357 = vector.shape_cast %356 : vector<1x16x32xf32> to vector<16x32xf32>
    %358 = vector.extract_strided_slice %355 {offsets = [1, 0, 0], sizes = [1, 16, 32], strides = [1, 1, 1]} : vector<2x16x32xf32> to vector<1x16x32xf32>
    %359 = vector.shape_cast %358 : vector<1x16x32xf32> to vector<16x32xf32>
    %360 = arith.addf %357, %359 : vector<16x32xf32>
    %361 = vector.broadcast %318 : vector<1x32xf32> to vector<16x32xf32>
    %362 = arith.addf %360, %361 : vector<16x32xf32>
    %363 = arith.addf %362, %297 : vector<16x32xf32>
    %364 = vector.extract_strided_slice %299 {offsets = [0, 0], sizes = [1, 32], strides = [1, 1]} : vector<3x32xf32> to vector<1x32xf32>
    %365 = vector.extract_strided_slice %301 {offsets = [0, 0], sizes = [1, 32], strides = [1, 1]} : vector<3x32xf32> to vector<1x32xf32>
    %cst_262 = arith.constant dense<0.000000e+00> : vector<16xf32>
    %366 = vector.multi_reduction <add>, %363, %cst_262 [1] : vector<16x32xf32> to vector<16xf32>
    %367 = vector.shape_cast %366 : vector<16xf32> to vector<16x1xf32>
    %cst_263 = arith.constant 3.200000e+01 : f32
    %368 = vector.broadcast %cst_263 : f32 to vector<16x1xf32>
    %369 = arith.divf %367, %368 : vector<16x1xf32>
    %370 = vector.broadcast %369 : vector<16x1xf32> to vector<16x32xf32>
    %371 = arith.subf %363, %370 : vector<16x32xf32>
    %372 = arith.mulf %371, %371 : vector<16x32xf32>
    %cst_264 = arith.constant dense<0.000000e+00> : vector<16xf32>
    %373 = vector.multi_reduction <add>, %372, %cst_264 [1] : vector<16x32xf32> to vector<16xf32>
    %374 = vector.shape_cast %373 : vector<16xf32> to vector<16x1xf32>
    %cst_265 = arith.constant 3.200000e+01 : f32
    %375 = vector.broadcast %cst_265 : f32 to vector<16x1xf32>
    %376 = arith.divf %374, %375 : vector<16x1xf32>
    %377 = vector.broadcast %369 : vector<16x1xf32> to vector<16x32xf32>
    %378 = arith.subf %363, %377 : vector<16x32xf32>
    %cst_266 = arith.constant 9.99999997E-7 : f32
    %379 = vector.broadcast %cst_266 : f32 to vector<16x1xf32>
    %380 = arith.addf %376, %379 : vector<16x1xf32>
    %381 = math.rsqrt %380 : vector<16x1xf32>
    %382 = vector.broadcast %381 : vector<16x1xf32> to vector<16x32xf32>
    %383 = arith.mulf %378, %382 : vector<16x32xf32>
    %384 = vector.broadcast %364 : vector<1x32xf32> to vector<16x32xf32>
    %385 = arith.mulf %383, %384 : vector<16x32xf32>
    %386 = vector.broadcast %365 : vector<1x32xf32> to vector<16x32xf32>
    %387 = arith.addf %385, %386 : vector<16x32xf32>
    %c1_267 = arith.constant 1 : index
    %c0_268 = arith.constant 0 : index
    %c0_269 = arith.constant 0 : index
    %388 = vector.load %arg8[%c1_267, %c0_268, %c0_269] : memref<2x32x32xf32, #tpu.memory_space<vmem>>, vector<1x32x32xf32>
    %389 = vector.shape_cast %388 : vector<1x32x32xf32> to vector<32x32xf32>
    %cst_270 = arith.constant dense<0.000000e+00> : vector<16x32xf32>
    %390 = tpu.matmul %387, %389, %cst_270 {dimension_numbers = #tpu.dot_dimension_numbers<[1], [0], [0], [1], [0, 0, 1, 1], [], []>} : vector<16x32xf32>, vector<32x32xf32>, vector<16x32xf32> -> vector<16x32xf32>
    %c1_271 = arith.constant 1 : index
    %c0_272 = arith.constant 0 : index
    %c0_273 = arith.constant 0 : index
    %391 = vector.load %arg9[%c1_271, %c0_272, %c0_273] : memref<2x1x32xf32, #tpu.memory_space<vmem>>, vector<1x1x32xf32>
    %392 = vector.shape_cast %391 : vector<1x1x32xf32> to vector<1x32xf32>
    %393 = vector.broadcast %392 : vector<1x32xf32> to vector<16x32xf32>
    %394 = arith.addf %390, %393 : vector<16x32xf32>
    %c1_274 = arith.constant 1 : index
    %c0_275 = arith.constant 0 : index
    %c0_276 = arith.constant 0 : index
    %395 = vector.load %arg10[%c1_274, %c0_275, %c0_276] : memref<2x32x64xf32, #tpu.memory_space<vmem>>, vector<1x32x64xf32>
    %396 = vector.shape_cast %395 : vector<1x32x64xf32> to vector<32x64xf32>
    %cst_277 = arith.constant dense<0.000000e+00> : vector<16x64xf32>
    %397 = tpu.matmul %3, %396, %cst_277 {dimension_numbers = #tpu.dot_dimension_numbers<[1], [0], [0], [1], [0, 0, 1, 1], [], []>} : vector<16x32xf32>, vector<32x64xf32>, vector<16x64xf32> -> vector<16x64xf32>
    %c1_278 = arith.constant 1 : index
    %c0_279 = arith.constant 0 : index
    %c0_280 = arith.constant 0 : index
    %398 = vector.load %arg11[%c1_278, %c0_279, %c0_280] : memref<2x1x64xf32, #tpu.memory_space<vmem>>, vector<1x1x64xf32>
    %399 = vector.shape_cast %398 : vector<1x1x64xf32> to vector<1x64xf32>
    %400 = vector.broadcast %399 : vector<1x64xf32> to vector<16x64xf32>
    %401 = arith.addf %397, %400 : vector<16x64xf32>
    %402 = vector.shape_cast %394 : vector<16x32xf32> to vector<2x8x32xf32>
    %403 = vector.extract_strided_slice %401 {offsets = [0, 0], sizes = [16, 32], strides = [1, 1]} : vector<16x64xf32> to vector<16x32xf32>
    %404 = vector.shape_cast %403 : vector<16x32xf32> to vector<2x8x32xf32>
    %405 = vector.extract_strided_slice %401 {offsets = [0, 32], sizes = [16, 32], strides = [1, 1]} : vector<16x64xf32> to vector<16x32xf32>
    %406 = vector.shape_cast %405 : vector<16x32xf32> to vector<2x8x32xf32>
    %c1_281 = arith.constant 1 : index
    %c0_282 = arith.constant 0 : index
    %c0_283 = arith.constant 0 : index
    %c0_284 = arith.constant 0 : index
    %407 = vector.load %arg12[%c1_281, %c0_282, %c0_283, %c0_284] : memref<2x2x16x32xf32, #tpu.memory_space<vmem>>, vector<1x2x16x32xf32>
    %408 = vector.shape_cast %407 : vector<1x2x16x32xf32> to vector<2x16x32xf32>
    %c1_285 = arith.constant 1 : index
    %c0_286 = arith.constant 0 : index
    %c0_287 = arith.constant 0 : index
    %409 = vector.load %arg13[%c1_285, %c0_286, %c0_287] : memref<2x1x32xf32, #tpu.memory_space<vmem>>, vector<1x1x32xf32>
    %410 = vector.shape_cast %409 : vector<1x1x32xf32> to vector<1x32xf32>
    %411 = vector.extract_strided_slice %402 {offsets = [0, 0, 0], sizes = [2, 8, 16], strides = [1, 1, 1]} : vector<2x8x32xf32> to vector<2x8x16xf32>
    %c0_288 = arith.constant 0 : index
    %c0_289 = arith.constant 0 : index
    %c0_290 = arith.constant 0 : index
    %412 = vector.load %arg23[%c0_288, %c0_289, %c0_290] : memref<4x8x16xf32, #tpu.memory_space<vmem>>, vector<2x8x16xf32>
    tpu.vector_store %arg23[%c0_288, %c0_289, %c0_290], %411 {strides = array<i32>} : memref<4x8x16xf32, #tpu.memory_space<vmem>>, vector<2x8x16xf32>,
    %413 = vector.extract_strided_slice %404 {offsets = [0, 0, 0], sizes = [2, 8, 16], strides = [1, 1, 1]} : vector<2x8x32xf32> to vector<2x8x16xf32>
    %c0_291 = arith.constant 0 : index
    %c0_292 = arith.constant 0 : index
    %c0_293 = arith.constant 0 : index
    %414 = vector.load %arg24[%c0_291, %c0_292, %c0_293] : memref<4x128x16xf32, #tpu.memory_space<vmem>>, vector<2x8x16xf32>
    tpu.vector_store %arg24[%c0_291, %c0_292, %c0_293], %413 {strides = array<i32>} : memref<4x128x16xf32, #tpu.memory_space<vmem>>, vector<2x8x16xf32>,
    %415 = vector.extract_strided_slice %406 {offsets = [0, 0, 0], sizes = [2, 8, 16], strides = [1, 1, 1]} : vector<2x8x32xf32> to vector<2x8x16xf32>
    %c0_294 = arith.constant 0 : index
    %c0_295 = arith.constant 0 : index
    %c0_296 = arith.constant 0 : index
    %416 = vector.load %arg25[%c0_294, %c0_295, %c0_296] : memref<4x128x16xf32, #tpu.memory_space<vmem>>, vector<2x8x16xf32>
    tpu.vector_store %arg25[%c0_294, %c0_295, %c0_296], %415 {strides = array<i32>} : memref<4x128x16xf32, #tpu.memory_space<vmem>>, vector<2x8x16xf32>,
    %417 = vector.extract_strided_slice %402 {offsets = [0, 0, 16], sizes = [2, 8, 16], strides = [1, 1, 1]} : vector<2x8x32xf32> to vector<2x8x16xf32>
    %c2_297 = arith.constant 2 : index
    %c0_298 = arith.constant 0 : index
    %c0_299 = arith.constant 0 : index
    %418 = vector.load %arg23[%c2_297, %c0_298, %c0_299] : memref<4x8x16xf32, #tpu.memory_space<vmem>>, vector<2x8x16xf32>
    tpu.vector_store %arg23[%c2_297, %c0_298, %c0_299], %417 {strides = array<i32>} : memref<4x8x16xf32, #tpu.memory_space<vmem>>, vector<2x8x16xf32>,
    %419 = vector.extract_strided_slice %404 {offsets = [0, 0, 16], sizes = [2, 8, 16], strides = [1, 1, 1]} : vector<2x8x32xf32> to vector<2x8x16xf32>
    %c2_300 = arith.constant 2 : index
    %c0_301 = arith.constant 0 : index
    %c0_302 = arith.constant 0 : index
    %420 = vector.load %arg24[%c2_300, %c0_301, %c0_302] : memref<4x128x16xf32, #tpu.memory_space<vmem>>, vector<2x8x16xf32>
    tpu.vector_store %arg24[%c2_300, %c0_301, %c0_302], %419 {strides = array<i32>} : memref<4x128x16xf32, #tpu.memory_space<vmem>>, vector<2x8x16xf32>,
    %421 = vector.extract_strided_slice %406 {offsets = [0, 0, 16], sizes = [2, 8, 16], strides = [1, 1, 1]} : vector<2x8x32xf32> to vector<2x8x16xf32>
    %c2_303 = arith.constant 2 : index
    %c0_304 = arith.constant 0 : index
    %c0_305 = arith.constant 0 : index
    %422 = vector.load %arg25[%c2_303, %c0_304, %c0_305] : memref<4x128x16xf32, #tpu.memory_space<vmem>>, vector<2x8x16xf32>
    tpu.vector_store %arg25[%c2_303, %c0_304, %c0_305], %421 {strides = array<i32>} : memref<4x128x16xf32, #tpu.memory_space<vmem>>, vector<2x8x16xf32>,
    %c0_306 = arith.constant 0 : index
    %c0_307 = arith.constant 0 : index
    %c0_308 = arith.constant 0 : index
    %423 = vector.load %arg23[%c0_306, %c0_307, %c0_308] : memref<4x8x16xf32, #tpu.memory_space<vmem>>, vector<4x8x16xf32>
    %cst_309 = arith.constant 2.500000e-01 : f32
    %424 = vector.broadcast %cst_309 : f32 to vector<4x8x16xf32>
    %425 = arith.mulf %423, %424 : vector<4x8x16xf32>
    %c0_310 = arith.constant 0 : index
    %c0_311 = arith.constant 0 : index
    %c0_312 = arith.constant 0 : index
    %426 = vector.load %arg24[%c0_310, %c0_311, %c0_312] : memref<4x128x16xf32, #tpu.memory_space<vmem>>, vector<4x128x16xf32>
    %c0_313 = arith.constant 0 : index
    %c0_314 = arith.constant 0 : index
    %c0_315 = arith.constant 0 : index
    %427 = vector.load %arg25[%c0_313, %c0_314, %c0_315] : memref<4x128x16xf32, #tpu.memory_space<vmem>>, vector<4x128x16xf32>
    "tpu.trace_start"() <{level = 10 : i32, message = "gqd,gkd->gqk"}> : () -> ()
    %cst_316 = arith.constant dense<0.000000e+00> : vector<4x8x128xf32>
    %428 = tpu.matmul %425, %426, %cst_316 {dimension_numbers = #tpu.dot_dimension_numbers<[2], [2], [1], [1], [0, 0, 0, 1, 1, 1], [0], [0]>} : vector<4x8x16xf32>, vector<4x128x16xf32>, vector<4x8x128xf32> -> vector<4x8x128xf32>
    "tpu.trace_stop"() : () -> ()
    %c0_317 = arith.constant 0 : index
    %c0_318 = arith.constant 0 : index
    %c0_319 = arith.constant 0 : index
    %429 = vector.load %arg27[%c0_317, %c0_318, %c0_319] : memref<4x8x128xf32, #tpu.memory_space<vmem>>, vector<4x8x128xf32>
    %430 = arith.addf %428, %429 : vector<4x8x128xf32>
    %cst_320 = arith.constant dense<0xFF800000> : vector<4x8xf32>
    %431 = vector.multi_reduction <maximumf>, %430, %cst_320 [2] : vector<4x8x128xf32> to vector<4x8xf32>
    %432 = vector.shape_cast %431 : vector<4x8xf32> to vector<4x8x1xf32>
    %433 = vector.broadcast %432 : vector<4x8x1xf32> to vector<4x8x128xf32>
    %434 = arith.subf %430, %433 : vector<4x8x128xf32>
    %435 = math.exp %434 : vector<4x8x128xf32>
    %cst_321 = arith.constant dense<0.000000e+00> : vector<4x8xf32>
    %436 = vector.multi_reduction <add>, %435, %cst_321 [2] : vector<4x8x128xf32> to vector<4x8xf32>
    %437 = vector.shape_cast %436 : vector<4x8xf32> to vector<4x8x1xf32>
    %438 = tpu.reciprocal %437 {approx = true} : vector<4x8x1xf32> -> vector<4x8x1xf32>
    %439 = vector.broadcast %438 : vector<4x8x1xf32> to vector<4x8x128xf32>
    %440 = arith.mulf %435, %439 : vector<4x8x128xf32>
    %c1_322 = arith.constant 1 : index
    %c0_323 = arith.constant 0 : index
    %c0_324 = arith.constant 0 : index
    %c0_325 = arith.constant 0 : index
    %441 = vector.load %arg22[%c1_322, %c0_323, %c0_324, %c0_325] : memref<2x4x8x128xf32, #tpu.memory_space<vmem>>, vector<1x4x8x128xf32>
    %442 = vector.shape_cast %441 : vector<1x4x8x128xf32> to vector<4x8x128xf32>
    %443 = vector.shape_cast %440 : vector<4x8x128xf32> to vector<1x4x8x128xf32>
    tpu.vector_store %arg22[%c1_322, %c0_323, %c0_324, %c0_325], %443 {strides = array<i32>} : memref<2x4x8x128xf32, #tpu.memory_space<vmem>>, vector<1x4x8x128xf32>,
    "tpu.trace_start"() <{level = 10 : i32, message = "gqk,gkd->gqd"}> : () -> ()
    %cst_326 = arith.constant dense<0.000000e+00> : vector<4x8x16xf32>
    %444 = tpu.matmul %440, %427, %cst_326 {dimension_numbers = #tpu.dot_dimension_numbers<[2], [1], [1], [2], [0, 0, 0, 1, 1, 2], [0], [0]>} : vector<4x8x128xf32>, vector<4x128x16xf32>, vector<4x8x16xf32> -> vector<4x8x16xf32>
    "tpu.trace_stop"() : () -> ()
    %445 = vector.shape_cast %444 : vector<4x8x16xf32> to vector<2x2x8x16xf32>
    %446 = vector.shape_cast %445 : vector<2x2x8x16xf32> to vector<2x16x16xf32>
    "tpu.trace_start"() <{level = 10 : i32, message = "hnd,hde->hne"}> : () -> ()
    %cst_327 = arith.constant dense<0.000000e+00> : vector<2x16x32xf32>
    %447 = tpu.matmul %446, %408, %cst_327 {dimension_numbers = #tpu.dot_dimension_numbers<[2], [1], [1], [2], [0, 0, 0, 1, 1, 2], [0], [0]>} : vector<2x16x16xf32>, vector<2x16x32xf32>, vector<2x16x32xf32> -> vector<2x16x32xf32>
    "tpu.trace_stop"() : () -> ()
    %448 = vector.extract_strided_slice %447 {offsets = [0, 0, 0], sizes = [1, 16, 32], strides = [1, 1, 1]} : vector<2x16x32xf32> to vector<1x16x32xf32>
    %449 = vector.shape_cast %448 : vector<1x16x32xf32> to vector<16x32xf32>
    %450 = vector.extract_strided_slice %447 {offsets = [1, 0, 0], sizes = [1, 16, 32], strides = [1, 1, 1]} : vector<2x16x32xf32> to vector<1x16x32xf32>
    %451 = vector.shape_cast %450 : vector<1x16x32xf32> to vector<16x32xf32>
    %452 = arith.addf %449, %451 : vector<16x32xf32>
    %453 = vector.broadcast %410 : vector<1x32xf32> to vector<16x32xf32>
    %454 = arith.addf %452, %453 : vector<16x32xf32>
    %455 = arith.addf %454, %387 : vector<16x32xf32>
    %456 = vector.extract_strided_slice %299 {offsets = [1, 0], sizes = [1, 32], strides = [1, 1]} : vector<3x32xf32> to vector<1x32xf32>
    %457 = vector.extract_strided_slice %301 {offsets = [1, 0], sizes = [1, 32], strides = [1, 1]} : vector<3x32xf32> to vector<1x32xf32>
    %cst_328 = arith.constant dense<0.000000e+00> : vector<16xf32>
    %458 = vector.multi_reduction <add>, %455, %cst_328 [1] : vector<16x32xf32> to vector<16xf32>
    %459 = vector.shape_cast %458 : vector<16xf32> to vector<16x1xf32>
    %cst_329 = arith.constant 3.200000e+01 : f32
    %460 = vector.broadcast %cst_329 : f32 to vector<16x1xf32>
    %461 = arith.divf %459, %460 : vector<16x1xf32>
    %462 = vector.broadcast %461 : vector<16x1xf32> to vector<16x32xf32>
    %463 = arith.subf %455, %462 : vector<16x32xf32>
    %464 = arith.mulf %463, %463 : vector<16x32xf32>
    %cst_330 = arith.constant dense<0.000000e+00> : vector<16xf32>
    %465 = vector.multi_reduction <add>, %464, %cst_330 [1] : vector<16x32xf32> to vector<16xf32>
    %466 = vector.shape_cast %465 : vector<16xf32> to vector<16x1xf32>
    %cst_331 = arith.constant 3.200000e+01 : f32
    %467 = vector.broadcast %cst_331 : f32 to vector<16x1xf32>
    %468 = arith.divf %466, %467 : vector<16x1xf32>
    %469 = vector.broadcast %461 : vector<16x1xf32> to vector<16x32xf32>
    %470 = arith.subf %455, %469 : vector<16x32xf32>
    %cst_332 = arith.constant 9.99999997E-7 : f32
    %471 = vector.broadcast %cst_332 : f32 to vector<16x1xf32>
    %472 = arith.addf %468, %471 : vector<16x1xf32>
    %473 = math.rsqrt %472 : vector<16x1xf32>
    %474 = vector.broadcast %473 : vector<16x1xf32> to vector<16x32xf32>
    %475 = arith.mulf %470, %474 : vector<16x32xf32>
    %476 = vector.broadcast %456 : vector<1x32xf32> to vector<16x32xf32>
    %477 = arith.mulf %475, %476 : vector<16x32xf32>
    %478 = vector.broadcast %457 : vector<1x32xf32> to vector<16x32xf32>
    %479 = arith.addf %477, %478 : vector<16x32xf32>
    %c1_333 = arith.constant 1 : index
    %c0_334 = arith.constant 0 : index
    %c0_335 = arith.constant 0 : index
    %480 = vector.load %arg14[%c1_333, %c0_334, %c0_335] : memref<2x32x64xf32, #tpu.memory_space<vmem>>, vector<1x32x64xf32>
    %481 = vector.shape_cast %480 : vector<1x32x64xf32> to vector<32x64xf32>
    %cst_336 = arith.constant dense<0.000000e+00> : vector<16x64xf32>
    %482 = tpu.matmul %479, %481, %cst_336 {dimension_numbers = #tpu.dot_dimension_numbers<[1], [0], [0], [1], [0, 0, 1, 1], [], []>} : vector<16x32xf32>, vector<32x64xf32>, vector<16x64xf32> -> vector<16x64xf32>
    %c1_337 = arith.constant 1 : index
    %c0_338 = arith.constant 0 : index
    %c0_339 = arith.constant 0 : index
    %483 = vector.load %arg15[%c1_337, %c0_338, %c0_339] : memref<2x1x64xf32, #tpu.memory_space<vmem>>, vector<1x1x64xf32>
    %484 = vector.shape_cast %483 : vector<1x1x64xf32> to vector<1x64xf32>
    %485 = vector.broadcast %484 : vector<1x64xf32> to vector<16x64xf32>
    %486 = arith.addf %482, %485 : vector<16x64xf32>
    %cst_340 = arith.constant 5.000000e-01 : f32
    %487 = vector.broadcast %cst_340 : f32 to vector<16x64xf32>
    %488 = arith.mulf %486, %487 : vector<16x64xf32>
    %cst_341 = arith.constant 0.707106769 : f32
    %489 = vector.broadcast %cst_341 : f32 to vector<16x64xf32>
    %490 = arith.mulf %486, %489 : vector<16x64xf32>
    %cst_342 = arith.constant -4.000000e+00 : f32
    %cst_343 = arith.constant 4.000000e+00 : f32
    %491 = vector.broadcast %cst_342 : f32 to vector<16x64xf32>
    %492 = arith.maximumf %491, %490 : vector<16x64xf32>
    %493 = vector.broadcast %cst_343 : f32 to vector<16x64xf32>
    %494 = arith.minimumf %493, %492 : vector<16x64xf32>
    %495 = arith.mulf %494, %494 : vector<16x64xf32>
    %cst_344 = arith.constant -2.72614237E-10 : f32
    %496 = vector.broadcast %cst_344 : f32 to vector<16x64xf32>
    %497 = arith.mulf %496, %495 : vector<16x64xf32>
    %cst_345 = arith.constant 2.77068146E-8 : f32
    %498 = vector.broadcast %cst_345 : f32 to vector<16x64xf32>
    %499 = arith.addf %497, %498 : vector<16x64xf32>
    %500 = arith.mulf %499, %495 : vector<16x64xf32>
    %cst_346 = arith.constant -2.10102394E-6 : f32
    %501 = vector.broadcast %cst_346 : f32 to vector<16x64xf32>
    %502 = arith.addf %500, %501 : vector<16x64xf32>
    %503 = arith.mulf %502, %495 : vector<16x64xf32>
    %cst_347 = arith.constant -5.69250624E-5 : f32
    %504 = vector.broadcast %cst_347 : f32 to vector<16x64xf32>
    %505 = arith.addf %503, %504 : vector<16x64xf32>
    %506 = arith.mulf %505, %495 : vector<16x64xf32>
    %cst_348 = arith.constant -7.34990637E-4 : f32
    %507 = vector.broadcast %cst_348 : f32 to vector<16x64xf32>
    %508 = arith.addf %506, %507 : vector<16x64xf32>
    %509 = arith.mulf %508, %495 : vector<16x64xf32>
    %cst_349 = arith.constant -2.954600e-03 : f32
    %510 = vector.broadcast %cst_349 : f32 to vector<16x64xf32>
    %511 = arith.addf %509, %510 : vector<16x64xf32>
    %512 = arith.mulf %511, %495 : vector<16x64xf32>
    %cst_350 = arith.constant -0.0160960332 : f32
    %513 = vector.broadcast %cst_350 : f32 to vector<16x64xf32>
    %514 = arith.addf %512, %513 : vector<16x64xf32>
    %cst_351 = arith.constant -1.45660715E-5 : f32
    %515 = vector.broadcast %cst_351 : f32 to vector<16x64xf32>
    %516 = arith.mulf %515, %495 : vector<16x64xf32>
    %cst_352 = arith.constant -2.13374049E-4 : f32
    %517 = vector.broadcast %cst_352 : f32 to vector<16x64xf32>
    %518 = arith.addf %516, %517 : vector<16x64xf32>
    %519 = arith.mulf %518, %495 : vector<16x64xf32>
    %cst_353 = arith.constant -0.00168282702 : f32
    %520 = vector.broadcast %cst_353 : f32 to vector<16x64xf32>
    %521 = arith.addf %519, %520 : vector<16x64xf32>
    %522 = arith.mulf %521, %495 : vector<16x64xf32>
    %cst_354 = arith.constant -0.00737332925 : f32
    %523 = vector.broadcast %cst_354 : f32 to vector<16x64xf32>
    %524 = arith.addf %522, %523 : vector<16x64xf32>
    %525 = arith.mulf %524, %495 : vector<16x64xf32>
    %cst_355 = arith.constant -0.0142647391 : f32
    %526 = vector.broadcast %cst_355 : f32 to vector<16x64xf32>
    %527 = arith.addf %525, %526 : vector<16x64xf32>
    %528 = arith.mulf %494, %514 : vector<16x64xf32>
    %529 = arith.divf %528, %527 : vector<16x64xf32>
    %cst_356 = arith.constant 1.000000e+00 : f32
    %530 = vector.broadcast %cst_356 : f32 to vector<16x64xf32>
    %531 = arith.addf %530, %529 : vector<16x64xf32>
    %532 = arith.mulf %488, %531 : vector<16x64xf32>
    %c1_357 = arith.constant 1 : index
    %c0_358 = arith.constant 0 : index
    %c0_359 = arith.constant 0 : index
    %533 = vector.load %arg16[%c1_357, %c0_358, %c0_359] : memref<2x64x32xf32, #tpu.memory_space<vmem>>, vector<1x64x32xf32>
    %534 = vector.shape_cast %533 : vector<1x64x32xf32> to vector<64x32xf32>
    %cst_360 = arith.constant dense<0.000000e+00> : vector<16x32xf32>
    %535 = tpu.matmul %532, %534, %cst_360 {dimension_numbers = #tpu.dot_dimension_numbers<[1], [0], [0], [1], [0, 0, 1, 1], [], []>} : vector<16x64xf32>, vector<64x32xf32>, vector<16x32xf32> -> vector<16x32xf32>
    %c1_361 = arith.constant 1 : index
    %c0_362 = arith.constant 0 : index
    %c0_363 = arith.constant 0 : index
    %536 = vector.load %arg17[%c1_361, %c0_362, %c0_363] : memref<2x1x32xf32, #tpu.memory_space<vmem>>, vector<1x1x32xf32>
    %537 = vector.shape_cast %536 : vector<1x1x32xf32> to vector<1x32xf32>
    %538 = vector.broadcast %537 : vector<1x32xf32> to vector<16x32xf32>
    %539 = arith.addf %535, %538 : vector<16x32xf32>
    %540 = arith.addf %539, %479 : vector<16x32xf32>
    %541 = vector.extract_strided_slice %299 {offsets = [2, 0], sizes = [1, 32], strides = [1, 1]} : vector<3x32xf32> to vector<1x32xf32>
    %542 = vector.extract_strided_slice %301 {offsets = [2, 0], sizes = [1, 32], strides = [1, 1]} : vector<3x32xf32> to vector<1x32xf32>
    %cst_364 = arith.constant dense<0.000000e+00> : vector<16xf32>
    %543 = vector.multi_reduction <add>, %540, %cst_364 [1] : vector<16x32xf32> to vector<16xf32>
    %544 = vector.shape_cast %543 : vector<16xf32> to vector<16x1xf32>
    %cst_365 = arith.constant 3.200000e+01 : f32
    %545 = vector.broadcast %cst_365 : f32 to vector<16x1xf32>
    %546 = arith.divf %544, %545 : vector<16x1xf32>
    %547 = vector.broadcast %546 : vector<16x1xf32> to vector<16x32xf32>
    %548 = arith.subf %540, %547 : vector<16x32xf32>
    %549 = arith.mulf %548, %548 : vector<16x32xf32>
    %cst_366 = arith.constant dense<0.000000e+00> : vector<16xf32>
    %550 = vector.multi_reduction <add>, %549, %cst_366 [1] : vector<16x32xf32> to vector<16xf32>
    %551 = vector.shape_cast %550 : vector<16xf32> to vector<16x1xf32>
    %cst_367 = arith.constant 3.200000e+01 : f32
    %552 = vector.broadcast %cst_367 : f32 to vector<16x1xf32>
    %553 = arith.divf %551, %552 : vector<16x1xf32>
    %554 = vector.broadcast %546 : vector<16x1xf32> to vector<16x32xf32>
    %555 = arith.subf %540, %554 : vector<16x32xf32>
    %cst_368 = arith.constant 9.99999997E-7 : f32
    %556 = vector.broadcast %cst_368 : f32 to vector<16x1xf32>
    %557 = arith.addf %553, %556 : vector<16x1xf32>
    %558 = math.rsqrt %557 : vector<16x1xf32>
    %559 = vector.broadcast %558 : vector<16x1xf32> to vector<16x32xf32>
    %560 = arith.mulf %555, %559 : vector<16x32xf32>
    %561 = vector.broadcast %541 : vector<1x32xf32> to vector<16x32xf32>
    %562 = arith.mulf %560, %561 : vector<16x32xf32>
    %563 = vector.broadcast %542 : vector<1x32xf32> to vector<16x32xf32>
    %564 = arith.addf %562, %563 : vector<16x32xf32>
    %565 = vector.shape_cast %564 : vector<16x32xf32> to vector<2x8x32xf32>
    %c0_369 = arith.constant 0 : index
    %c0_370 = arith.constant 0 : index
    %c0_371 = arith.constant 0 : index
    %566 = vector.load %arg20[%c0_369, %c0_370, %c0_371] : memref<2x8x32xf32, #tpu.memory_space<vmem>>, vector<2x8x32xf32>
    tpu.vector_store %arg20[%c0_369, %c0_370, %c0_371], %565 {strides = array<i32>} : memref<2x8x32xf32, #tpu.memory_space<vmem>>, vector<2x8x32xf32>,
    return
  }
}

</mosaic_0001>

<bundles_post_ra>
// kernel: decoder_forward.1
= control target key start
LH: loop header
LB: loop body
LE: loop exit
PB: predicated region body
PF: predicated region fallthrough
CT: control target
= control target key end

     0   :  { %s11572_s0 = inlined_call_operand.vmem [shape: f32[2,8,32], index: 0, kind: input, shape index: {}]   ;;  %s11573_s1 = inlined_call_operand.vmem [shape: f32[2,8,32], index: 1, kind: input, shape index: {}]   ;;  %s11574_s2 = inlined_call_operand.vmem [shape: f32[2,8,128], index: 2, kind: input, shape index: {}]   ;;  %s11575_s3 = inlined_call_operand.vmem [shape: f32[2,8,128], index: 3, kind: input, shape index: {}]   ;;  %s11576_s4 = inlined_call_operand.vmem [shape: f32[2,32,96], index: 4, kind: input, shape index: {}]   ;;  %s11577_s5 = inlined_call_operand.vmem [shape: f32[2,1,96], index: 5, kind: input, shape index: {}]   ;;  %s11578_s6 = inlined_call_operand.vmem [shape: f32[2,2,16,32], index: 6, kind: input, shape index: {}]   ;;  %s11579_s7 = inlined_call_operand.vmem [shape: f32[2,1,32], index: 7, kind: input, shape index: {}]   ;;  %s11580_s8 = inlined_call_operand.vmem [shape: f32[2,32,32], index: 8, kind: input, shape index: {}]   ;;  %s11581_s9 = inlined_call_operand.vmem [shape: f32[2,1,32], index: 9, kind: input, shape index: {}]   ;;  %s11582_s10 = inlined_call_operand.vmem [shape: f32[2,32,64], index: 10, kind: input, shape index: {}]   ;;  %s11583_s11 = inlined_call_operand.vmem [shape: f32[2,1,64], index: 11, kind: input, shape index: {}]   ;;  %s11584_s12 = inlined_call_operand.vmem [shape: f32[2,2,16,32], index: 12, kind: input, shape index: {}]   ;;  %s11585_s13 = inlined_call_operand.vmem [shape: f32[2,1,32], index: 13, kind: input, shape index: {}]   ;;  %s11586_s14 = inlined_call_operand.vmem [shape: f32[2,32,64], index: 14, kind: input, shape index: {}]   ;;  %s11587_s15 = inlined_call_operand.vmem [shape: f32[2,1,64], index: 15, kind: input, shape index: {}]   ;;  %s11588_s16 = inlined_call_operand.vmem [shape: f32[2,64,32], index: 16, kind: input, shape index: {}]   ;;  %s11589_s17 = inlined_call_operand.vmem [shape: f32[2,1,32], index: 17, kind: input, shape index: {}]   ;;  %s11590_s18 = inlined_call_operand.vmem [shape: f32[2,3,32], index: 18, kind: input, shape index: {}]   ;;  %s11591_s19 = inlined_call_operand.vmem [shape: f32[2,3,32], index: 19, kind: input, shape index: {}]   ;;  %s11592_s20 = inlined_call_operand.hbm [shape: f32[2,8,32], index: 20, kind: output, shape index: {0}]   ;;  %s11593_s21 = inlined_call_operand.vmem [shape: f32[2,4,8,128], index: 21, kind: output, shape index: {1}]   ;;  %s11594_s22 = inlined_call_operand.vmem [shape: f32[2,4,8,128], index: 22, kind: output, shape index: {2}]  }
   0x1   :  { %11610 = sst [smem:[#allocation10_spill]] %s11572_s0 }
   0x2   :  { %11611 = sst [smem:[#allocation11_spill]] %s11573_s1 }
   0x3   :  { %11612 = sst [smem:[#allocation12_spill]] %s11574_s2 }
   0x4   :  { %11613 = sst [smem:[#allocation13_spill]] %s11575_s3 }
   0x5   :  { %11614 = sst [smem:[#allocation14_spill]] %s11576_s4 }
   0x6   :  { %11615 = sst [smem:[#allocation15_spill]] %s11577_s5 }
   0x7   :  { %11616 = sst [smem:[#allocation16_spill]] %s11578_s6 }
   0x8   :  { %s11617_s29 = sld [smem:[#allocation14_spill]]  ;;  %vm241_vm0 = vcmask 261120   ;;  %s11618_s25 = sld [smem:[#allocation10_spill]] }
   0xe   :  { %v230_v0 = vld [vmem:[%s11617_s29] sm:$0xff]  ;;  %v231_v1 = vld [vmem:[%s11617_s29 + $0x8] sm:$0xff]  ;;  %v232_v2 = vld [vmem:[%s11617_s29 + $0x10] sm:$0xff] }
   0xf   :  { %v8537_v3 = vpack.c.bf16 %v231_v1, %v230_v0  ;;  %v233_v4 = vld [vmem:[%s11617_s29 + $0x18] sm:$0xff]  ;;  %v69_v5 = vld [vmem:[%s11618_s25] sm:$0xff] }
  0x10   :  { %v8541_v6 = vpack.c.bf16 %v233_v4, %v232_v2  ;;  %7243 = vmatprep.mubr.msk.f32.mxu1 %vm241_vm0, %v69_v5 }
  0x11   :  { %28 = vsyncpa [#allocation8], 0  ;;  %8538 = vmatprep.subr.bf16.mxu1 %v8537_v3  ;;  %v70_v7 = vld [vmem:[%s11618_s25 + $0x8] sm:$0xff]  ;;  %vm73_vm1 = vcmask 130048   ;;  %v9710_v8 = vmov 0.0   ;;  %s11619_s28 = sld [smem:[#allocation15_spill]] }
  0x12   :  { %8540 = vmatpush3.bf16.msra.mxu1 %v8537_v3  ;;  %106 = vst.msk [vmem:[#allocation3 + $0x100] sm:$0xff] %vm73_vm1, %v9710_v8  ;;  %74 = vst.msk [vmem:[#allocation3] sm:$0xff] %vm73_vm1, %v9710_v8  ;;  %v9711_v11 = vmov 0.0|0.0   ;;  %s11606_s30 = smov 80   ;;  %s11608_s4 = smov 96   ;;  %vm9715_vm2 = vmmov 0  }
  0x13   :  { %8542 = vmatprep.subr.bf16.mxu1 %v8541_v6  ;;  %75 = vst.msk [vmem:[#allocation3 + $0x8] sm:$0xff] %vm73_vm1, %v9710_v8  ;;  %76 = vst.msk [vmem:[#allocation3 + $0x10] sm:$0xff] %vm73_vm1, %v9710_v8  ;;  %8577 = vmatprep.subr.bf16.mxu0 %v9711_v11  ;;  %s9714_s0 = smov 112   ;;  %s11622_s5 = sld [smem:[#allocation12_spill]]  ;;  %vm3084_vm5 = vcmask 523264  }
  0x14   :  { %77 = vst.msk [vmem:[#allocation3 + $0x18] sm:$0xff] %vm73_vm1, %v9710_v8  ;;  %78 = vst.msk [vmem:[#allocation3 + $0x20] sm:$0xff] %vm73_vm1, %v9710_v8  ;;  %7313 = vmatprep.mubr.msk.f32.mxu0 %vm9715_vm2, %v9710_v8  ;;  %s11604_s26 = smov 64   ;;  %s11602_s2 = smov 48  }
  0x15   :  { %79 = vst.msk [vmem:[#allocation3 + $0x28] sm:$0xff] %vm73_vm1, %v9710_v8  ;;  %80 = vst.msk [vmem:[#allocation3 + $0x30] sm:$0xff] %vm73_vm1, %v9710_v8  ;;  %s11623_s1 = sld [smem:[#allocation16_spill]]  ;;  %s11624_s27 = sld [smem:[#allocation11_spill]] }
  0x16   :  { %8544 = vmatpush3.bf16.msra.mxu1 %v8541_v6  ;;  %81 = vst.msk [vmem:[#allocation3 + $0x38] sm:$0xff] %vm73_vm1, %v9710_v8  ;;  %82 = vst.msk [vmem:[#allocation3 + $0x40] sm:$0xff] %vm73_vm1, %v9710_v8  ;;  %s11625_s3 = sld [smem:[#allocation13_spill]]  ;;  %s11626_s24 = smov 96  }
  0x17   :  { %83 = vst.msk [vmem:[#allocation3 + $0x48] sm:$0xff] %vm73_vm1, %v9710_v8  ;;  %84 = vst.msk [vmem:[#allocation3 + $0x50] sm:$0xff] %vm73_vm1, %v9710_v8  ;;  %v6216_v9 = vld [vmem:[%s11619_s28] ss:$0 sm:$0xff]  ;;  %8545 = vmatprep.subr.bf16.mxu1 %v9711_v11 }
  0x18   :  { %85 = vst.msk [vmem:[#allocation3 + $0x58] sm:$0xff] %vm73_vm1, %v9710_v8  ;;  %86 = vst.msk [vmem:[#allocation3 + $0x60] sm:$0xff] %vm73_vm1, %v9710_v8 }
  0x19   :  { %7244 = vmatmul.mubr.msk.f32.vlgmr.msra.gmra.mrb[0].mxu1 %vm241_vm0, %v70_v7  ;;  %87 = vst.msk [vmem:[#allocation3 + $0x68] sm:$0xff] %vm73_vm1, %v9710_v8  ;;  %88 = vst.msk [vmem:[#allocation3 + $0x70] sm:$0xff] %vm73_vm1, %v9710_v8 }
  0x1a   :  { %89 = vst.msk [vmem:[#allocation3 + $0x78] sm:$0xff] %vm73_vm1, %v9710_v8  ;;  %90 = vst.msk [vmem:[#allocation3 + $0x80] sm:$0xff] %vm73_vm1, %v9710_v8  ;;  %7278 = vmatprep.mubr.msk.f32.mxu1 %vm9715_vm2, %v9710_v8  ;;  %v384_v19 = vld [vmem:[#allocation3 + $0x8] sm:$0xff]  ;;  %v385_v27 = vld [vmem:[#allocation3 + $0x10] sm:$0xff] }
  0x1b   :  { %91 = vst.msk [vmem:[#allocation3 + $0x88] sm:$0xff] %vm73_vm1, %v9710_v8  ;;  %92 = vst.msk [vmem:[#allocation3 + $0x90] sm:$0xff] %vm73_vm1, %v9710_v8  ;;  %v386_v28 = vld [vmem:[#allocation3 + $0x18] sm:$0xff]  ;;  %v387_v34 = vld [vmem:[#allocation3 + $0x20] sm:$0xff] }
  0x1c   :  { %93 = vst.msk [vmem:[#allocation3 + $0x98] sm:$0xff] %vm73_vm1, %v9710_v8  ;;  %94 = vst.msk [vmem:[#allocation3 + $0xa0] sm:$0xff] %vm73_vm1, %v9710_v8  ;;  %v8550_v30 = vpack.c.bf16 %v386_v28, %v385_v27  ;;  %v388_v35 = vld [vmem:[#allocation3 + $0x28] sm:$0xff]  ;;  %v389_v40 = vld [vmem:[#allocation3 + $0x30] sm:$0xff] }
  0x1d   :  { %95 = vst.msk [vmem:[#allocation3 + $0xa8] sm:$0xff] %vm73_vm1, %v9710_v8  ;;  %96 = vst.msk [vmem:[#allocation3 + $0xb0] sm:$0xff] %vm73_vm1, %v9710_v8  ;;  %v8554_v36 = vpack.c.bf16 %v388_v35, %v387_v34  ;;  %v390_v41 = vld [vmem:[#allocation3 + $0x38] sm:$0xff]  ;;  %v391_v46 = vld [vmem:[#allocation3 + $0x40] sm:$0xff] }
  0x1e   :  { %97 = vst.msk [vmem:[#allocation3 + $0xb8] sm:$0xff] %vm73_vm1, %v9710_v8  ;;  %98 = vst.msk [vmem:[#allocation3 + $0xc0] sm:$0xff] %vm73_vm1, %v9710_v8  ;;  %v8558_v42 = vpack.c.bf16 %v390_v41, %v389_v40  ;;  %v392_v47 = vld [vmem:[#allocation3 + $0x48] sm:$0xff]  ;;  %v393_v52 = vld [vmem:[#allocation3 + $0x50] sm:$0xff] }
  0x1f   :  { %99 = vst.msk [vmem:[#allocation3 + $0xc8] sm:$0xff] %vm73_vm1, %v9710_v8  ;;  %100 = vst.msk [vmem:[#allocation3 + $0xd0] sm:$0xff] %vm73_vm1, %v9710_v8  ;;  %v8562_v48 = vpack.c.bf16 %v392_v47, %v391_v46  ;;  %v394_v53 = vld [vmem:[#allocation3 + $0x58] sm:$0xff]  ;;  %v395_v58 = vld [vmem:[#allocation3 + $0x60] sm:$0xff] }
  0x20   :  { %101 = vst.msk [vmem:[#allocation3 + $0xd8] sm:$0xff] %vm73_vm1, %v9710_v8  ;;  %102 = vst.msk [vmem:[#allocation3 + $0xe0] sm:$0xff] %vm73_vm1, %v9710_v8  ;;  %v8566_v54 = vpack.c.bf16 %v394_v53, %v393_v52  ;;  %v396_v59 = vld [vmem:[#allocation3 + $0x68] sm:$0xff]  ;;  %v397_v0 = vld [vmem:[#allocation3 + $0x70] sm:$0xff] }
  0x21   :  { %103 = vst.msk [vmem:[#allocation3 + $0xe8] sm:$0xff] %vm73_vm1, %v9710_v8  ;;  %104 = vst.msk [vmem:[#allocation3 + $0xf0] sm:$0xff] %vm73_vm1, %v9710_v8  ;;  %v8570_v60 = vpack.c.bf16 %v396_v59, %v395_v58  ;;  %v398_v1 = vld [vmem:[#allocation3 + $0x78] sm:$0xff] }
  0x22   :  { %105 = vst.msk [vmem:[#allocation3 + $0xf8] sm:$0xff] %vm73_vm1, %v9710_v8  ;;  %107 = vst.msk [vmem:[#allocation3 + $0x108] sm:$0xff] %vm73_vm1, %v9710_v8  ;;  %v400_v25 = vld [vmem:[#allocation3 + $0x88] sm:$0xff]  ;;  %v401_v31 = vld [vmem:[#allocation3 + $0x90] sm:$0xff]  ;;  %v8574_v2 = vpack.c.bf16 %v398_v1, %v397_v0 }
  0x23   :  { %108 = vst.msk [vmem:[#allocation3 + $0x110] sm:$0xff] %vm73_vm1, %v9710_v8  ;;  %109 = vst.msk [vmem:[#allocation3 + $0x118] sm:$0xff] %vm73_vm1, %v9710_v8  ;;  %v402_v32 = vld [vmem:[#allocation3 + $0x98] sm:$0xff]  ;;  %v403_v37 = vld [vmem:[#allocation3 + $0xa0] sm:$0xff] }
  0x24   :  { %110 = vst.msk [vmem:[#allocation3 + $0x120] sm:$0xff] %vm73_vm1, %v9710_v8  ;;  %111 = vst.msk [vmem:[#allocation3 + $0x128] sm:$0xff] %vm73_vm1, %v9710_v8  ;;  %v8582_v33 = vpack.c.bf16 %v402_v32, %v401_v31  ;;  %v404_v38 = vld [vmem:[#allocation3 + $0xa8] sm:$0xff]  ;;  %v405_v43 = vld [vmem:[#allocation3 + $0xb0] sm:$0xff] }
  0x25   :  { %112 = vst.msk [vmem:[#allocation3 + $0x130] sm:$0xff] %vm73_vm1, %v9710_v8  ;;  %113 = vst.msk [vmem:[#allocation3 + $0x138] sm:$0xff] %vm73_vm1, %v9710_v8  ;;  %v8586_v39 = vpack.c.bf16 %v404_v38, %v403_v37  ;;  %v406_v44 = vld [vmem:[#allocation3 + $0xb8] sm:$0xff]  ;;  %v407_v49 = vld [vmem:[#allocation3 + $0xc0] sm:$0xff] }
  0x26   :  { %114 = vst.msk [vmem:[#allocation3 + $0x140] sm:$0xff] %vm73_vm1, %v9710_v8  ;;  %115 = vst.msk [vmem:[#allocation3 + $0x148] sm:$0xff] %vm73_vm1, %v9710_v8  ;;  %v8590_v45 = vpack.c.bf16 %v406_v44, %v405_v43  ;;  %v408_v50 = vld [vmem:[#allocation3 + $0xc8] sm:$0xff]  ;;  %v409_v55 = vld [vmem:[#allocation3 + $0xd0] sm:$0xff] }
  0x27   :  { %116 = vst.msk [vmem:[#allocation3 + $0x150] sm:$0xff] %vm73_vm1, %v9710_v8  ;;  %117 = vst.msk [vmem:[#allocation3 + $0x158] sm:$0xff] %vm73_vm1, %v9710_v8  ;;  %v8594_v51 = vpack.c.bf16 %v408_v50, %v407_v49  ;;  %v410_v56 = vld [vmem:[#allocation3 + $0xd8] sm:$0xff]  ;;  %v411_v61 = vld [vmem:[#allocation3 + $0xe0] sm:$0xff] }
  0x28   :  { %118 = vst.msk [vmem:[#allocation3 + $0x160] sm:$0xff] %vm73_vm1, %v9710_v8  ;;  %119 = vst.msk [vmem:[#allocation3 + $0x168] sm:$0xff] %vm73_vm1, %v9710_v8  ;;  %v8598_v57 = vpack.c.bf16 %v410_v56, %v409_v55  ;;  %v412_v62 = vld [vmem:[#allocation3 + $0xe8] sm:$0xff]  ;;  %v413_v3 = vld [vmem:[#allocation3 + $0xf0] sm:$0xff] }
  0x29   :  { %120 = vst.msk [vmem:[#allocation3 + $0x170] sm:$0xff] %vm73_vm1, %v9710_v8  ;;  %121 = vst.msk [vmem:[#allocation3 + $0x178] sm:$0xff] %vm73_vm1, %v9710_v8  ;;  %v8602_v63 = vpack.c.bf16 %v412_v62, %v411_v61  ;;  %v414_v4 = vld [vmem:[#allocation3 + $0xf8] sm:$0xff] }
  0x2a   :  { %122 = vst.msk [vmem:[#allocation3 + $0x180] sm:$0xff] %vm73_vm1, %v9710_v8  ;;  %123 = vst.msk [vmem:[#allocation3 + $0x188] sm:$0xff] %vm73_vm1, %v9710_v8  ;;  %v8606_v5 = vpack.c.bf16 %v414_v4, %v413_v3  ;;  %v202_v3 = vlaneseq }
  0x2b   :  { %124 = vst.msk [vmem:[#allocation3 + $0x190] sm:$0xff] %vm73_vm1, %v9710_v8  ;;  %125 = vst.msk [vmem:[#allocation3 + $0x198] sm:$0xff] %vm73_vm1, %v9710_v8  ;;  %v419_v27 = vld [vmem:[#allocation3 + $0x120] sm:$0xff]  ;;  %v420_v28 = vld [vmem:[#allocation3 + $0x128] sm:$0xff] }
  0x2c   :  { %126 = vst.msk [vmem:[#allocation3 + $0x1a0] sm:$0xff] %vm73_vm1, %v9710_v8  ;;  %127 = vst.msk [vmem:[#allocation3 + $0x1a8] sm:$0xff] %vm73_vm1, %v9710_v8  ;;  %v422_v34 = vld [vmem:[#allocation3 + $0x138] sm:$0xff]  ;;  %v203_v4 = vand.u32 127, %v202_v3 }
  0x2d   :  { %128 = vst.msk [vmem:[#allocation3 + $0x1b0] sm:$0xff] %vm73_vm1, %v9710_v8  ;;  %129 = vst.msk [vmem:[#allocation3 + $0x1b8] sm:$0xff] %vm73_vm1, %v9710_v8  ;;  %v424_v40 = vld [vmem:[#allocation3 + $0x148] sm:$0xff] }
  0x2e   :  { %130 = vst.msk [vmem:[#allocation3 + $0x1c0] sm:$0xff] %vm73_vm1, %v9710_v8  ;;  %131 = vst.msk [vmem:[#allocation3 + $0x1c8] sm:$0xff] %vm73_vm1, %v9710_v8  ;;  %v426_v46 = vld [vmem:[#allocation3 + $0x158] sm:$0xff]  ;;  %vm208_vm4 = vcmp.ge.s32.totalorder %v203_v4, 8 }
  0x2f   :  { %132 = vst.msk [vmem:[#allocation3 + $0x1d0] sm:$0xff] %vm73_vm1, %v9710_v8  ;;  %133 = vst.msk [vmem:[#allocation3 + $0x1d8] sm:$0xff] %vm73_vm1, %v9710_v8  ;;  %v428_v52 = vld [vmem:[#allocation3 + $0x168] sm:$0xff] }
  0x30   :  { %134 = vst.msk [vmem:[#allocation3 + $0x1e0] sm:$0xff] %vm73_vm1, %v9710_v8  ;;  %135 = vst.msk [vmem:[#allocation3 + $0x1e8] sm:$0xff] %vm73_vm1, %v9710_v8  ;;  %v430_v58 = vld [vmem:[#allocation3 + $0x178] sm:$0xff] }
  0x31   :  { %136 = vst.msk [vmem:[#allocation3 + $0x1f0] sm:$0xff] %vm73_vm1, %v9710_v8  ;;  %137 = vst.msk [vmem:[#allocation3 + $0x1f8] sm:$0xff] %vm73_vm1, %v9710_v8 }
  0x32   :  { %138 = vst.msk [vmem:[#allocation4] sm:$0xff] %vm73_vm1, %v9710_v8  ;;  %139 = vst.msk [vmem:[#allocation4 + $0x8] sm:$0xff] %vm73_vm1, %v9710_v8 }
  0x33   :  { %140 = vst.msk [vmem:[#allocation4 + $0x10] sm:$0xff] %vm73_vm1, %v9710_v8  ;;  %141 = vst.msk [vmem:[#allocation4 + $0x18] sm:$0xff] %vm73_vm1, %v9710_v8  ;;  %v436_v31 = vld [vmem:[#allocation3 + $0x1a8] sm:$0xff] }
  0x34   :  { %142 = vst.msk [vmem:[#allocation4 + $0x20] sm:$0xff] %vm73_vm1, %v9710_v8  ;;  %143 = vst.msk [vmem:[#allocation4 + $0x28] sm:$0xff] %vm73_vm1, %v9710_v8  ;;  %v438_v37 = vld [vmem:[#allocation3 + $0x1b8] sm:$0xff] }
  0x35   :  { %144 = vst.msk [vmem:[#allocation4 + $0x30] sm:$0xff] %vm73_vm1, %v9710_v8  ;;  %145 = vst.msk [vmem:[#allocation4 + $0x38] sm:$0xff] %vm73_vm1, %v9710_v8  ;;  %v440_v43 = vld [vmem:[#allocation3 + $0x1c8] sm:$0xff] }
  0x36   :  { %146 = vst.msk [vmem:[#allocation4 + $0x40] sm:$0xff] %vm73_vm1, %v9710_v8  ;;  %147 = vst.msk [vmem:[#allocation4 + $0x48] sm:$0xff] %vm73_vm1, %v9710_v8  ;;  %v442_v49 = vld [vmem:[#allocation3 + $0x1d8] sm:$0xff] }
  0x37   :  { %148 = vst.msk [vmem:[#allocation4 + $0x50] sm:$0xff] %vm73_vm1, %v9710_v8  ;;  %149 = vst.msk [vmem:[#allocation4 + $0x58] sm:$0xff] %vm73_vm1, %v9710_v8  ;;  %v444_v55 = vld [vmem:[#allocation3 + $0x1e8] sm:$0xff] }
  0x38   :  { %150 = vst.msk [vmem:[#allocation4 + $0x60] sm:$0xff] %vm73_vm1, %v9710_v8  ;;  %151 = vst.msk [vmem:[#allocation4 + $0x68] sm:$0xff] %vm73_vm1, %v9710_v8  ;;  %v446_v61 = vld [vmem:[#allocation3 + $0x1f8] sm:$0xff] }
  0x39   :  { %152 = vst.msk [vmem:[#allocation4 + $0x70] sm:$0xff] %vm73_vm1, %v9710_v8  ;;  %153 = vst.msk [vmem:[#allocation4 + $0x78] sm:$0xff] %vm73_vm1, %v9710_v8 }
  0x3a   :  { %154 = vst.msk [vmem:[#allocation4 + $0x80] sm:$0xff] %vm73_vm1, %v9710_v8  ;;  %155 = vst.msk [vmem:[#allocation4 + $0x88] sm:$0xff] %vm73_vm1, %v9710_v8 }
  0x3b   :  { %156 = vst.msk [vmem:[#allocation4 + $0x90] sm:$0xff] %vm73_vm1, %v9710_v8  ;;  %157 = vst.msk [vmem:[#allocation4 + $0x98] sm:$0xff] %vm73_vm1, %v9710_v8 }
  0x3c   :  { %158 = vst.msk [vmem:[#allocation4 + $0xa0] sm:$0xff] %vm73_vm1, %v9710_v8  ;;  %159 = vst.msk [vmem:[#allocation4 + $0xa8] sm:$0xff] %vm73_vm1, %v9710_v8 }
  0x3d   :  { %160 = vst.msk [vmem:[#allocation4 + $0xb0] sm:$0xff] %vm73_vm1, %v9710_v8  ;;  %161 = vst.msk [vmem:[#allocation4 + $0xb8] sm:$0xff] %vm73_vm1, %v9710_v8 }
  0x3e   :  { %162 = vst.msk [vmem:[#allocation4 + $0xc0] sm:$0xff] %vm73_vm1, %v9710_v8  ;;  %163 = vst.msk [vmem:[#allocation4 + $0xc8] sm:$0xff] %vm73_vm1, %v9710_v8 }
  0x3f   :  { %164 = vst.msk [vmem:[#allocation4 + $0xd0] sm:$0xff] %vm73_vm1, %v9710_v8  ;;  %165 = vst.msk [vmem:[#allocation4 + $0xd8] sm:$0xff] %vm73_vm1, %v9710_v8 }
  0x40   :  { %166 = vst.msk [vmem:[#allocation4 + $0xe0] sm:$0xff] %vm73_vm1, %v9710_v8  ;;  %167 = vst.msk [vmem:[#allocation4 + $0xe8] sm:$0xff] %vm73_vm1, %v9710_v8 }
  0x41   :  { %168 = vst.msk [vmem:[#allocation4 + $0xf0] sm:$0xff] %vm73_vm1, %v9710_v8  ;;  %169 = vst.msk [vmem:[#allocation4 + $0xf8] sm:$0xff] %vm73_vm1, %v9710_v8  ;;  %v464_v4 = vld [vmem:[#allocation4 + $0x88] sm:$0xff] }
  0x42   :  { %170 = vst.msk [vmem:[#allocation4 + $0x100] sm:$0xff] %vm73_vm1, %v9710_v8  ;;  %171 = vst.msk [vmem:[#allocation4 + $0x108] sm:$0xff] %vm73_vm1, %v9710_v8 }
  0x43   :  { %172 = vst.msk [vmem:[#allocation4 + $0x110] sm:$0xff] %vm73_vm1, %v9710_v8  ;;  %173 = vst.msk [vmem:[#allocation4 + $0x118] sm:$0xff] %vm73_vm1, %v9710_v8 }
  0x44   :  { %174 = vst.msk [vmem:[#allocation4 + $0x120] sm:$0xff] %vm73_vm1, %v9710_v8  ;;  %175 = vst.msk [vmem:[#allocation4 + $0x128] sm:$0xff] %vm73_vm1, %v9710_v8 }
  0x45   :  { %176 = vst.msk [vmem:[#allocation4 + $0x130] sm:$0xff] %vm73_vm1, %v9710_v8  ;;  %177 = vst.msk [vmem:[#allocation4 + $0x138] sm:$0xff] %vm73_vm1, %v9710_v8 }
  0x46   :  { %178 = vst.msk [vmem:[#allocation4 + $0x140] sm:$0xff] %vm73_vm1, %v9710_v8  ;;  %179 = vst.msk [vmem:[#allocation4 + $0x148] sm:$0xff] %vm73_vm1, %v9710_v8 }
  0x47   :  { %180 = vst.msk [vmem:[#allocation4 + $0x150] sm:$0xff] %vm73_vm1, %v9710_v8  ;;  %181 = vst.msk [vmem:[#allocation4 + $0x158] sm:$0xff] %vm73_vm1, %v9710_v8 }
  0x48   :  { %182 = vst.msk [vmem:[#allocation4 + $0x160] sm:$0xff] %vm73_vm1, %v9710_v8  ;;  %183 = vst.msk [vmem:[#allocation4 + $0x168] sm:$0xff] %vm73_vm1, %v9710_v8 }
  0x49   :  { %184 = vst.msk [vmem:[#allocation4 + $0x170] sm:$0xff] %vm73_vm1, %v9710_v8  ;;  %185 = vst.msk [vmem:[#allocation4 + $0x178] sm:$0xff] %vm73_vm1, %v9710_v8 }
  0x4a   :  { %186 = vst.msk [vmem:[#allocation4 + $0x180] sm:$0xff] %vm73_vm1, %v9710_v8  ;;  %187 = vst.msk [vmem:[#allocation4 + $0x188] sm:$0xff] %vm73_vm1, %v9710_v8 }
  0x4b   :  { %188 = vst.msk [vmem:[#allocation4 + $0x190] sm:$0xff] %vm73_vm1, %v9710_v8  ;;  %189 = vst.msk [vmem:[#allocation4 + $0x198] sm:$0xff] %vm73_vm1, %v9710_v8 }
  0x4c   :  { %190 = vst.msk [vmem:[#allocation4 + $0x1a0] sm:$0xff] %vm73_vm1, %v9710_v8  ;;  %191 = vst.msk [vmem:[#allocation4 + $0x1a8] sm:$0xff] %vm73_vm1, %v9710_v8 }
  0x4d   :  { %192 = vst.msk [vmem:[#allocation4 + $0x1b0] sm:$0xff] %vm73_vm1, %v9710_v8  ;;  %193 = vst.msk [vmem:[#allocation4 + $0x1b8] sm:$0xff] %vm73_vm1, %v9710_v8 }
  0x4e   :  { %194 = vst.msk [vmem:[#allocation4 + $0x1c0] sm:$0xff] %vm73_vm1, %v9710_v8  ;;  %195 = vst.msk [vmem:[#allocation4 + $0x1c8] sm:$0xff] %vm73_vm1, %v9710_v8 }
  0x4f   :  { %196 = vst.msk [vmem:[#allocation4 + $0x1d0] sm:$0xff] %vm73_vm1, %v9710_v8  ;;  %197 = vst.msk [vmem:[#allocation4 + $0x1d8] sm:$0xff] %vm73_vm1, %v9710_v8 }
  0x50   :  { %198 = vst.msk [vmem:[#allocation4 + $0x1e0] sm:$0xff] %vm73_vm1, %v9710_v8  ;;  %199 = vst.msk [vmem:[#allocation4 + $0x1e8] sm:$0xff] %vm73_vm1, %v9710_v8 }
  0x51   :  { %200 = vst.msk [vmem:[#allocation4 + $0x1f0] sm:$0xff] %vm73_vm1, %v9710_v8  ;;  %201 = vst.msk [vmem:[#allocation4 + $0x1f8] sm:$0xff] %vm73_vm1, %v9710_v8 }
  0x52   :  { %vm10147_vm3 = vmpackc.low %vm73_vm1, %vm73_vm1 }
  0xec   :  { %v7245_v10 = vpop.f32.mrb[0].mxu1 }
  0xed   :  { %v10117_v12 = vadd.f32 %v7245_v10, %v6216_v9  ;;  %v314_v13 = vpop.f32.mrb[1].mxu1 }
  0xee   :  { %v10119_v14 = vadd.f32 %v6216_v9, %v314_v13  ;;  %v416_v9 = vld [vmem:[#allocation3 + $0x108] sm:$0xff] }
  0xef   :  { %329 = vst.msk [vmem:[#allocation2 + $0x8] sm:$0xff] %vm73_vm1, %v10117_v12 }
  0xf0   :  { %328 = vst.msk [vmem:[#allocation2] sm:$0xff] %vm73_vm1, %v10119_v14  ;;  %357 = vrot.lane.b32.xlu1 %v10119_v14, %s11606_s30  ;;  %332 = vrot.lane.b32.xlu0 %v10119_v14, %s11608_s4 }
  0xf4   :  { %359 = vrot.lane.b32.xlu1 %v10117_v12, %s11606_s30  ;;  %334 = vrot.lane.b32.xlu0 %v10117_v12, %s11608_s4  ;;  %s11627_s30 = smov 80  }
  0xf7   :  { %v375_v6 = vld [vmem:[#allocation2] sm:$0xff] }
  0xf8   :  { %350 = vrot.lane.b32.xlu1 %v10117_v12, %s9714_s0  ;;  %348 = vrot.lane.b32.xlu0 %v10119_v14, %s9714_s0  ;;  %v379_v10 = vmul.f32 0.25, %v375_v6 }
 0x162   :  { %v358_v15 = vpop.permute.xlu1 %357  ;;  %v333_v16 = vpop.permute.xlu0 %332 }
 0x163   :  { %364 = vst.msk [vmem:[#allocation3 + $0x100] sm:$0xff] %vm73_vm1, %v358_v15  ;;  %338 = vst.msk [vmem:[#allocation3] sm:$0xff] %vm73_vm1, %v333_v16  ;;  %v376_v15 = vld [vmem:[#allocation2 + $0x8] sm:$0xff] }
 0x166   :  { %v360_v17 = vpop.permute.xlu1 %359  ;;  %v335_v18 = vpop.permute.xlu0 %334 }
 0x167   :  { %365 = vst.msk [vmem:[#allocation3 + $0x180] sm:$0xff] %vm73_vm1, %v360_v17  ;;  %339 = vst.msk [vmem:[#allocation3 + $0x80] sm:$0xff] %vm73_vm1, %v335_v18  ;;  %v432_v17 = vld [vmem:[#allocation3 + $0x188] sm:$0xff]  ;;  %v380_v18 = vmul.f32 0.25, %v376_v15 }
 0x16a   :  { %v351_v20 = vpop.permute.xlu1 %350  ;;  %v349_v21 = vpop.permute.xlu0 %348  ;;  %v383_v22 = vld [vmem:[#allocation3] sm:$0xff] }
 0x16b   :  { %356 = vst.msk [vmem:[#allocation2 + $0x18] sm:$0xff] %vm73_vm1, %v351_v20  ;;  %355 = vst.msk [vmem:[#allocation2 + $0x10] sm:$0xff] %vm73_vm1, %v349_v21  ;;  %v8546_v24 = vpack.c.bf16 %v384_v19, %v383_v22  ;;  %v415_v7 = vld [vmem:[#allocation3 + $0x100] sm:$0xff]  ;;  %v417_v19 = vld [vmem:[#allocation3 + $0x110] sm:$0xff] }
 0x16c   :  { %v8610_v13 = vpack.c.bf16 %v416_v9, %v415_v7  ;;  %v418_v20 = vld [vmem:[#allocation3 + $0x118] sm:$0xff]  ;;  %v10266_v7 = vsel %vm208_vm4, -1e+30, %v9710_v8  ;;  %v205_v9 = vld [vmem:[%s11622_s5 + $0x8] sm:$0xff] }
 0x16d   :  { %8548 = vmatpush3.bf16.xpose.msk.msra.mxu1 %vm10147_vm3, %v8546_v24  ;;  %v8614_v22 = vpack.c.bf16 %v418_v20, %v417_v19  ;;  %v433_v24 = vld [vmem:[#allocation3 + $0x190] sm:$0xff] }
 0x16e   :  { %v399_v26 = vld [vmem:[#allocation3 + $0x80] sm:$0xff]  ;;  %8549 = vmatprep.subr.bf16.mxu1 %v9711_v11 }
 0x16f   :  { %v8578_v29 = vpack.c.bf16 %v400_v25, %v399_v26  ;;  %v431_v16 = vld [vmem:[#allocation3 + $0x180] sm:$0xff]  ;;  %v434_v25 = vld [vmem:[#allocation3 + $0x198] sm:$0xff] }
 0x170   :  { %v8642_v21 = vpack.c.bf16 %v432_v17, %v431_v16  ;;  %v8646_v26 = vpack.c.bf16 %v434_v25, %v433_v24 }
 0x171   :  { %8580 = vmatpush3.bf16.xpose.msk.msra.mxu0 %vm10147_vm3, %v8578_v29  ;;  %v8618_v29 = vpack.c.bf16 %v420_v28, %v419_v27 }
 0x172   :  { %8581 = vmatprep.subr.bf16.mxu0 %v9711_v11  ;;  %v378_v1 = vld [vmem:[#allocation2 + $0x18] sm:$0xff] }
 0x175   :  { %8552 = vmatpush3.bf16.xpose.msk.msra.mxu1 %vm10147_vm3, %v8550_v30  ;;  %v435_v30 = vld [vmem:[#allocation3 + $0x1a0] sm:$0xff] }
 0x176   :  { %8553 = vmatprep.subr.bf16.mxu1 %v9711_v11  ;;  %v8650_v32 = vpack.c.bf16 %v436_v31, %v435_v30 }
 0x179   :  { %8584 = vmatpush3.bf16.xpose.msk.msra.mxu0 %vm10147_vm3, %v8582_v33  ;;  %v421_v33 = vld [vmem:[#allocation3 + $0x130] sm:$0xff] }
 0x17a   :  { %8585 = vmatprep.subr.bf16.mxu0 %v9711_v11  ;;  %v8622_v35 = vpack.c.bf16 %v422_v34, %v421_v33 }
 0x17d   :  { %8556 = vmatpush3.bf16.xpose.msk.msra.mxu1 %vm10147_vm3, %v8554_v36  ;;  %v437_v36 = vld [vmem:[#allocation3 + $0x1b0] sm:$0xff] }
 0x17e   :  { %8557 = vmatprep.subr.bf16.mxu1 %v9711_v11  ;;  %v8654_v38 = vpack.c.bf16 %v438_v37, %v437_v36  ;;  %v448_v36 = vld [vmem:[#allocation4 + $0x8] sm:$0xff] }
 0x181   :  { %8588 = vmatpush3.bf16.xpose.msk.msra.mxu0 %vm10147_vm3, %v8586_v39  ;;  %v423_v39 = vld [vmem:[#allocation3 + $0x140] sm:$0xff] }
 0x182   :  { %8589 = vmatprep.subr.bf16.mxu0 %v9711_v11  ;;  %v8626_v41 = vpack.c.bf16 %v424_v40, %v423_v39  ;;  %v449_v39 = vld [vmem:[#allocation4 + $0x10] sm:$0xff]  ;;  %v450_v40 = vld [vmem:[#allocation4 + $0x18] sm:$0xff] }
 0x185   :  { %8560 = vmatpush3.bf16.xpose.msk.msra.mxu1 %vm10147_vm3, %v8558_v42  ;;  %v439_v42 = vld [vmem:[#allocation3 + $0x1c0] sm:$0xff] }
 0x186   :  { %8561 = vmatprep.subr.bf16.mxu1 %v9711_v11  ;;  %v8658_v44 = vpack.c.bf16 %v440_v43, %v439_v42  ;;  %v8677_v43 = vpack.c.bf16 %v450_v40, %v449_v39 }
 0x189   :  { %8592 = vmatpush3.bf16.xpose.msk.msra.mxu0 %vm10147_vm3, %v8590_v45  ;;  %v425_v45 = vld [vmem:[#allocation3 + $0x150] sm:$0xff] }
 0x18a   :  { %8593 = vmatprep.subr.bf16.mxu0 %v9711_v11  ;;  %v8630_v47 = vpack.c.bf16 %v426_v46, %v425_v45  ;;  %v452_v45 = vld [vmem:[#allocation4 + $0x28] sm:$0xff] }
 0x18d   :  { %8564 = vmatpush3.bf16.xpose.msk.msra.mxu1 %vm10147_vm3, %v8562_v48  ;;  %v441_v48 = vld [vmem:[#allocation3 + $0x1d0] sm:$0xff] }
 0x18e   :  { %8565 = vmatprep.subr.bf16.mxu1 %v9711_v11  ;;  %v8662_v50 = vpack.c.bf16 %v442_v49, %v441_v48  ;;  %v454_v48 = vld [vmem:[#allocation4 + $0x38] sm:$0xff] }
 0x191   :  { %8596 = vmatpush3.bf16.xpose.msk.msra.mxu0 %vm10147_vm3, %v8594_v51  ;;  %v427_v51 = vld [vmem:[#allocation3 + $0x160] sm:$0xff] }
 0x192   :  { %8597 = vmatprep.subr.bf16.mxu0 %v9711_v11  ;;  %v8634_v53 = vpack.c.bf16 %v428_v52, %v427_v51  ;;  %v456_v51 = vld [vmem:[#allocation4 + $0x48] sm:$0xff] }
 0x195   :  { %8568 = vmatpush3.bf16.xpose.msk.msra.mxu1 %vm10147_vm3, %v8566_v54  ;;  %v443_v54 = vld [vmem:[#allocation3 + $0x1e0] sm:$0xff] }
 0x196   :  { %8569 = vmatprep.subr.bf16.mxu1 %v9711_v11  ;;  %v8666_v56 = vpack.c.bf16 %v444_v55, %v443_v54  ;;  %v458_v54 = vld [vmem:[#allocation4 + $0x58] sm:$0xff] }
 0x199   :  { %8600 = vmatpush3.bf16.xpose.msk.msra.mxu0 %vm10147_vm3, %v8598_v57  ;;  %v429_v57 = vld [vmem:[#allocation3 + $0x170] sm:$0xff] }
 0x19a   :  { %8601 = vmatprep.subr.bf16.mxu0 %v9711_v11  ;;  %v8638_v59 = vpack.c.bf16 %v430_v58, %v429_v57  ;;  %v460_v57 = vld [vmem:[#allocation4 + $0x68] sm:$0xff] }
 0x19d   :  { %8572 = vmatpush3.bf16.xpose.msk.msra.mxu1 %vm10147_vm3, %v8570_v60  ;;  %v445_v60 = vld [vmem:[#allocation3 + $0x1f0] sm:$0xff] }
 0x19e   :  { %8573 = vmatprep.subr.bf16.mxu1 %v9711_v11  ;;  %v8670_v62 = vpack.c.bf16 %v446_v61, %v445_v60  ;;  %v462_v60 = vld [vmem:[#allocation4 + $0x78] sm:$0xff] }
 0x1a1   :  { %8604 = vmatpush3.bf16.xpose.msk.msra.mxu0 %vm10147_vm3, %v8602_v63  ;;  %v377_v63 = vld [vmem:[#allocation2 + $0x10] sm:$0xff] }
 0x1a2   :  { %8605 = vmatprep.subr.bf16.mxu0 %v9711_v11  ;;  %v381_v0 = vmul.f32 0.25, %v377_v63 }
 0x1a5   :  { %8576 = vmatpush3.bf16.xpose.msk.msra.mxu1 %vm10147_vm3, %v8574_v2  ;;  %v382_v2 = vmul.f32 0.25, %v378_v1 }
 0x1a6   :  { %8609 = vmatprep.subr.bf16.mxu1 %v9711_v11 }
 0x1a9   :  { %8608 = vmatpush3.bf16.xpose.msk.msra.mxu0 %vm10147_vm3, %v8606_v5  ;;  %v204_v5 = vld [vmem:[%s11622_s5] sm:$0xff] }
 0x1aa   :  { %8641 = vmatprep.subr.bf16.mxu0 %v9711_v11  ;;  %v206_v6 = vmul.f32 -1e+09, %v204_v5 }
 0x1ac   :  { %7279 = vmatmul.mubr.msk.f32.vlgmr.msra.gmra.mrb[2].mxu1 %vm73_vm1, %v379_v10  ;;  %v10272_v10 = vadd.f32 %v10266_v7, %v206_v6 }
 0x1ad   :  { %8612 = vmatpush3.bf16.xpose.msk.msra.mxu1 %vm10147_vm3, %v8610_v13  ;;  %7348 = vmatprep.mubr.msk.f32.mxu1 %vm9715_vm2, %v9710_v8  ;;  %v207_v13 = vmul.f32 -1e+09, %v205_v9  ;;  %v465_v9 = vld [vmem:[#allocation4 + $0x90] sm:$0xff] }
 0x1ae   :  { %8613 = vmatprep.subr.bf16.mxu1 %v9711_v11 }
 0x1b0   :  { %7314 = vmatmul.mubr.msk.f32.vlgmr.msra.gmra.mrb[0].mxu0 %vm73_vm1, %v380_v18  ;;  %v10276_v18 = vadd.f32 %v10266_v7, %v207_v13  ;;  %v466_v13 = vld [vmem:[#allocation4 + $0x98] sm:$0xff] }
 0x1b1   :  { %8644 = vmatpush3.bf16.xpose.msk.msra.mxu0 %vm10147_vm3, %v8642_v21  ;;  %7383 = vmatprep.mubr.msk.f32.mxu0 %vm9715_vm2, %v9710_v8 }
 0x1b2   :  { %8645 = vmatprep.subr.bf16.mxu0 %v9711_v11 }
 0x1b5   :  { %8616 = vmatpush3.bf16.xpose.msk.msra.mxu1 %vm10147_vm3, %v8614_v22 }
 0x1b6   :  { %8617 = vmatprep.subr.bf16.mxu1 %v9711_v11 }
 0x1b9   :  { %8648 = vmatpush3.bf16.xpose.msk.msra.mxu0 %vm10147_vm3, %v8646_v26 }
 0x1ba   :  { %8649 = vmatprep.subr.bf16.mxu0 %v9711_v11 }
 0x1bd   :  { %8620 = vmatpush3.bf16.xpose.msk.msra.mxu1 %vm10147_vm3, %v8618_v29 }
 0x1be   :  { %8621 = vmatprep.subr.bf16.mxu1 %v9711_v11 }
 0x1c1   :  { %8652 = vmatpush3.bf16.xpose.msk.msra.mxu0 %vm10147_vm3, %v8650_v32 }
 0x1c2   :  { %8653 = vmatprep.subr.bf16.mxu0 %v9711_v11 }
 0x1c5   :  { %8624 = vmatpush3.bf16.xpose.msk.msra.mxu1 %vm10147_vm3, %v8622_v35 }
 0x1c6   :  { %8625 = vmatprep.subr.bf16.mxu1 %v9711_v11 }
 0x1c9   :  { %8656 = vmatpush3.bf16.xpose.msk.msra.mxu0 %vm10147_vm3, %v8654_v38 }
 0x1ca   :  { %8657 = vmatprep.subr.bf16.mxu0 %v9711_v11 }
 0x1cd   :  { %8628 = vmatpush3.bf16.xpose.msk.msra.mxu1 %vm10147_vm3, %v8626_v41 }
 0x1ce   :  { %8629 = vmatprep.subr.bf16.mxu1 %v9711_v11 }
 0x1d1   :  { %8660 = vmatpush3.bf16.xpose.msk.msra.mxu0 %vm10147_vm3, %v8658_v44  ;;  %v451_v44 = vld [vmem:[#allocation4 + $0x20] sm:$0xff] }
 0x1d2   :  { %8661 = vmatprep.subr.bf16.mxu0 %v9711_v11  ;;  %v8680_v46 = vpack.c.bf16 %v452_v45, %v451_v44  ;;  %v480_v44 = vld [vmem:[#allocation4 + $0x108] sm:$0xff] }
 0x1d5   :  { %8632 = vmatpush3.bf16.xpose.msk.msra.mxu1 %vm10147_vm3, %v8630_v47  ;;  %v453_v47 = vld [vmem:[#allocation4 + $0x30] sm:$0xff] }
 0x1d6   :  { %8633 = vmatprep.subr.bf16.mxu1 %v9711_v11  ;;  %v8683_v49 = vpack.c.bf16 %v454_v48, %v453_v47  ;;  %v481_v48 = vld [vmem:[#allocation4 + $0x110] sm:$0xff] }
 0x1d9   :  { %8664 = vmatpush3.bf16.xpose.msk.msra.mxu0 %vm10147_vm3, %v8662_v50  ;;  %v455_v50 = vld [vmem:[#allocation4 + $0x40] sm:$0xff] }
 0x1da   :  { %8665 = vmatprep.subr.bf16.mxu0 %v9711_v11  ;;  %v8686_v52 = vpack.c.bf16 %v456_v51, %v455_v50  ;;  %v496_v51 = vld [vmem:[#allocation4 + $0x188] sm:$0xff] }
 0x1dd   :  { %8636 = vmatpush3.bf16.xpose.msk.msra.mxu1 %vm10147_vm3, %v8634_v53  ;;  %v457_v53 = vld [vmem:[#allocation4 + $0x50] sm:$0xff] }
 0x1de   :  { %8637 = vmatprep.subr.bf16.mxu1 %v9711_v11  ;;  %v8689_v55 = vpack.c.bf16 %v458_v54, %v457_v53  ;;  %v497_v53 = vld [vmem:[#allocation4 + $0x190] sm:$0xff]  ;;  %v498_v54 = vld [vmem:[#allocation4 + $0x198] sm:$0xff] }
 0x1e1   :  { %8668 = vmatpush3.bf16.xpose.msk.msra.mxu0 %vm10147_vm3, %v8666_v56  ;;  %v459_v56 = vld [vmem:[#allocation4 + $0x60] sm:$0xff] }
 0x1e2   :  { %8669 = vmatprep.subr.bf16.mxu0 %v9711_v11  ;;  %v10305_v58 = vpack.c.bf16 %v460_v57, %v459_v56  ;;  %v483_v57 = vld [vmem:[#allocation4 + $0x120] sm:$0xff] }
 0x1e5   :  { %8640 = vmatpush3.bf16.xpose.msk.msra.mxu1 %vm10147_vm3, %v8638_v59  ;;  %v461_v59 = vld [vmem:[#allocation4 + $0x70] sm:$0xff] }
 0x1e6   :  { %8673 = vmatprep.subr.bf16.mxu1 %v9711_v11  ;;  %v10311_v61 = vpack.c.bf16 %v462_v60, %v461_v59  ;;  %v484_v59 = vld [vmem:[#allocation4 + $0x128] sm:$0xff] }
 0x1e9   :  { %8672 = vmatpush3.bf16.xpose.msk.msra.mxu0 %vm10147_vm3, %v8670_v62 }
 0x1ea   :  { %8697 = vmatprep.subr.bf16.mxu0 %v9711_v11 }
 0x1ec   :  { %7349 = vmatmul.mubr.msk.f32.vlgmr.msra.gmra.mrb[4].mxu1 %vm73_vm1, %v381_v0 }
 0x1ed   :  { %7418 = vmatprep.mubr.msk.f32.mxu1 %vm9715_vm2, %v9710_v8 }
 0x1f0   :  { %7384 = vmatmul.mubr.msk.f32.vlgmr.msra.gmra.mrb[2].mxu0 %vm73_vm1, %v382_v2 }
 0x1f1   :  { %7453 = vmatprep.mubr.msk.f32.mxu0 %vm9715_vm2, %v9710_v8 }
 0x27f   :  { %v632_v15 = vpop.f32.mrb[2].mxu1 }
 0x280   :  { %v633_v16 = vadd.f32 %v632_v15, %v10272_v10  ;;  %v7280_v17 = vpop.f32.mrb[3].mxu1 }
 0x281   :  { %v8701_v17 = vpack.c.bf16 %v466_v13, %v465_v9  ;;  %v487_v9 = vld [vmem:[#allocation4 + $0x140] sm:$0xff]  ;;  %v488_v13 = vld [vmem:[#allocation4 + $0x148] sm:$0xff] }
 0x282   :  { %999 = vmax.xlane.f32.xlu0 %v633_v16 }
 0x283   :  { %v753_v19 = vpop.f32.mrb[0].mxu0 }
 0x284   :  { %v754_v20 = vadd.f32 %v753_v19, %v10276_v18  ;;  %v7315_v21 = vpop.f32.mrb[1].mxu0  ;;  %v467_v19 = vld [vmem:[#allocation4 + $0xa0] sm:$0xff] }
 0x286   :  { %1001 = vmax.xlane.f32.xlu1 %v754_v20 }
 0x297   :  { %340 = vrot.lane.b32.xlu1 %v10119_v14, %s11604_s26 }
 0x2bf   :  { %v874_v22 = vpop.f32.mrb[4].mxu1 }
 0x2c0   :  { %v7350_v24 = vpop.f32.mrb[5].mxu1  ;;  %v10286_v28 = vadd.f32 %v874_v22, %v10272_v10  ;;  %v469_v22 = vld [vmem:[#allocation4 + $0xb0] sm:$0xff] }
 0x2c1   :  { %v470_v24 = vld [vmem:[#allocation4 + $0xb8] sm:$0xff] }
 0x2c3   :  { %v995_v25 = vpop.f32.mrb[2].mxu0 }
 0x2c4   :  { %v10282_v26 = vadd.f32 %v995_v25, %v10276_v18  ;;  %v7385_v27 = vpop.f32.mrb[3].mxu0  ;;  %v8707_v25 = vpack.c.bf16 %v470_v24, %v469_v22  ;;  %v490_v22 = vld [vmem:[#allocation4 + $0x158] sm:$0xff] }
 0x2c5   :  { %v472_v27 = vld [vmem:[#allocation4 + $0xc8] sm:$0xff] }
 0x2c6   :  { %1005 = vmax.xlane.f32.xlu0 %v10282_v26 }
 0x2ca   :  { %1003 = vmax.xlane.f32.xlu0 %v10286_v28 }
 0x2e0   :  { %342 = vrot.lane.b32.xlu0 %v10117_v12, %s11604_s26 }
 0x30f   :  { %v1000_v29 = vpop.xlane.xlu0 %999 }
 0x310   :  { %v1007_v30 = vsub.f32 %v633_v16, %v1000_v29  ;;  %v473_v29 = vld [vmem:[#allocation4 + $0xd0] sm:$0xff] }
 0x312   :  { %v1011_v31 = vmul.f32 1.442695, %v1007_v30  ;;  %v474_v30 = vld [vmem:[#allocation4 + $0xd8] sm:$0xff] }
 0x313   :  { %v1002_v32 = vpop.xlane.xlu1 %1001 }
 0x314   :  { %9580 = vpow2.f32 %v1011_v31  ;;  %v1008_v33 = vsub.f32 %v754_v20, %v1002_v32  ;;  %v468_v20 = vld [vmem:[#allocation4 + $0xa8] sm:$0xff]  ;;  %v8713_v31 = vpack.c.bf16 %v474_v30, %v473_v29  ;;  %v475_v32 = vld [vmem:[#allocation4 + $0xe0] sm:$0xff] }
 0x315   :  { %v8704_v21 = vpack.c.bf16 %v468_v20, %v467_v19  ;;  %v8734_v19 = vpack.c.bf16 %v488_v13, %v487_v9  ;;  %v504_v20 = vld [vmem:[#allocation4 + $0x1c8] sm:$0xff]  ;;  %v1624_v13 = vld [vmem:[%s11582_s10] sm:$0xff] }
 0x316   :  { %v1013_v34 = vmul.f32 1.442695, %v1008_v33  ;;  %v476_v33 = vld [vmem:[#allocation4 + $0xe8] sm:$0xff] }
 0x317   :  { %v341_v35 = vpop.permute.xlu1 %340  ;;  %v492_v29 = vld [vmem:[#allocation4 + $0x168] sm:$0xff] }
 0x318   :  { %9582 = vpow2.f32 %v1013_v34  ;;  %346 = vst.msk [vmem:[#allocation4] sm:$0xff] %vm73_vm1, %v341_v35  ;;  %v8716_v34 = vpack.c.bf16 %v476_v33, %v475_v32  ;;  %v477_v35 = vld [vmem:[#allocation4 + $0xf0] sm:$0xff]  ;;  %v508_v33 = vld [vmem:[#allocation4 + $0x1e8] sm:$0xff] }
 0x31e   :  { %v10292_v37 = vpop.eup %9580 }
 0x31f   :  { %1019 = vadd.xlane.f32.xlu1 %v10292_v37  ;;  %v447_v38 = vld [vmem:[#allocation4] sm:$0xff] }
 0x320   :  { %v8674_v41 = vpack.c.bf16 %v448_v36, %v447_v38  ;;  %v478_v36 = vld [vmem:[#allocation4 + $0xf8] sm:$0xff] }
 0x321   :  { %v8719_v38 = vpack.c.bf16 %v478_v36, %v477_v35  ;;  %v494_v35 = vld [vmem:[#allocation4 + $0x178] sm:$0xff] }
 0x322   :  { %v10295_v42 = vpop.eup %9582  ;;  %8675 = vmatpush3.bf16.msra.mxu1 %v8674_v41 }
 0x323   :  { %1021 = vadd.xlane.f32.xlu0 %v10295_v42  ;;  %8676 = vmatprep.subr.bf16.mxu1 %v9711_v11 }
 0x326   :  { %8678 = vmatpush3.bf16.msra.mxu1 %v8677_v43 }
 0x327   :  { %8679 = vmatprep.subr.bf16.mxu1 %v9711_v11 }
 0x32a   :  { %8681 = vmatpush3.bf16.msra.mxu1 %v8680_v46 }
 0x32b   :  { %8682 = vmatprep.subr.bf16.mxu1 %v9711_v11 }
 0x32e   :  { %8684 = vmatpush3.bf16.msra.mxu1 %v8683_v49  ;;  %v482_v49 = vld [vmem:[#allocation4 + $0x118] sm:$0xff] }
 0x32f   :  { %8685 = vmatprep.subr.bf16.mxu1 %v9711_v11 }
 0x330   :  { %366 = vrot.lane.b32.xlu1 %v10119_v14, %s11602_s2 }
 0x332   :  { %8687 = vmatpush3.bf16.msra.mxu1 %v8686_v52 }
 0x333   :  { %8688 = vmatprep.subr.bf16.mxu1 %v9711_v11 }
 0x336   :  { %8690 = vmatpush3.bf16.msra.mxu1 %v8689_v55  ;;  %v8725_v55 = vpack.c.bf16 %v482_v49, %v481_v48  ;;  %v323_v49 = vld [vmem:[%s11623_s1] sm:$0xff] }
 0x337   :  { %8691 = vmatprep.subr.bf16.mxu1 %v9711_v11 }
 0x339   :  { %368 = vrot.lane.b32.xlu0 %v10117_v12, %s11602_s2  ;;  %s11629_s2 = smov 48  }
 0x33a   :  { %8693 = vmatpush3.bf16.msra.mxu1 %v10305_v58 }
 0x33b   :  { %8694 = vmatprep.subr.bf16.mxu1 %v9711_v11 }
 0x33e   :  { %8696 = vmatpush3.bf16.msra.mxu1 %v10311_v61 }
 0x33f   :  { %8721 = vmatprep.subr.bf16.mxu1 %v9711_v11 }
 0x353   :  { %v1006_v14 = vpop.xlane.xlu0 %1005 }
 0x354   :  { %v1010_v62 = vsub.f32 %v10282_v26, %v1006_v14  ;;  %v471_v26 = vld [vmem:[#allocation4 + $0xc0] sm:$0xff]  ;;  %v8749_v14 = vpack.c.bf16 %v498_v54, %v497_v53 }
 0x356   :  { %v1017_v63 = vmul.f32 1.442695, %v1010_v62  ;;  %v499_v62 = vld [vmem:[#allocation4 + $0x1a0] sm:$0xff] }
 0x357   :  { %v1004_v0 = vpop.xlane.xlu0 %1003 }
 0x358   :  { %9584 = vpow2.f32 %v1017_v63  ;;  %v1009_v1 = vsub.f32 %v10286_v28, %v1004_v0  ;;  %v8710_v28 = vpack.c.bf16 %v472_v27, %v471_v26  ;;  %v8728_v63 = vpack.c.bf16 %v484_v59, %v483_v57  ;;  %v500_v0 = vld [vmem:[#allocation4 + $0x1a8] sm:$0xff]  ;;  %v506_v27 = vld [vmem:[#allocation4 + $0x1d8] sm:$0xff] }
 0x35a   :  { %v1015_v2 = vmul.f32 1.442695, %v1009_v1  ;;  %v486_v1 = vld [vmem:[#allocation4 + $0x138] sm:$0xff] }
 0x35b   :  { %v343_v12 = vpop.permute.xlu0 %342 }
 0x35c   :  { %9586 = vpow2.f32 %v1015_v2  ;;  %347 = vst.msk [vmem:[#allocation4 + $0x80] sm:$0xff] %vm73_vm1, %v343_v12  ;;  %v8752_v2 = vpack.c.bf16 %v500_v0, %v499_v62  ;;  %v501_v12 = vld [vmem:[#allocation4 + $0x1b0] sm:$0xff] }
 0x362   :  { %v10319_v5 = vpop.eup %9584 }
 0x363   :  { %1025 = vadd.xlane.f32.xlu0 %v10319_v5  ;;  %v463_v6 = vld [vmem:[#allocation4 + $0x80] sm:$0xff] }
 0x364   :  { %v8698_v15 = vpack.c.bf16 %v464_v4, %v463_v6  ;;  %v502_v6 = vld [vmem:[#allocation4 + $0x1b8] sm:$0xff] }
 0x366   :  { %v10322_v16 = vpop.eup %9586  ;;  %8699 = vmatpush3.bf16.msra.mxu0 %v8698_v15  ;;  %v8755_v15 = vpack.c.bf16 %v502_v6, %v501_v12  ;;  %v9677_v12 = vld [vmem:[%s11618_s25] sm:$0xff] }
 0x367   :  { %1023 = vadd.xlane.f32.xlu1 %v10322_v16  ;;  %8700 = vmatprep.subr.bf16.mxu0 %v9711_v11 }
 0x36a   :  { %8702 = vmatpush3.bf16.msra.mxu0 %v8701_v17  ;;  %v503_v17 = vld [vmem:[#allocation4 + $0x1c0] sm:$0xff] }
 0x36b   :  { %8703 = vmatprep.subr.bf16.mxu0 %v9711_v11  ;;  %v8758_v24 = vpack.c.bf16 %v504_v20, %v503_v17  ;;  %v1626_v17 = vld [vmem:[%s11582_s10 + $0x10] sm:$0xff]  ;;  %v1627_v20 = vld [vmem:[%s11582_s10 + $0x18] sm:$0xff] }
 0x36e   :  { %8705 = vmatpush3.bf16.msra.mxu0 %v8704_v21  ;;  %v489_v21 = vld [vmem:[#allocation4 + $0x150] sm:$0xff] }
 0x36f   :  { %8706 = vmatprep.subr.bf16.mxu0 %v9711_v11  ;;  %v8737_v26 = vpack.c.bf16 %v490_v22, %v489_v21  ;;  %v71_v21 = vld [vmem:[%s11624_s27] sm:$0xff]  ;;  %v8789_v22 = vpack.c.bf16 %v1627_v20, %v1626_v17 }
 0x370   :  { %v10484_v17 = vld [vmem:[%s11590_s18] sm:$0x7] }
 0x372   :  { %8708 = vmatpush3.bf16.msra.mxu0 %v8707_v25  ;;  %v505_v25 = vld [vmem:[#allocation4 + $0x1d0] sm:$0xff] }
 0x373   :  { %8709 = vmatprep.subr.bf16.mxu0 %v9711_v11  ;;  %v8761_v30 = vpack.c.bf16 %v506_v27, %v505_v25 }
 0x376   :  { %8711 = vmatpush3.bf16.msra.mxu0 %v8710_v28  ;;  %v491_v28 = vld [vmem:[#allocation4 + $0x160] sm:$0xff] }
 0x377   :  { %8712 = vmatprep.subr.bf16.mxu0 %v9711_v11  ;;  %v8740_v32 = vpack.c.bf16 %v492_v29, %v491_v28 }
 0x37a   :  { %8714 = vmatpush3.bf16.msra.mxu0 %v8713_v31  ;;  %v507_v31 = vld [vmem:[#allocation4 + $0x1e0] sm:$0xff] }
 0x37b   :  { %8715 = vmatprep.subr.bf16.mxu0 %v9711_v11  ;;  %v8764_v36 = vpack.c.bf16 %v508_v33, %v507_v31 }
 0x37e   :  { %8717 = vmatpush3.bf16.msra.mxu0 %v8716_v34  ;;  %v493_v34 = vld [vmem:[#allocation4 + $0x170] sm:$0xff] }
 0x37f   :  { %8718 = vmatprep.subr.bf16.mxu0 %v9711_v11 }
 0x382   :  { %8720 = vmatpush3.bf16.msra.mxu0 %v8719_v38  ;;  %v8743_v38 = vpack.c.bf16 %v494_v35, %v493_v34  ;;  %v1532_v35 = vld [vmem:[%s11580_s8] sm:$0xff] }
 0x383   :  { %8745 = vmatprep.subr.bf16.mxu0 %v9711_v11 }
 0x3ac   :  { %v1020_v39 = vpop.xlane.xlu1 %1019 }
 0x3ad   :  { %9588 = vrcp.f32 %v1020_v39  ;;  %v509_v39 = vld [vmem:[#allocation4 + $0x1f0] sm:$0xff] }
 0x3b0   :  { %v367_v40 = vpop.permute.xlu1 %366  ;;  %v1022_v41 = vpop.xlane.xlu0 %1021 }
 0x3b1   :  { %373 = vst.msk [vmem:[#allocation4 + $0x100] sm:$0xff] %vm73_vm1, %v367_v40  ;;  %9590 = vrcp.f32 %v1022_v41  ;;  %v510_v40 = vld [vmem:[#allocation4 + $0x1f8] sm:$0xff] }
 0x3b2   :  { %v8767_v41 = vpack.c.bf16 %v510_v40, %v509_v39  ;;  %v1534_v39 = vld [vmem:[%s11580_s8 + $0x10] sm:$0xff]  ;;  %v1535_v40 = vld [vmem:[%s11580_s8 + $0x18] sm:$0xff] }
 0x3b4   :  { %v369_v43 = vpop.permute.xlu0 %368 }
 0x3b5   :  { %374 = vst.msk [vmem:[#allocation4 + $0x180] sm:$0xff] %vm73_vm1, %v369_v43 }
 0x3b7   :  { %v9589_v45 = vpop.eup %9588 }
 0x3b8   :  { %v1031_v46 = vmul.f32 %v9589_v45, %v10292_v37  ;;  %v479_v47 = vld [vmem:[#allocation4 + $0x100] sm:$0xff] }
 0x3b9   :  { %v8722_v50 = vpack.c.bf16 %v480_v44, %v479_v47 }
 0x3ba   :  { %1035 = vst [vmem:[%s11593_s21] sm:$0xff] %v1031_v46  ;;  %7419 = vmatmul.mubr.f32.vlgmr.msra.gmra.mrb[6].mxu1 %v1031_v46 }
 0x3bb   :  { %v9591_v52 = vpop.eup %9590  ;;  %8723 = vmatpush3.bf16.msra.mxu1 %v8722_v50  ;;  %7488 = vmatprep.mubr.msk.f32.mxu1 %vm9715_vm2, %v9710_v8 }
 0x3bc   :  { %v1032_v37 = vmul.f32 %v9591_v52, %v10295_v42  ;;  %v495_v56 = vld [vmem:[#allocation4 + $0x180] sm:$0xff]  ;;  %8724 = vmatprep.subr.bf16.mxu1 %v9711_v11  ;;  %v485_v42 = vld [vmem:[#allocation4 + $0x130] sm:$0xff] }
 0x3bd   :  { %v8746_v60 = vpack.c.bf16 %v496_v51, %v495_v56  ;;  %v8731_v4 = vpack.c.bf16 %v486_v1, %v485_v42  ;;  %v326_v51 = vld [vmem:[%s11623_s1 + $0x18] sm:$0xff]  ;;  %v9676_v1 = vld [vmem:[%s11618_s25 + $0x8] sm:$0xff] }
 0x3be   :  { %1036 = vst [vmem:[%s11593_s21 + $0x8] sm:$0xff] %v1032_v37  ;;  %7454 = vmatmul.mubr.f32.vlgmr.msra.gmra.mrb[4].mxu0 %v1032_v37 }
 0x3bf   :  { %8747 = vmatpush3.bf16.msra.mxu0 %v8746_v60  ;;  %8726 = vmatpush3.bf16.msra.mxu1 %v8725_v55 }
 0x3c0   :  { %8748 = vmatprep.subr.bf16.mxu0 %v9711_v11  ;;  %8727 = vmatprep.subr.bf16.mxu1 %v9711_v11 }
 0x3c1   :  { %7523 = vmatprep.mubr.msk.f32.mxu0 %vm9715_vm2, %v9710_v8 }
 0x3c3   :  { %8750 = vmatpush3.bf16.msra.mxu0 %v8749_v14  ;;  %8729 = vmatpush3.bf16.msra.mxu1 %v8728_v63  ;;  %v6291_v14 = vld [vmem:[%s11579_s7] ss:$0 sm:$0xff] }
 0x3c4   :  { %8751 = vmatprep.subr.bf16.mxu0 %v9711_v11  ;;  %8730 = vmatprep.subr.bf16.mxu1 %v9711_v11 }
 0x3c7   :  { %8753 = vmatpush3.bf16.msra.mxu0 %v8752_v2  ;;  %8732 = vmatpush3.bf16.msra.mxu1 %v8731_v4 }
 0x3c8   :  { %8754 = vmatprep.subr.bf16.mxu0 %v9711_v11  ;;  %8733 = vmatprep.subr.bf16.mxu1 %v9711_v11 }
 0x3cb   :  { %8756 = vmatpush3.bf16.msra.mxu0 %v8755_v15  ;;  %8735 = vmatpush3.bf16.msra.mxu1 %v8734_v19  ;;  %v1625_v15 = vld [vmem:[%s11582_s10 + $0x8] sm:$0xff] }
 0x3cc   :  { %8757 = vmatprep.subr.bf16.mxu0 %v9711_v11  ;;  %8736 = vmatprep.subr.bf16.mxu1 %v9711_v11  ;;  %v8785_v19 = vpack.c.bf16 %v1625_v15, %v1624_v13  ;;  %v1798_v13 = vld [vmem:[#allocation3 + $0xe8] sm:$0xff] }
 0x3cf   :  { %8759 = vmatpush3.bf16.msra.mxu0 %v8758_v24  ;;  %8738 = vmatpush3.bf16.msra.mxu1 %v8737_v26  ;;  %v72_v24 = vld [vmem:[%s11624_s27 + $0x8] sm:$0xff] }
 0x3d0   :  { %8760 = vmatprep.subr.bf16.mxu0 %v9711_v11  ;;  %8739 = vmatprep.subr.bf16.mxu1 %v9711_v11 }
 0x3d3   :  { %8762 = vmatpush3.bf16.msra.mxu0 %v8761_v30  ;;  %8741 = vmatpush3.bf16.msra.mxu1 %v8740_v32 }
 0x3d4   :  { %8763 = vmatprep.subr.bf16.mxu0 %v9711_v11  ;;  %8742 = vmatprep.subr.bf16.mxu1 %v9711_v11 }
 0x3d7   :  { %8765 = vmatpush3.bf16.msra.mxu0 %v8764_v36  ;;  %8744 = vmatpush3.bf16.msra.mxu1 %v8743_v38  ;;  %v1533_v36 = vld [vmem:[%s11580_s8 + $0x8] sm:$0xff] }
 0x3d8   :  { %8766 = vmatprep.subr.bf16.mxu0 %v9711_v11  ;;  %v8777_v38 = vpack.c.bf16 %v1533_v36, %v1532_v35 }
 0x3db   :  { %8768 = vmatpush3.bf16.msra.mxu0 %v8767_v41  ;;  %v8781_v41 = vpack.c.bf16 %v1535_v40, %v1534_v39  ;;  %v1774_v39 = vld [vmem:[#allocation3 + $0x28] sm:$0xff] }
 0x3dc   :  { %8778 = vmatprep.subr.bf16.mxu0 %v8777_v38 }
 0x3f0   :  { %v1026_v43 = vpop.xlane.xlu0 %1025 }
 0x3f1   :  { %9592 = vrcp.f32 %v1026_v43  ;;  %v6295_v43 = vld [vmem:[%s11583_s11] ss:$0 sm:$0xff] }
 0x3f4   :  { %v1024_v44 = vpop.xlane.xlu1 %1023 }
 0x3f5   :  { %9594 = vrcp.f32 %v1024_v44 }
 0x3fb   :  { %v9593_v45 = vpop.eup %9592 }
 0x3fc   :  { %v1034_v46 = vmul.f32 %v9593_v45, %v10319_v5  ;;  %v324_v5 = vld [vmem:[%s11623_s1 + $0x8] sm:$0xff] }
 0x3fd   :  { %v8769_v50 = vpack.c.bf16 %v324_v5, %v323_v49 }
 0x3fe   :  { %1038 = vst [vmem:[%s11593_s21 + $0x18] sm:$0xff] %v1034_v46  ;;  %7524 = vmatmul.mubr.f32.vlgmr.msra.gmra.mrb[6].mxu0 %v1034_v46 }
 0x3ff   :  { %v9595_v47 = vpop.eup %9594  ;;  %8770 = vmatprep.subr.bf16.mxu1 %v8769_v50  ;;  %8780 = vmatpush3.bf16.msra.mxu0 %v8777_v38  ;;  %v1773_v38 = vld [vmem:[#allocation3 + $0x20] sm:$0xff] }
 0x400   :  { %v1033_v48 = vmul.f32 %v9595_v47, %v10322_v16  ;;  %v325_v16 = vld [vmem:[%s11623_s1 + $0x10] sm:$0xff]  ;;  %8782 = vmatprep.subr.bf16.mxu0 %v8781_v41  ;;  %v8802_v40 = vpack.c.bf16 %v1774_v39, %v1773_v38 }
 0x401   :  { %v8773_v52 = vpack.c.bf16 %v326_v51, %v325_v16  ;;  %v1788_v16 = vld [vmem:[#allocation3 + $0x98] sm:$0xff] }
 0x402   :  { %1037 = vst [vmem:[%s11593_s21 + $0x10] sm:$0xff] %v1033_v48  ;;  %7489 = vmatmul.mubr.f32.vlgmr.msra.gmra.mrb[8].mxu1 %v1033_v48  ;;  %v1786_v48 = vld [vmem:[#allocation3 + $0x88] sm:$0xff] }
 0x403   :  { %8772 = vmatpush3.bf16.msra.mxu1 %v8769_v50  ;;  %8784 = vmatpush3.bf16.msra.mxu0 %v8781_v41  ;;  %v1787_v50 = vld [vmem:[#allocation3 + $0x90] sm:$0xff] }
 0x404   :  { %8774 = vmatprep.subr.bf16.mxu1 %v8773_v52  ;;  %8793 = vmatprep.subr.bf16.mxu0 %v9711_v11  ;;  %v8830_v51 = vpack.c.bf16 %v1788_v16, %v1787_v50  ;;  %v1775_v41 = vld [vmem:[#allocation3 + $0x30] sm:$0xff]  ;;  %v1780_v50 = vld [vmem:[#allocation3 + $0x58] sm:$0xff] }
 0x48d   :  { %v1105_v53 = vpop.f32.mrb[6].mxu1 }
 0x48e   :  { %v7420_v54 = vpop.f32.mrb[7].mxu1  ;;  %7530 = vmatprep.mubr.msk.f32.mxu1 %vm73_vm1, %v1105_v53  ;;  %v1790_v53 = vld [vmem:[#allocation3 + $0xa8] sm:$0xff] }
 0x491   :  { %v1175_v55 = vpop.f32.mrb[4].mxu0 }
 0x492   :  { %v7455_v37 = vpop.f32.mrb[5].mxu0  ;;  %7531 = vmatmul.mubr.msk.f32.vlgmr.msra.gmra.mrb[10].mxu1 %vm73_vm1, %v1175_v55  ;;  %v1791_v55 = vld [vmem:[#allocation3 + $0xb0] sm:$0xff] }
 0x493   :  { %8776 = vmatpush3.bf16.msra.mxu1 %v8773_v52  ;;  %v1789_v52 = vld [vmem:[#allocation3 + $0xa0] sm:$0xff]  ;;  %v1792_v37 = vld [vmem:[#allocation3 + $0xb8] sm:$0xff] }
 0x494   :  { %8786 = vmatprep.subr.bf16.mxu1 %v8785_v19  ;;  %v8834_v54 = vpack.c.bf16 %v1790_v53, %v1789_v52  ;;  %v1782_v52 = vld [vmem:[#allocation3 + $0x68] sm:$0xff] }
 0x4d1   :  { %v1315_v56 = vpop.f32.mrb[6].mxu0 }
 0x4d2   :  { %v7525_v57 = vpop.f32.mrb[7].mxu0 }
 0x4d3   :  { %v1793_v57 = vld [vmem:[#allocation3 + $0xc0] sm:$0xff] }
 0x4d5   :  { %v1245_v59 = vpop.f32.mrb[8].mxu1 }
 0x4d6   :  { %v7490_v60 = vpop.f32.mrb[9].mxu1  ;;  %7537 = vmatprep.mubr.msk.f32.mxu1 %vm73_vm1, %v1245_v59  ;;  %v1794_v59 = vld [vmem:[#allocation3 + $0xc8] sm:$0xff] }
 0x4d7   :  { %7538 = vmatmul.mubr.msk.f32.vlgmr.msra.gmra.mrb[10].mxu1 %vm73_vm1, %v1315_v56  ;;  %v8838_v56 = vpack.c.bf16 %v1792_v37, %v1791_v55  ;;  %v8842_v60 = vpack.c.bf16 %v1794_v59, %v1793_v57  ;;  %v1800_v55 = vld [vmem:[#allocation3 + $0xf8] sm:$0xff] }
 0x4d8   :  { %7559 = vmatprep.mubr.msk.f32.mxu1 %vm241_vm0, %v71_v21  ;;  %8788 = vmatpush3.bf16.msra.mxu1 %v8785_v19  ;;  %v1784_v57 = vld [vmem:[#allocation3 + $0x78] sm:$0xff] }
 0x4d9   :  { %8790 = vmatprep.subr.bf16.mxu1 %v8789_v22 }
 0x4dc   :  { %8792 = vmatpush3.bf16.msra.mxu1 %v8789_v22 }
 0x4dd   :  { %8825 = vmatprep.subr.bf16.mxu1 %v9711_v11 }
 0x4df   :  { %7560 = vmatmul.mubr.msk.f32.vlgmr.msra.gmra.mrb[12].mxu1 %vm241_vm0, %v72_v24 }
 0x4e0   :  { %7629 = vmatprep.mubr.msk.f32.mxu1 %vm9715_vm2, %v9710_v8 }
 0x5aa   :  { %v7539_v62 = vpop.f32.mrb[10].mxu1 }
 0x5ab   :  { %v1490_v63 = vadd.f32 %v7539_v62, %v6291_v14  ;;  %v1472_v0 = vpop.f32.mrb[11].mxu1  ;;  %v1795_v62 = vld [vmem:[#allocation3 + $0xd0] sm:$0xff] }
 0x5ac   :  { %v1489_v42 = vadd.f32 %v6291_v14, %v1472_v0 }
 0x5ad   :  { %v1492_v2 = vadd.f32 %v9676_v1, %v1490_v63  ;;  %v1796_v63 = vld [vmem:[#allocation3 + $0xd8] sm:$0xff] }
 0x5ae   :  { %v1491_v4 = vadd.f32 %v9677_v12, %v1489_v42  ;;  %v8846_v12 = vpack.c.bf16 %v1796_v63, %v1795_v62  ;;  %v6292_v62 = vld [vmem:[%s11581_s9] ss:$0 sm:$0xff] }
 0x5af   :  { %v1496_v6 = vsel %vm241_vm0, %v1492_v2, 0.0 }
 0x5b0   :  { %1497 = vadd.xlane.f32.xlu0 %v1496_v6  ;;  %v1493_v9 = vsel %vm241_vm0, %v1491_v4, 0.0  ;;  %v10473_v6 = vshrl.u32 %v202_v3, 7  ;;  %v10489_v3 = vld [vmem:[%s11591_s19] sm:$0x7] }
 0x5b1   :  { %1494 = vadd.xlane.f32.xlu1 %v1493_v9  ;;  %v1797_v9 = vld [vmem:[#allocation3 + $0xe0] sm:$0xff] }
 0x5b2   :  { %v7561_v44 = vpop.f32.mrb[12].mxu1  ;;  %v10479_v15 = vsub.s32 0, %v10473_v6  ;;  %v8850_v19 = vpack.c.bf16 %v1798_v13, %v1797_v9  ;;  %v1802_v9 = vld [vmem:[#allocation3 + $0x108] sm:$0xff] }
 0x5b3   :  { %v10445_v45 = vadd.f32 %v7561_v44, %v6295_v43  ;;  %v1707_v46 = vpop.f32.mrb[13].mxu1 }
 0x5b4   :  { %v10447_v47 = vadd.f32 %v6295_v43, %v1707_v46  ;;  %v1523_v20 = vrot.slane %v10484_v17, %v10479_v15  ;;  %v1776_v43 = vld [vmem:[#allocation3 + $0x38] sm:$0xff]  ;;  %v1777_v46 = vld [vmem:[#allocation3 + $0x40] sm:$0xff] }
 0x5b5   :  { %1724 = vst.msk [vmem:[#allocation3 + $0x80] sm:$0xff] %vm73_vm1, %v10445_v45  ;;  %v8806_v44 = vpack.c.bf16 %v1776_v43, %v1775_v41  ;;  %v1824_v41 = vld [vmem:[#allocation3 + $0x1b8] sm:$0xff]  ;;  %v1807_v43 = vld [vmem:[#allocation3 + $0x130] sm:$0xff] }
 0x5b6   :  { %1723 = vst.msk [vmem:[#allocation3] sm:$0xff] %vm73_vm1, %v10447_v47 }
 0x5bc   :  { %v1785_v49 = vld [vmem:[#allocation3 + $0x80] sm:$0xff] }
 0x5bd   :  { %v8826_v5 = vpack.c.bf16 %v1786_v48, %v1785_v49  ;;  %v1778_v48 = vld [vmem:[#allocation3 + $0x48] sm:$0xff] }
 0x5be   :  { %v8810_v49 = vpack.c.bf16 %v1778_v48, %v1777_v46 }
 0x5bf   :  { %8828 = vmatpush3.bf16.xpose.msk.msra.mxu1 %vm10147_vm3, %v8826_v5  ;;  %v1779_v5 = vld [vmem:[#allocation3 + $0x50] sm:$0xff] }
 0x5c0   :  { %8829 = vmatprep.subr.bf16.mxu1 %v9711_v11  ;;  %v8814_v16 = vpack.c.bf16 %v1780_v50, %v1779_v5  ;;  %v1826_v5 = vld [vmem:[#allocation3 + $0x1c8] sm:$0xff]  ;;  %v1809_v50 = vld [vmem:[#allocation3 + $0x140] sm:$0xff] }
 0x5c7   :  { %8832 = vmatpush3.bf16.xpose.msk.msra.mxu1 %vm10147_vm3, %v8830_v51  ;;  %v1781_v51 = vld [vmem:[#allocation3 + $0x60] sm:$0xff] }
 0x5c8   :  { %8833 = vmatprep.subr.bf16.mxu1 %v9711_v11  ;;  %v8818_v53 = vpack.c.bf16 %v1782_v52, %v1781_v51 }
 0x5cf   :  { %8836 = vmatpush3.bf16.xpose.msk.msra.mxu1 %vm10147_vm3, %v8834_v54  ;;  %v1799_v54 = vld [vmem:[#allocation3 + $0xf0] sm:$0xff] }
 0x5d0   :  { %8837 = vmatprep.subr.bf16.mxu1 %v9711_v11  ;;  %v8854_v37 = vpack.c.bf16 %v1800_v55, %v1799_v54  ;;  %v1828_v54 = vld [vmem:[#allocation3 + $0x1d8] sm:$0xff]  ;;  %v1811_v55 = vld [vmem:[#allocation3 + $0x150] sm:$0xff] }
 0x5d7   :  { %8840 = vmatpush3.bf16.xpose.msk.msra.mxu1 %vm10147_vm3, %v8838_v56  ;;  %v1783_v56 = vld [vmem:[#allocation3 + $0x70] sm:$0xff] }
 0x5d8   :  { %8841 = vmatprep.subr.bf16.mxu1 %v9711_v11  ;;  %v8822_v59 = vpack.c.bf16 %v1784_v57, %v1783_v56 }
 0x5df   :  { %8844 = vmatpush3.bf16.xpose.msk.msra.mxu1 %vm10147_vm3, %v8842_v60 }
 0x5e0   :  { %8845 = vmatprep.subr.bf16.mxu1 %v9711_v11 }
 0x5e7   :  { %8848 = vmatpush3.bf16.xpose.msk.msra.mxu1 %vm10147_vm3, %v8846_v12  ;;  %v1818_v12 = vld [vmem:[#allocation3 + $0x188] sm:$0xff] }
 0x5e8   :  { %8849 = vmatprep.subr.bf16.mxu1 %v9711_v11 }
 0x5ef   :  { %8852 = vmatpush3.bf16.xpose.msk.msra.mxu1 %vm10147_vm3, %v8850_v19 }
 0x5f0   :  { %8853 = vmatprep.subr.bf16.mxu1 %v9711_v11 }
 0x5f7   :  { %8856 = vmatpush3.bf16.xpose.msk.msra.mxu1 %vm10147_vm3, %v8854_v37  ;;  %v1812_v37 = vld [vmem:[#allocation3 + $0x158] sm:$0xff] }
 0x5f8   :  { %8889 = vmatprep.subr.bf16.mxu1 %v9711_v11  ;;  %v8878_v57 = vpack.c.bf16 %v1812_v37, %v1811_v55 }
 0x63d   :  { %v1498_v25 = vpop.xlane.xlu0 %1497 }
 0x63e   :  { %v1501_v26 = vmul.f32 0.03125, %v1498_v25  ;;  %v1495_v27 = vpop.xlane.xlu1 %1494 }
 0x63f   :  { %v1500_v28 = vmul.f32 0.03125, %v1495_v27 }
 0x640   :  { %v10419_v29 = vsub.f32 %v1492_v2, %v1501_v26  ;;  %v1529_v26 = vrot.slane %v10489_v3, %v10479_v15 }
 0x641   :  { %v10421_v30 = vsub.f32 %v1491_v4, %v1500_v28  ;;  %v1769_v28 = vld [vmem:[#allocation3] sm:$0xff] }
 0x642   :  { %v1505_v31 = vmul.f32 %v10419_v29, %v10419_v29 }
 0x643   :  { %v1504_v32 = vmul.f32 %v10421_v30, %v10421_v30 }
 0x644   :  { %v1509_v33 = vsel %vm241_vm0, %v1505_v31, 0.0  ;;  %v1770_v31 = vld [vmem:[#allocation3 + $0x8] sm:$0xff] }
 0x645   :  { %1510 = vadd.xlane.f32.xlu0 %v1509_v33  ;;  %v1506_v34 = vsel %vm241_vm0, %v1504_v32, 0.0 }
 0x646   :  { %1507 = vadd.xlane.f32.xlu1 %v1506_v34  ;;  %v8794_v34 = vpack.c.bf16 %v1770_v31, %v1769_v28  ;;  %v1804_v28 = vld [vmem:[#allocation3 + $0x118] sm:$0xff] }
 0x657   :  { %1745 = vrot.lane.b32.xlu1 %v10447_v47, %s9714_s0 }
 0x65b   :  { %1747 = vrot.lane.b32.xlu0 %v10445_v45, %s9714_s0 }
 0x6d2   :  { %v1511_v14 = vpop.xlane.xlu0 %1510 }
 0x6d3   :  { %v1513_v0 = vmul.f32 0.03125, %v1511_v14  ;;  %v1508_v42 = vpop.xlane.xlu1 %1507 }
 0x6d4   :  { %v1512_v1 = vmul.f32 0.03125, %v1508_v42 }
 0x6d5   :  { %v1515_v2 = vadd.f32 1e-06, %v1513_v0 }
 0x6d6   :  { %v1514_v4 = vadd.f32 1e-06, %v1512_v1  ;;  %v1748_v14 = vpop.permute.xlu0 %1747 }
 0x6d7   :  { %9596 = vrsqrt.f32 %v1515_v2  ;;  %v1746_v60 = vpop.permute.xlu1 %1745  ;;  %1752 = vst.msk [vmem:[#allocation3 + $0x180] sm:$0xff] %vm73_vm1, %v1748_v14  ;;  %v1813_v14 = vld [vmem:[#allocation3 + $0x160] sm:$0xff] }
 0x6d8   :  { %9598 = vrsqrt.f32 %v1514_v4  ;;  %1751 = vst.msk [vmem:[#allocation3 + $0x100] sm:$0xff] %vm73_vm1, %v1746_v60  ;;  %v1830_v60 = vld [vmem:[#allocation3 + $0x1e8] sm:$0xff] }
 0x6de   :  { %v1817_v2 = vld [vmem:[#allocation3 + $0x180] sm:$0xff] }
 0x6df   :  { %v1801_v4 = vld [vmem:[#allocation3 + $0x100] sm:$0xff]  ;;  %v8890_v19 = vpack.c.bf16 %v1818_v12, %v1817_v2  ;;  %v1815_v2 = vld [vmem:[#allocation3 + $0x170] sm:$0xff]  ;;  %v1816_v12 = vld [vmem:[#allocation3 + $0x178] sm:$0xff] }
 0x6e1   :  { %v9597_v21 = vpop.eup %9596 }
 0x6e2   :  { %v9599_v22 = vpop.eup %9598  ;;  %v1519_v24 = vmul.f32 %v9597_v21, %v10419_v29  ;;  %v1771_v29 = vld [vmem:[#allocation3 + $0x10] sm:$0xff] }
 0x6e3   :  { %v1518_v25 = vmul.f32 %v9599_v22, %v10421_v30  ;;  %v1772_v30 = vld [vmem:[#allocation3 + $0x18] sm:$0xff]  ;;  %v8858_v22 = vpack.c.bf16 %v1802_v9, %v1801_v4  ;;  %v8886_v9 = vpack.c.bf16 %v1816_v12, %v1815_v2  ;;  %v1842_v2 = vld [vmem:[#allocation4 + $0x48] sm:$0xff] }
 0x6e4   :  { %v1525_v27 = vmul.f32 %v1523_v20, %v1519_v24  ;;  %v8798_v36 = vpack.c.bf16 %v1772_v30, %v1771_v29  ;;  %v1822_v29 = vld [vmem:[#allocation3 + $0x1a8] sm:$0xff]  ;;  %v1805_v30 = vld [vmem:[#allocation3 + $0x120] sm:$0xff] }
 0x6e5   :  { %v1524_v32 = vmul.f32 %v1523_v20, %v1518_v25  ;;  %v1819_v25 = vld [vmem:[#allocation3 + $0x190] sm:$0xff] }
 0x6e6   :  { %v10502_v35 = vadd.f32 %v1529_v26, %v1525_v27  ;;  %v1803_v27 = vld [vmem:[#allocation3 + $0x110] sm:$0xff] }
 0x6e7   :  { %v10500_v33 = vadd.f32 %v1529_v26, %v1524_v32  ;;  %v1820_v26 = vld [vmem:[#allocation3 + $0x198] sm:$0xff]  ;;  %v8862_v32 = vpack.c.bf16 %v1804_v28, %v1803_v27 }
 0x6e8   :  { %v8894_v31 = vpack.c.bf16 %v1820_v26, %v1819_v25  ;;  %v213_v25 = vld [vmem:[%s11625_s3 + $0x8] sm:$0xff]  ;;  %v212_v26 = vld [vmem:[%s11625_s3] sm:$0xff] }
 0x6e9   :  { %7548 = vmatprep.mubr.msk.f32.mxu0 %vm241_vm0, %v10500_v33  ;;  %v215_v27 = vmul.f32 -1e+09, %v213_v25  ;;  %v214_v28 = vmul.f32 -1e+09, %v212_v26 }
 0x6ea   :  { %7549 = vmatmul.mubr.msk.f32.vlgmr.msra.gmra.mrb[8].mxu0 %vm241_vm0, %v10502_v35 }
 0x6eb   :  { %8796 = vmatpush3.bf16.xpose.msk.msra.mxu0 %vm10147_vm3, %v8794_v34  ;;  %7594 = vmatprep.mubr.msk.f32.mxu0 %vm9715_vm2, %v9710_v8  ;;  %v1821_v34 = vld [vmem:[#allocation3 + $0x1a0] sm:$0xff] }
 0x6ec   :  { %8797 = vmatprep.subr.bf16.mxu0 %v9711_v11  ;;  %v8898_v38 = vpack.c.bf16 %v1822_v29, %v1821_v34 }
 0x6f3   :  { %8800 = vmatpush3.bf16.xpose.msk.msra.mxu0 %vm10147_vm3, %v8798_v36  ;;  %v1806_v36 = vld [vmem:[#allocation3 + $0x128] sm:$0xff] }
 0x6f4   :  { %8801 = vmatprep.subr.bf16.mxu0 %v9711_v11  ;;  %v8866_v39 = vpack.c.bf16 %v1806_v36, %v1805_v30 }
 0x6fb   :  { %8804 = vmatpush3.bf16.xpose.msk.msra.mxu0 %vm10147_vm3, %v8802_v40  ;;  %v1823_v40 = vld [vmem:[#allocation3 + $0x1b0] sm:$0xff] }
 0x6fc   :  { %8805 = vmatprep.subr.bf16.mxu0 %v9711_v11  ;;  %v8902_v46 = vpack.c.bf16 %v1824_v41, %v1823_v40 }
 0x703   :  { %8808 = vmatpush3.bf16.xpose.msk.msra.mxu0 %vm10147_vm3, %v8806_v44  ;;  %v1808_v44 = vld [vmem:[#allocation3 + $0x138] sm:$0xff] }
 0x704   :  { %8809 = vmatprep.subr.bf16.mxu0 %v9711_v11  ;;  %v8870_v48 = vpack.c.bf16 %v1808_v44, %v1807_v43 }
 0x70b   :  { %8812 = vmatpush3.bf16.xpose.msk.msra.mxu0 %vm10147_vm3, %v8810_v49  ;;  %v1825_v49 = vld [vmem:[#allocation3 + $0x1c0] sm:$0xff] }
 0x70c   :  { %8813 = vmatprep.subr.bf16.mxu0 %v9711_v11  ;;  %v8906_v51 = vpack.c.bf16 %v1826_v5, %v1825_v49 }
 0x713   :  { %8816 = vmatpush3.bf16.xpose.msk.msra.mxu0 %vm10147_vm3, %v8814_v16  ;;  %v1810_v16 = vld [vmem:[#allocation3 + $0x148] sm:$0xff] }
 0x714   :  { %8817 = vmatprep.subr.bf16.mxu0 %v9711_v11  ;;  %v8874_v52 = vpack.c.bf16 %v1810_v16, %v1809_v50 }
 0x71b   :  { %8820 = vmatpush3.bf16.xpose.msk.msra.mxu0 %vm10147_vm3, %v8818_v53  ;;  %v1827_v53 = vld [vmem:[#allocation3 + $0x1d0] sm:$0xff] }
 0x71c   :  { %8821 = vmatprep.subr.bf16.mxu0 %v9711_v11  ;;  %v8910_v56 = vpack.c.bf16 %v1828_v54, %v1827_v53  ;;  %v1835_v53 = vld [vmem:[#allocation4 + $0x10] sm:$0xff]  ;;  %v1836_v54 = vld [vmem:[#allocation4 + $0x18] sm:$0xff] }
 0x71d   :  { %v8925_v37 = vpack.c.bf16 %v1836_v54, %v1835_v53  ;;  %v1863_v53 = vld [vmem:[#allocation4 + $0xf0] sm:$0xff]  ;;  %v1864_v54 = vld [vmem:[#allocation4 + $0xf8] sm:$0xff] }
 0x723   :  { %8824 = vmatpush3.bf16.xpose.msk.msra.mxu0 %vm10147_vm3, %v8822_v59  ;;  %v1829_v59 = vld [vmem:[#allocation3 + $0x1e0] sm:$0xff] }
 0x724   :  { %8857 = vmatprep.subr.bf16.mxu0 %v9711_v11 }
 0x7bd   :  { %v7550_v63 = vpop.f32.mrb[8].mxu0 }
 0x7be   :  { %v1621_v0 = vadd.f32 %v7550_v63, %v6292_v62  ;;  %v1615_v42 = vpop.f32.mrb[9].mxu0  ;;  %v8914_v63 = vpack.c.bf16 %v1830_v60, %v1829_v59  ;;  %v1838_v59 = vld [vmem:[#allocation4 + $0x28] sm:$0xff] }
 0x7bf   :  { %v1616_v1 = vadd.f32 %v6292_v62, %v1615_v42  ;;  %v1814_v62 = vld [vmem:[#allocation3 + $0x168] sm:$0xff]  ;;  %v1831_v42 = vld [vmem:[#allocation3 + $0x1f0] sm:$0xff] }
 0x7c0   :  { %1722 = vst.msk [vmem:[#allocation2 + $0x8] sm:$0xff] %vm73_vm1, %v1621_v0 }
 0x7c1   :  { %1721 = vst.msk [vmem:[#allocation2] sm:$0xff] %vm73_vm1, %v1616_v1  ;;  %1737 = vrot.lane.b32.xlu1 %v1616_v1, %s9714_s0  ;;  %v1832_v1 = vld [vmem:[#allocation3 + $0x1f8] sm:$0xff] }
 0x7c2   :  { %v8918_v4 = vpack.c.bf16 %v1832_v1, %v1831_v42  ;;  %v1841_v1 = vld [vmem:[#allocation4 + $0x40] sm:$0xff] }
 0x7c3   :  { %v8934_v12 = vpack.c.bf16 %v1842_v2, %v1841_v1  ;;  %v1869_v1 = vld [vmem:[#allocation4 + $0x120] sm:$0xff]  ;;  %v1870_v2 = vld [vmem:[#allocation4 + $0x128] sm:$0xff] }
 0x7c5   :  { %1739 = vrot.lane.b32.xlu1 %v1621_v0, %s9714_s0  ;;  %v8882_v0 = vpack.c.bf16 %v1814_v62, %v1813_v14  ;;  %v1839_v62 = vld [vmem:[#allocation4 + $0x30] sm:$0xff] }
 0x7c7   :  { %v1762_v13 = vld [vmem:[#allocation2 + $0x8] sm:$0xff] }
 0x7c8   :  { %v1766_v20 = vmul.f32 0.25, %v1762_v13  ;;  %v1761_v21 = vld [vmem:[#allocation2] sm:$0xff] }
 0x7c9   :  { %v1765_v24 = vmul.f32 0.25, %v1761_v21 }
 0x7ca   :  { %7630 = vmatmul.mubr.msk.f32.vlgmr.msra.gmra.mrb[14].mxu1 %vm73_vm1, %v1766_v20 }
 0x7cb   :  { %7595 = vmatmul.mubr.msk.f32.vlgmr.msra.gmra.mrb[10].mxu0 %vm73_vm1, %v1765_v24  ;;  %8892 = vmatpush3.bf16.xpose.msk.msra.mxu1 %vm10147_vm3, %v8890_v19 }
 0x7cc   :  { %8860 = vmatpush3.bf16.xpose.msk.msra.mxu0 %vm10147_vm3, %v8858_v22  ;;  %8893 = vmatprep.subr.bf16.mxu1 %v9711_v11 }
 0x7cd   :  { %8861 = vmatprep.subr.bf16.mxu0 %v9711_v11  ;;  %7664 = vmatprep.mubr.msk.f32.mxu0 %vm9715_vm2, %v9710_v8 }
 0x7ce   :  { %7699 = vmatprep.mubr.msk.f32.mxu1 %vm9715_vm2, %v9710_v8 }
 0x7d3   :  { %8896 = vmatpush3.bf16.xpose.msk.msra.mxu1 %vm10147_vm3, %v8894_v31  ;;  %v10615_v31 = vadd.f32 %v215_v27, %v10266_v7 }
 0x7d4   :  { %8864 = vmatpush3.bf16.xpose.msk.msra.mxu0 %vm10147_vm3, %v8862_v32  ;;  %8897 = vmatprep.subr.bf16.mxu1 %v9711_v11  ;;  %v10618_v32 = vadd.f32 %v214_v28, %v10266_v7  ;;  %v1851_v28 = vld [vmem:[#allocation4 + $0x90] sm:$0xff] }
 0x7d5   :  { %8865 = vmatprep.subr.bf16.mxu0 %v9711_v11 }
 0x7db   :  { %8900 = vmatpush3.bf16.xpose.msk.msra.mxu1 %vm10147_vm3, %v8898_v38 }
 0x7dc   :  { %8868 = vmatpush3.bf16.xpose.msk.msra.mxu0 %vm10147_vm3, %v8866_v39  ;;  %8901 = vmatprep.subr.bf16.mxu1 %v9711_v11 }
 0x7dd   :  { %8869 = vmatprep.subr.bf16.mxu0 %v9711_v11 }
 0x7e3   :  { %8904 = vmatpush3.bf16.xpose.msk.msra.mxu1 %vm10147_vm3, %v8902_v46 }
 0x7e4   :  { %8872 = vmatpush3.bf16.xpose.msk.msra.mxu0 %vm10147_vm3, %v8870_v48  ;;  %8905 = vmatprep.subr.bf16.mxu1 %v9711_v11 }
 0x7e5   :  { %8873 = vmatprep.subr.bf16.mxu0 %v9711_v11 }
 0x7eb   :  { %8908 = vmatpush3.bf16.xpose.msk.msra.mxu1 %vm10147_vm3, %v8906_v51  ;;  %v1834_v51 = vld [vmem:[#allocation4 + $0x8] sm:$0xff] }
 0x7ec   :  { %8876 = vmatpush3.bf16.xpose.msk.msra.mxu0 %vm10147_vm3, %v8874_v52  ;;  %8909 = vmatprep.subr.bf16.mxu1 %v9711_v11 }
 0x7ed   :  { %8877 = vmatprep.subr.bf16.mxu0 %v9711_v11 }
 0x7f3   :  { %8912 = vmatpush3.bf16.xpose.msk.msra.mxu1 %vm10147_vm3, %v8910_v56 }
 0x7f4   :  { %8880 = vmatpush3.bf16.xpose.msk.msra.mxu0 %vm10147_vm3, %v8878_v57  ;;  %8913 = vmatprep.subr.bf16.mxu1 %v9711_v11  ;;  %v1837_v57 = vld [vmem:[#allocation4 + $0x20] sm:$0xff] }
 0x7f5   :  { %8881 = vmatprep.subr.bf16.mxu0 %v9711_v11  ;;  %v8928_v14 = vpack.c.bf16 %v1838_v59, %v1837_v57 }
 0x7fb   :  { %8916 = vmatpush3.bf16.xpose.msk.msra.mxu1 %vm10147_vm3, %v8914_v63  ;;  %v1840_v63 = vld [vmem:[#allocation4 + $0x38] sm:$0xff] }
 0x7fc   :  { %8884 = vmatpush3.bf16.xpose.msk.msra.mxu0 %vm10147_vm3, %v8882_v0  ;;  %8917 = vmatprep.subr.bf16.mxu1 %v9711_v11  ;;  %v8931_v42 = vpack.c.bf16 %v1840_v63, %v1839_v62  ;;  %v1868_v62 = vld [vmem:[#allocation4 + $0x118] sm:$0xff]  ;;  %v9678_v63 = vld [vmem:[#allocation4 + $0x108] sm:$0xff] }
 0x7fd   :  { %8885 = vmatprep.subr.bf16.mxu0 %v9711_v11 }
 0x803   :  { %8920 = vmatpush3.bf16.xpose.msk.msra.mxu1 %vm10147_vm3, %v8918_v4  ;;  %v1843_v4 = vld [vmem:[#allocation4 + $0x50] sm:$0xff] }
 0x804   :  { %8888 = vmatpush3.bf16.xpose.msk.msra.mxu0 %vm10147_vm3, %v8886_v9  ;;  %8945 = vmatprep.subr.bf16.mxu1 %v9711_v11  ;;  %v1844_v9 = vld [vmem:[#allocation4 + $0x58] sm:$0xff] }
 0x805   :  { %8921 = vmatprep.subr.bf16.mxu0 %v9711_v11 }
 0x833   :  { %v1738_v13 = vpop.permute.xlu1 %1737 }
 0x834   :  { %1743 = vst.msk [vmem:[#allocation2 + $0x10] sm:$0xff] %vm73_vm1, %v1738_v13  ;;  %v8937_v13 = vpack.c.bf16 %v1844_v9, %v1843_v4  ;;  %v1871_v4 = vld [vmem:[#allocation4 + $0x130] sm:$0xff]  ;;  %v1872_v9 = vld [vmem:[#allocation4 + $0x138] sm:$0xff] }
 0x837   :  { %v1740_v19 = vpop.permute.xlu1 %1739 }
 0x838   :  { %1744 = vst.msk [vmem:[#allocation2 + $0x18] sm:$0xff] %vm73_vm1, %v1740_v19 }
 0x83b   :  { %v1763_v20 = vld [vmem:[#allocation2 + $0x10] sm:$0xff] }
 0x83c   :  { %v1767_v21 = vmul.f32 0.25, %v1763_v20 }
 0x83e   :  { %7665 = vmatmul.mubr.msk.f32.vlgmr.msra.gmra.mrb[12].mxu0 %vm73_vm1, %v1767_v21 }
 0x83f   :  { %v1764_v22 = vld [vmem:[#allocation2 + $0x18] sm:$0xff]  ;;  %7734 = vmatprep.mubr.msk.f32.mxu0 %vm9715_vm2, %v9710_v8 }
 0x840   :  { %v1768_v24 = vmul.f32 0.25, %v1764_v22 }
 0x842   :  { %7700 = vmatmul.mubr.msk.f32.vlgmr.msra.gmra.mrb[16].mxu1 %vm73_vm1, %v1768_v24 }
 0x843   :  { %7769 = vmatprep.mubr.msk.f32.mxu1 %vm9715_vm2, %v9710_v8 }
 0x89d   :  { %v2139_v34 = vpop.f32.mrb[14].mxu1 }
 0x89e   :  { %v2140_v29 = vadd.f32 %v2139_v34, %v10615_v31  ;;  %v2018_v30 = vpop.f32.mrb[10].mxu0  ;;  %v7631_v36 = vpop.f32.mrb[15].mxu1  ;;  %v1852_v34 = vld [vmem:[#allocation4 + $0x98] sm:$0xff] }
 0x89f   :  { %v2019_v38 = vadd.f32 %v2018_v30, %v10618_v32  ;;  %v7596_v39 = vpop.f32.mrb[11].mxu0  ;;  %v8949_v30 = vpack.c.bf16 %v1852_v34, %v1851_v28  ;;  %v1853_v36 = vld [vmem:[#allocation4 + $0xa0] sm:$0xff]  ;;  %v1883_v34 = vld [vmem:[#allocation4 + $0x190] sm:$0xff] }
 0x8a0   :  { %2387 = vmax.xlane.f32.xlu1 %v2140_v29 }
 0x8a1   :  { %2385 = vmax.xlane.f32.xlu0 %v2019_v38 }
 0x8b1   :  { %1727 = vrot.lane.b32.xlu1 %v10447_v47, %s11626_s24 }
 0x911   :  { %v2260_v40 = vpop.f32.mrb[12].mxu0 }
 0x912   :  { %v7666_v41 = vpop.f32.mrb[13].mxu0  ;;  %v2261_v46 = vadd.f32 %v2260_v40, %v10618_v32  ;;  %v1855_v40 = vld [vmem:[#allocation4 + $0xb0] sm:$0xff] }
 0x913   :  { %v1856_v41 = vld [vmem:[#allocation4 + $0xb8] sm:$0xff] }
 0x915   :  { %v2381_v43 = vpop.f32.mrb[16].mxu1 }
 0x916   :  { %v2382_v44 = vadd.f32 %v2381_v43, %v10615_v31  ;;  %v7701_v7 = vpop.f32.mrb[17].mxu1  ;;  %v8955_v43 = vpack.c.bf16 %v1856_v41, %v1855_v40  ;;  %v1886_v41 = vld [vmem:[#allocation4 + $0x1a8] sm:$0xff] }
 0x917   :  { %v1858_v7 = vld [vmem:[#allocation4 + $0xc8] sm:$0xff] }
 0x918   :  { %2391 = vmax.xlane.f32.xlu0 %v2382_v44 }
 0x91c   :  { %2389 = vmax.xlane.f32.xlu0 %v2261_v46 }
 0x92d   :  { %v2388_v48 = vpop.xlane.xlu1 %2387 }
 0x92e   :  { %v2386_v49 = vpop.xlane.xlu0 %2385  ;;  %v2394_v60 = vsub.f32 %v2140_v29, %v2388_v48  ;;  %v1859_v48 = vld [vmem:[#allocation4 + $0xd0] sm:$0xff] }
 0x92f   :  { %v2393_v5 = vsub.f32 %v2019_v38, %v2386_v49  ;;  %v1854_v38 = vld [vmem:[#allocation4 + $0xa8] sm:$0xff]  ;;  %v1860_v49 = vld [vmem:[#allocation4 + $0xd8] sm:$0xff] }
 0x930   :  { %v2399_v0 = vmul.f32 1.442695, %v2394_v60  ;;  %v8952_v39 = vpack.c.bf16 %v1854_v38, %v1853_v36  ;;  %v1877_v38 = vld [vmem:[#allocation4 + $0x160] sm:$0xff] }
 0x931   :  { %v2397_v50 = vmul.f32 1.442695, %v2393_v5  ;;  %v1728_v16 = vpop.permute.xlu1 %1727  ;;  %v8961_v5 = vpack.c.bf16 %v1860_v49, %v1859_v48  ;;  %v1887_v48 = vld [vmem:[#allocation4 + $0x1b0] sm:$0xff]  ;;  %v1888_v49 = vld [vmem:[#allocation4 + $0x1b8] sm:$0xff] }
 0x932   :  { %1733 = vst.msk [vmem:[#allocation4] sm:$0xff] %vm73_vm1, %v1728_v16  ;;  %1729 = vrot.lane.b32.xlu0 %v10445_v45, %s11626_s24  ;;  %v1862_v16 = vld [vmem:[#allocation4 + $0xe8] sm:$0xff] }
 0x933   :  { %9600 = vpow2.f32 %v2397_v50  ;;  %v1861_v50 = vld [vmem:[#allocation4 + $0xe0] sm:$0xff] }
 0x934   :  { %9602 = vpow2.f32 %v2399_v0 }
 0x939   :  { %v1833_v52 = vld [vmem:[#allocation4] sm:$0xff] }
 0x93a   :  { %v8922_v55 = vpack.c.bf16 %v1834_v51, %v1833_v52  ;;  %v8964_v52 = vpack.c.bf16 %v1862_v16, %v1861_v50  ;;  %v9003_v50 = vpack.c.bf16 %v1888_v49, %v1887_v48  ;;  %v1889_v16 = vld [vmem:[#allocation4 + $0x1c0] sm:$0xff] }
 0x93c   :  { %8923 = vmatpush3.bf16.msra.mxu0 %v8922_v55 }
 0x93d   :  { %v10629_v56 = vpop.eup %9600  ;;  %8924 = vmatprep.subr.bf16.mxu0 %v9711_v11 }
 0x93e   :  { %2405 = vadd.xlane.f32.xlu1 %v10629_v56  ;;  %v10639_v19 = vpop.eup %9602 }
 0x940   :  { %8926 = vmatpush3.bf16.msra.mxu0 %v8925_v37  ;;  %v8967_v37 = vpack.c.bf16 %v1864_v54, %v1863_v53  ;;  %v1891_v53 = vld [vmem:[#allocation4 + $0x1d0] sm:$0xff]  ;;  %v1892_v54 = vld [vmem:[#allocation4 + $0x1d8] sm:$0xff] }
 0x941   :  { %8927 = vmatprep.subr.bf16.mxu0 %v9711_v11 }
 0x944   :  { %8929 = vmatpush3.bf16.msra.mxu0 %v8928_v14  ;;  %v1867_v14 = vld [vmem:[#allocation4 + $0x110] sm:$0xff] }
 0x945   :  { %8930 = vmatprep.subr.bf16.mxu0 %v9711_v11 }
 0x948   :  { %8932 = vmatpush3.bf16.msra.mxu0 %v8931_v42  ;;  %v8973_v42 = vpack.c.bf16 %v1868_v62, %v1867_v14  ;;  %v1896_v14 = vld [vmem:[#allocation4 + $0x1f8] sm:$0xff] }
 0x949   :  { %8933 = vmatprep.subr.bf16.mxu0 %v9711_v11 }
 0x94c   :  { %8935 = vmatpush3.bf16.msra.mxu0 %v8934_v12  ;;  %v8976_v12 = vpack.c.bf16 %v1870_v2, %v1869_v1 }
 0x94d   :  { %8936 = vmatprep.subr.bf16.mxu0 %v9711_v11 }
 0x94f   :  { %1753 = vrot.lane.b32.xlu1 %v10447_v47, %s11627_s30 }
 0x950   :  { %8938 = vmatpush3.bf16.msra.mxu0 %v8937_v13 }
 0x951   :  { %2407 = vadd.xlane.f32.xlu0 %v10639_v19  ;;  %8939 = vmatprep.subr.bf16.mxu0 %v9711_v11 }
 0x954   :  { %8941 = vmatpush3.bf16.msra.mxu0 %v10305_v58  ;;  %v1850_v58 = vld [vmem:[#allocation4 + $0x88] sm:$0xff] }
 0x955   :  { %8942 = vmatprep.subr.bf16.mxu0 %v9711_v11 }
 0x958   :  { %8944 = vmatpush3.bf16.msra.mxu0 %v10311_v61 }
 0x959   :  { %8969 = vmatprep.subr.bf16.mxu0 %v9711_v11 }
 0x967   :  { %1755 = vrot.lane.b32.xlu0 %v10445_v45, %s11627_s30 }
 0x9a5   :  { %v2392_v20 = vpop.xlane.xlu0 %2391 }
 0x9a6   :  { %v2396_v47 = vsub.f32 %v2382_v44, %v2392_v20  ;;  %v1857_v44 = vld [vmem:[#allocation4 + $0xc0] sm:$0xff]  ;;  %v8979_v20 = vpack.c.bf16 %v1872_v9, %v1871_v4  ;;  %v1718_v4 = vld [vmem:[%s11584_s12 + $0x10] sm:$0xff]  ;;  %v1719_v9 = vld [vmem:[%s11584_s12 + $0x18] sm:$0xff] }
 0x9a8   :  { %v2403_v21 = vmul.f32 1.442695, %v2396_v47  ;;  %v1873_v47 = vld [vmem:[#allocation4 + $0x140] sm:$0xff] }
 0x9a9   :  { %v2390_v22 = vpop.xlane.xlu0 %2389 }
 0x9aa   :  { %9604 = vpow2.f32 %v2403_v21  ;;  %v2395_v24 = vsub.f32 %v2261_v46, %v2390_v22  ;;  %v8958_v46 = vpack.c.bf16 %v1858_v7, %v1857_v44  ;;  %v1874_v21 = vld [vmem:[#allocation4 + $0x148] sm:$0xff]  ;;  %v1879_v44 = vld [vmem:[#allocation4 + $0x170] sm:$0xff]  ;;  %v1880_v7 = vld [vmem:[#allocation4 + $0x178] sm:$0xff] }
 0x9ab   :  { %v8982_v22 = vpack.c.bf16 %v1874_v21, %v1873_v47  ;;  %v9021_v47 = vpack.c.bf16 %v1719_v9, %v1718_v4 }
 0x9ac   :  { %v2401_v25 = vmul.f32 1.442695, %v2395_v24  ;;  %v1875_v24 = vld [vmem:[#allocation4 + $0x150] sm:$0xff] }
 0x9ad   :  { %v1730_v26 = vpop.permute.xlu0 %1729 }
 0x9ae   :  { %9606 = vpow2.f32 %v2401_v25  ;;  %1734 = vst.msk [vmem:[#allocation4 + $0x80] sm:$0xff] %vm73_vm1, %v1730_v26  ;;  %v1876_v25 = vld [vmem:[#allocation4 + $0x158] sm:$0xff]  ;;  %v1882_v26 = vld [vmem:[#allocation4 + $0x188] sm:$0xff] }
 0x9b4   :  { %v10650_v27 = vpop.eup %9604 }
 0x9b5   :  { %2411 = vadd.xlane.f32.xlu0 %v10650_v27  ;;  %v1849_v61 = vld [vmem:[#allocation4 + $0x80] sm:$0xff] }
 0x9b6   :  { %v8946_v45 = vpack.c.bf16 %v1850_v58, %v1849_v61 }
 0x9b8   :  { %v10653_v29 = vpop.eup %9606  ;;  %8947 = vmatpush3.bf16.msra.mxu1 %v8946_v45  ;;  %v1884_v45 = vld [vmem:[#allocation4 + $0x198] sm:$0xff] }
 0x9b9   :  { %2409 = vadd.xlane.f32.xlu1 %v10653_v29  ;;  %8948 = vmatprep.subr.bf16.mxu1 %v9711_v11  ;;  %v8997_v40 = vpack.c.bf16 %v1884_v45, %v1883_v34 }
 0x9bc   :  { %8950 = vmatpush3.bf16.msra.mxu1 %v8949_v30  ;;  %v8985_v30 = vpack.c.bf16 %v1876_v25, %v1875_v24 }
 0x9bd   :  { %8951 = vmatprep.subr.bf16.mxu1 %v9711_v11 }
 0x9c0   :  { %8953 = vmatpush3.bf16.msra.mxu1 %v8952_v39  ;;  %v1878_v39 = vld [vmem:[#allocation4 + $0x168] sm:$0xff] }
 0x9c1   :  { %8954 = vmatprep.subr.bf16.mxu1 %v9711_v11 }
 0x9c4   :  { %8956 = vmatpush3.bf16.msra.mxu1 %v8955_v43  ;;  %v8988_v43 = vpack.c.bf16 %v1878_v39, %v1877_v38 }
 0x9c5   :  { %8957 = vmatprep.subr.bf16.mxu1 %v9711_v11 }
 0x9c8   :  { %8959 = vmatpush3.bf16.msra.mxu1 %v8958_v46 }
 0x9c9   :  { %8960 = vmatprep.subr.bf16.mxu1 %v9711_v11 }
 0x9cb   :  { %v2406_v51 = vpop.xlane.xlu1 %2405 }
 0x9cc   :  { %9608 = vrcp.f32 %v2406_v51  ;;  %8962 = vmatpush3.bf16.msra.mxu1 %v8961_v5  ;;  %v8991_v5 = vpack.c.bf16 %v1880_v7, %v1879_v44  ;;  %v1890_v51 = vld [vmem:[#allocation4 + $0x1c8] sm:$0xff] }
 0x9cd   :  { %8963 = vmatprep.subr.bf16.mxu1 %v9711_v11 }
 0x9cf   :  { %v1754_v55 = vpop.permute.xlu1 %1753 }
 0x9d0   :  { %1759 = vst.msk [vmem:[#allocation4 + $0x100] sm:$0xff] %vm73_vm1, %v1754_v55  ;;  %8965 = vmatpush3.bf16.msra.mxu1 %v8964_v52  ;;  %v9006_v52 = vpack.c.bf16 %v1890_v51, %v1889_v16  ;;  %v9009_v55 = vpack.c.bf16 %v1892_v54, %v1891_v53  ;;  %v2919_v51 = vld [vmem:[%s11586_s14 + $0x10] sm:$0xff] }
 0x9d1   :  { %8966 = vmatprep.subr.bf16.mxu1 %v9711_v11 }
 0x9d4   :  { %8968 = vmatpush3.bf16.msra.mxu1 %v8967_v37  ;;  %v1893_v37 = vld [vmem:[#allocation4 + $0x1e0] sm:$0xff] }
 0x9d5   :  { %8993 = vmatprep.subr.bf16.mxu1 %v9711_v11 }
 0x9d6   :  { %v9609_v57 = vpop.eup %9608 }
 0x9d7   :  { %v2417_v59 = vmul.f32 %v9609_v57, %v10629_v56  ;;  %v1865_v60 = vld [vmem:[#allocation4 + $0x100] sm:$0xff]  ;;  %v1894_v57 = vld [vmem:[#allocation4 + $0x1e8] sm:$0xff] }
 0x9d8   :  { %v8970_v0 = vpack.c.bf16 %v9678_v63, %v1865_v60  ;;  %v1895_v60 = vld [vmem:[#allocation4 + $0x1f0] sm:$0xff]  ;;  %v1716_v63 = vld [vmem:[%s11584_s12] sm:$0xff] }
 0x9d9   :  { %2421 = vst [vmem:[%s11594_s22] sm:$0xff] %v2417_v59  ;;  %7735 = vmatmul.mubr.f32.vlgmr.msra.gmra.mrb[14].mxu0 %v2417_v59  ;;  %v9012_v59 = vpack.c.bf16 %v1894_v57, %v1893_v37  ;;  %v9015_v62 = vpack.c.bf16 %v1896_v14, %v1895_v60  ;;  %v10738_v14 = vsub.s32 1, %v10473_v6 }
 0x9da   :  { %8971 = vmatpush3.bf16.msra.mxu0 %v8970_v0  ;;  %7804 = vmatprep.mubr.msk.f32.mxu0 %vm9715_vm2, %v9710_v8  ;;  %v1717_v0 = vld [vmem:[%s11584_s12 + $0x8] sm:$0xff] }
 0x9db   :  { %8972 = vmatprep.subr.bf16.mxu0 %v9711_v11 }
 0x9de   :  { %v2408_v56 = vpop.xlane.xlu0 %2407  ;;  %8974 = vmatpush3.bf16.msra.mxu0 %v8973_v42  ;;  %v9017_v42 = vpack.c.bf16 %v1717_v0, %v1716_v63 }
 0x9df   :  { %9610 = vrcp.f32 %v2408_v56  ;;  %8975 = vmatprep.subr.bf16.mxu0 %v9711_v11 }
 0x9e2   :  { %v1756_v13 = vpop.permute.xlu0 %1755  ;;  %8977 = vmatpush3.bf16.msra.mxu0 %v8976_v12 }
 0x9e3   :  { %1760 = vst.msk [vmem:[#allocation4 + $0x180] sm:$0xff] %vm73_vm1, %v1756_v13  ;;  %8978 = vmatprep.subr.bf16.mxu0 %v9711_v11 }
 0x9e6   :  { %8980 = vmatpush3.bf16.msra.mxu0 %v8979_v20 }
 0x9e7   :  { %8981 = vmatprep.subr.bf16.mxu0 %v9711_v11 }
 0x9e9   :  { %v9611_v58 = vpop.eup %9610 }
 0x9ea   :  { %v2418_v61 = vmul.f32 %v9611_v58, %v10639_v19  ;;  %v1881_v28 = vld [vmem:[#allocation4 + $0x180] sm:$0xff]  ;;  %8983 = vmatpush3.bf16.msra.mxu0 %v8982_v22 }
 0x9eb   :  { %v8994_v36 = vpack.c.bf16 %v1882_v26, %v1881_v28  ;;  %8984 = vmatprep.subr.bf16.mxu0 %v9711_v11  ;;  %v1885_v19 = vld [vmem:[#allocation4 + $0x1a0] sm:$0xff] }
 0x9ec   :  { %2422 = vst [vmem:[%s11594_s22 + $0x8] sm:$0xff] %v2418_v61  ;;  %7770 = vmatmul.mubr.f32.vlgmr.msra.gmra.mrb[18].mxu1 %v2418_v61  ;;  %v9000_v46 = vpack.c.bf16 %v1886_v41, %v1885_v19  ;;  %v6370_v61 = vld [vmem:[%s11585_s13] ss:$0 sm:$0xff] }
 0x9ed   :  { %8995 = vmatpush3.bf16.msra.mxu1 %v8994_v36  ;;  %7839 = vmatprep.mubr.msk.f32.mxu1 %vm9715_vm2, %v9710_v8 }
 0x9ee   :  { %8996 = vmatprep.subr.bf16.mxu1 %v9711_v11  ;;  %8986 = vmatpush3.bf16.msra.mxu0 %v8985_v30 }
 0x9ef   :  { %8987 = vmatprep.subr.bf16.mxu0 %v9711_v11 }
 0x9f1   :  { %8998 = vmatpush3.bf16.msra.mxu1 %v8997_v40 }
 0x9f2   :  { %8999 = vmatprep.subr.bf16.mxu1 %v9711_v11  ;;  %8989 = vmatpush3.bf16.msra.mxu0 %v8988_v43 }
 0x9f3   :  { %8990 = vmatprep.subr.bf16.mxu0 %v9711_v11 }
 0x9f5   :  { %9001 = vmatpush3.bf16.msra.mxu1 %v9000_v46 }
 0x9f6   :  { %9002 = vmatprep.subr.bf16.mxu1 %v9711_v11  ;;  %8992 = vmatpush3.bf16.msra.mxu0 %v8991_v5 }
 0x9f7   :  { %9018 = vmatprep.subr.bf16.mxu0 %v9017_v42 }
 0x9f9   :  { %9004 = vmatpush3.bf16.msra.mxu1 %v9003_v50  ;;  %v2918_v50 = vld [vmem:[%s11586_s14 + $0x8] sm:$0xff] }
 0x9fa   :  { %9005 = vmatprep.subr.bf16.mxu1 %v9711_v11 }
 0x9fd   :  { %9007 = vmatpush3.bf16.msra.mxu1 %v9006_v52  ;;  %v2920_v52 = vld [vmem:[%s11586_s14 + $0x18] sm:$0xff] }
 0x9fe   :  { %9008 = vmatprep.subr.bf16.mxu1 %v9711_v11  ;;  %v9029_v53 = vpack.c.bf16 %v2920_v52, %v2919_v51 }
 0xa01   :  { %9010 = vmatpush3.bf16.msra.mxu1 %v9009_v55 }
 0xa02   :  { %9011 = vmatprep.subr.bf16.mxu1 %v9711_v11 }
 0xa05   :  { %9013 = vmatpush3.bf16.msra.mxu1 %v9012_v59 }
 0xa06   :  { %9014 = vmatprep.subr.bf16.mxu1 %v9711_v11 }
 0xa09   :  { %9016 = vmatpush3.bf16.msra.mxu1 %v9015_v62  ;;  %v2908_v62 = vrot.slane %v10484_v17, %v10738_v14  ;;  %v3069_v17 = vld [vmem:[%s11588_s16] sm:$0xff] }
 0xa42   :  { %v2412_v1 = vpop.xlane.xlu0 %2411 }
 0xa43   :  { %9612 = vrcp.f32 %v2412_v1 }
 0xa46   :  { %v2410_v2 = vpop.xlane.xlu1 %2409 }
 0xa47   :  { %9614 = vrcp.f32 %v2410_v2  ;;  %v2914_v2 = vrot.slane %v10489_v3, %v10738_v14  ;;  %v3070_v3 = vld [vmem:[%s11588_s16 + $0x8] sm:$0xff] }
 0xa4d   :  { %v9613_v56 = vpop.eup %9612 }
 0xa4e   :  { %v2420_v12 = vmul.f32 %v9613_v56, %v10650_v27 }
 0xa50   :  { %2424 = vst [vmem:[%s11594_s22 + $0x18] sm:$0xff] %v2420_v12  ;;  %7840 = vmatmul.mubr.f32.vlgmr.msra.gmra.mrb[20].mxu1 %v2420_v12 }
 0xa51   :  { %v9615_v13 = vpop.eup %9614 }
 0xa52   :  { %v2419_v20 = vmul.f32 %v9615_v13, %v10653_v29  ;;  %v9033_v13 = vpack.c.bf16 %v3070_v3, %v3069_v17 }
 0xa54   :  { %2423 = vst [vmem:[%s11594_s22 + $0x10] sm:$0xff] %v2419_v20  ;;  %7805 = vmatmul.mubr.f32.vlgmr.msra.gmra.mrb[16].mxu0 %v2419_v20  ;;  %v3071_v20 = vld [vmem:[%s11588_s16 + $0x10] sm:$0xff] }
 0xa55   :  { %9020 = vmatpush3.bf16.msra.mxu0 %v9017_v42 }
 0xa56   :  { %9022 = vmatprep.subr.bf16.mxu0 %v9021_v47 }
 0xaac   :  { %v2491_v27 = vpop.f32.mrb[14].mxu0 }
 0xaad   :  { %v7736_v21 = vpop.f32.mrb[15].mxu0  ;;  %7846 = vmatprep.mubr.msk.f32.mxu0 %vm73_vm1, %v2491_v27 }
 0xaae   :  { %v3073_v21 = vld [vmem:[%s11588_s16 + $0x20] sm:$0xff] }
 0xabf   :  { %v2561_v22 = vpop.f32.mrb[18].mxu1 }
 0xac0   :  { %v7771_v24 = vpop.f32.mrb[19].mxu1  ;;  %7847 = vmatmul.mubr.msk.f32.vlgmr.msra.gmra.mrb[18].mxu0 %vm73_vm1, %v2561_v22  ;;  %v3074_v22 = vld [vmem:[%s11588_s16 + $0x28] sm:$0xff] }
 0xac1   :  { %9024 = vmatpush3.bf16.msra.mxu0 %v9021_v47  ;;  %v3072_v47 = vld [vmem:[%s11588_s16 + $0x18] sm:$0xff]  ;;  %v9041_v24 = vpack.c.bf16 %v3074_v22, %v3073_v21 }
 0xac2   :  { %9034 = vmatprep.subr.bf16.mxu0 %v9033_v13  ;;  %v9037_v27 = vpack.c.bf16 %v3072_v47, %v3071_v20 }
 0xb23   :  { %v2701_v25 = vpop.f32.mrb[20].mxu1 }
 0xb24   :  { %v7841_v26 = vpop.f32.mrb[21].mxu1 }
 0xb25   :  { %v3076_v26 = vld [vmem:[%s11588_s16 + $0x38] sm:$0xff] }
 0xb27   :  { %v2631_v29 = vpop.f32.mrb[16].mxu0 }
 0xb28   :  { %v7806_v58 = vpop.f32.mrb[17].mxu0  ;;  %7853 = vmatprep.mubr.msk.f32.mxu0 %vm73_vm1, %v2631_v29 }
 0xb29   :  { %7854 = vmatmul.mubr.msk.f32.vlgmr.msra.gmra.mrb[18].mxu0 %vm73_vm1, %v2701_v25  ;;  %v3075_v25 = vld [vmem:[%s11588_s16 + $0x30] sm:$0xff]  ;;  %v6371_v58 = vld [vmem:[%s11587_s15] ss:$0 sm:$0xff] }
 0xb2a   :  { %9036 = vmatpush3.bf16.msra.mxu0 %v9033_v13  ;;  %v9045_v29 = vpack.c.bf16 %v3076_v26, %v3075_v25 }
 0xb2b   :  { %9038 = vmatprep.subr.bf16.mxu0 %v9037_v27 }
 0xb2e   :  { %9040 = vmatpush3.bf16.msra.mxu0 %v9037_v27 }
 0xb2f   :  { %9042 = vmatprep.subr.bf16.mxu0 %v9041_v24 }
 0xb32   :  { %9044 = vmatpush3.bf16.msra.mxu0 %v9041_v24 }
 0xb33   :  { %9046 = vmatprep.subr.bf16.mxu0 %v9045_v29 }
 0xb36   :  { %9048 = vmatpush3.bf16.msra.mxu0 %v9045_v29 }
 0xb37   :  { %9089 = vmatprep.subr.bf16.mxu0 %v9711_v11 }
 0xbfc   :  { %v7855_v28 = vpop.f32.mrb[18].mxu0 }
 0xbfd   :  { %v2876_v34 = vadd.f32 %v7855_v28, %v6370_v61  ;;  %v2858_v45 = vpop.f32.mrb[19].mxu0 }
 0xbfe   :  { %v2875_v30 = vadd.f32 %v6370_v61, %v2858_v45 }
 0xbff   :  { %v2878_v36 = vadd.f32 %v2876_v34, %v10502_v35 }
 0xc00   :  { %v2877_v38 = vadd.f32 %v2875_v30, %v10500_v33  ;;  %v2917_v33 = vld [vmem:[%s11586_s14] sm:$0xff] }
 0xc01   :  { %v2882_v39 = vsel %vm241_vm0, %v2878_v36, 0.0  ;;  %v9025_v16 = vpack.c.bf16 %v2918_v50, %v2917_v33 }
 0xc02   :  { %2883 = vadd.xlane.f32.xlu0 %v2882_v39  ;;  %v2879_v40 = vsel %vm241_vm0, %v2877_v38, 0.0 }
 0xc03   :  { %2880 = vadd.xlane.f32.xlu1 %v2879_v40  ;;  %9026 = vmatprep.subr.bf16.mxu1 %v9025_v16 }
 0xc04   :  { %9028 = vmatpush3.bf16.msra.mxu1 %v9025_v16 }
 0xc05   :  { %9030 = vmatprep.subr.bf16.mxu1 %v9029_v53 }
 0xc08   :  { %9032 = vmatpush3.bf16.msra.mxu1 %v9029_v53 }
 0xc8f   :  { %v2884_v19 = vpop.xlane.xlu0 %2883 }
 0xc90   :  { %v2886_v41 = vmul.f32 0.03125, %v2884_v19  ;;  %v2881_v43 = vpop.xlane.xlu1 %2880 }
 0xc91   :  { %v2885_v44 = vmul.f32 0.03125, %v2881_v43 }
 0xc92   :  { %v2888_v7 = vsub.f32 %v2878_v36, %v2886_v41 }
 0xc93   :  { %v2887_v46 = vsub.f32 %v2877_v38, %v2885_v44 }
 0xc94   :  { %v2890_v48 = vmul.f32 %v2888_v7, %v2888_v7 }
 0xc95   :  { %v2889_v49 = vmul.f32 %v2887_v46, %v2887_v46 }
 0xc96   :  { %v2894_v5 = vsel %vm241_vm0, %v2890_v48, 0.0 }
 0xc97   :  { %2895 = vadd.xlane.f32.xlu0 %v2894_v5  ;;  %v2891_v35 = vsel %vm241_vm0, %v2889_v49, 0.0 }
 0xc98   :  { %2892 = vadd.xlane.f32.xlu1 %v2891_v35 }
 0xd24   :  { %v2896_v54 = vpop.xlane.xlu0 %2895 }
 0xd25   :  { %v2898_v55 = vmul.f32 0.03125, %v2896_v54  ;;  %v2893_v37 = vpop.xlane.xlu1 %2892 }
 0xd26   :  { %v2897_v57 = vmul.f32 0.03125, %v2893_v37 }
 0xd27   :  { %v2900_v59 = vadd.f32 1e-06, %v2898_v55 }
 0xd28   :  { %v2899_v60 = vadd.f32 1e-06, %v2897_v57 }
 0xd29   :  { %9616 = vrsqrt.f32 %v2900_v59 }
 0xd2a   :  { %9618 = vrsqrt.f32 %v2899_v60 }
 0xd33   :  { %v9617_v63 = vpop.eup %9616 }
 0xd34   :  { %v9619_v0 = vpop.eup %9618  ;;  %v2904_v42 = vmul.f32 %v9617_v63, %v2888_v7 }
 0xd35   :  { %v2903_v1 = vmul.f32 %v9619_v0, %v2887_v46 }
 0xd36   :  { %v2910_v56 = vmul.f32 %v2908_v62, %v2904_v42 }
 0xd37   :  { %v2909_v12 = vmul.f32 %v2908_v62, %v2903_v1 }
 0xd38   :  { %v10746_v9 = vadd.f32 %v2914_v2, %v2910_v56 }
 0xd39   :  { %v10744_v4 = vadd.f32 %v2914_v2, %v2909_v12 }
 0xd3b   :  { %7864 = vmatprep.mubr.msk.f32.mxu1 %vm241_vm0, %v10744_v4 }
 0xd3c   :  { %7865 = vmatmul.mubr.msk.f32.vlgmr.msra.gmra.mrb[22].mxu1 %vm241_vm0, %v10746_v9 }
 0xe0f   :  { %v7866_v61 = vpop.f32.mrb[22].mxu1 }
 0xe10   :  { %v3006_v28 = vadd.f32 %v7866_v61, %v6371_v58  ;;  %v3000_v34 = vpop.f32.mrb[23].mxu1 }
 0xe11   :  { %v3001_v45 = vadd.f32 %v6371_v58, %v3000_v34 }
 0xe12   :  { %v3012_v30 = vmul.f32 0.70710677, %v3006_v28 }
 0xe13   :  { %v3011_v36 = vmul.f32 0.70710677, %v3001_v45 }
 0xe14   :  { %v6375_v38 = vclamps-f32 %v3012_v30, 4.0 }
 0xe15   :  { %v6374_v39 = vclamps-f32 %v3011_v36, 4.0 }
 0xe16   :  { %v3018_v40 = vmul.f32 %v6375_v38, %v6375_v38 }
 0xe17   :  { %v3017_v19 = vmul.f32 %v6374_v39, %v6374_v39 }
 0xe18   :  { %v3020_v41 = vmul.f32 -2.7261424e-10, %v3018_v40  ;;  %v3044_v43 = vmul.f32 -1.45660715e-05, %v3018_v40 }
 0xe19   :  { %v3019_v44 = vmul.f32 -2.7261424e-10, %v3017_v19  ;;  %v3043_v7 = vmul.f32 -1.45660715e-05, %v3017_v19 }
 0xe1a   :  { %v3022_v46 = vadd.f32 2.7706815e-08, %v3020_v41  ;;  %v3046_v48 = vadd.f32 -0.00021337405, %v3044_v43  ;;  %v3009_v43 = vmul.f32 0.5, %v3001_v45 }
 0xe1b   :  { %v3021_v49 = vadd.f32 2.7706815e-08, %v3019_v44  ;;  %v3045_v5 = vadd.f32 -0.00021337405, %v3043_v7  ;;  %v3010_v7 = vmul.f32 0.5, %v3006_v28 }
 0xe1c   :  { %v3024_v35 = vmul.f32 %v3022_v46, %v3018_v40  ;;  %v3048_v33 = vmul.f32 %v3046_v48, %v3018_v40 }
 0xe1d   :  { %v3023_v50 = vmul.f32 %v3021_v49, %v3017_v19  ;;  %v3047_v16 = vmul.f32 %v3045_v5, %v3017_v19 }
 0xe1e   :  { %v3026_v51 = vadd.f32 -2.101024e-06, %v3024_v35  ;;  %v3050_v52 = vadd.f32 -0.001682827, %v3048_v33 }
 0xe1f   :  { %v3025_v53 = vadd.f32 -2.101024e-06, %v3023_v50  ;;  %v3049_v54 = vadd.f32 -0.001682827, %v3047_v16 }
 0xe20   :  { %v3028_v55 = vmul.f32 %v3026_v51, %v3018_v40  ;;  %v3052_v37 = vmul.f32 %v3050_v52, %v3018_v40 }
 0xe21   :  { %v3027_v57 = vmul.f32 %v3025_v53, %v3017_v19  ;;  %v3051_v59 = vmul.f32 %v3049_v54, %v3017_v19 }
 0xe22   :  { %v3030_v60 = vadd.f32 -5.6925062e-05, %v3028_v55  ;;  %v3054_v62 = vadd.f32 -0.0073733293, %v3052_v37 }
 0xe23   :  { %v3029_v63 = vadd.f32 -5.6925062e-05, %v3027_v57  ;;  %v3053_v0 = vadd.f32 -0.0073733293, %v3051_v59  ;;  %v6382_v57 = vld [vmem:[%s11617_s29 + $0x28] sm:$0xff] }
 0xe24   :  { %v3032_v42 = vmul.f32 %v3030_v60, %v3018_v40  ;;  %v3056_v1 = vmul.f32 %v3054_v62, %v3018_v40  ;;  %v6383_v60 = vld [vmem:[%s11617_s29 + $0x30] sm:$0xff]  ;;  %v6384_v62 = vld [vmem:[%s11617_s29 + $0x38] sm:$0xff] }
 0xe25   :  { %v3031_v2 = vmul.f32 %v3029_v63, %v3017_v19  ;;  %v3055_v56 = vmul.f32 %v3053_v0, %v3017_v19  ;;  %v9053_v63 = vpack.c.bf16 %v6384_v62, %v6383_v60 }
 0xe26   :  { %v3034_v12 = vadd.f32 -0.00073499064, %v3032_v42  ;;  %v3058_v17 = vadd.f32 -0.014264739, %v3056_v1 }
 0xe27   :  { %v3033_v3 = vadd.f32 -0.00073499064, %v3031_v2  ;;  %v3057_v13 = vadd.f32 -0.014264739, %v3055_v56 }
 0xe28   :  { %v3036_v20 = vmul.f32 %v3034_v12, %v3018_v40  ;;  %9620 = vrcp.f32 %v3058_v17  ;;  %v10807_v17 = vsub.s32 2, %v10473_v6 }
 0xe29   :  { %v3035_v47 = vmul.f32 %v3033_v3, %v3017_v19  ;;  %9622 = vrcp.f32 %v3057_v13  ;;  %v9679_v3 = vld [vmem:[%s11590_s18] sm:$0x7] }
 0xe2a   :  { %v3038_v27 = vadd.f32 -0.0029546, %v3036_v20  ;;  %v3197_v13 = vrot.slane %v9679_v3, %v10807_v17  ;;  %v3390_v3 = vld [vmem:[#allocation3 + $0xd8] sm:$0xff] }
 0xe2b   :  { %v3037_v21 = vadd.f32 -0.0029546, %v3035_v47 }
 0xe2c   :  { %v3040_v22 = vmul.f32 %v3038_v27, %v3018_v40 }
 0xe2d   :  { %v3039_v24 = vmul.f32 %v3037_v21, %v3017_v19 }
 0xe2e   :  { %v3042_v25 = vadd.f32 -0.016096033, %v3040_v22  ;;  %v9680_v22 = vld [vmem:[%s11591_s19] sm:$0x7] }
 0xe2f   :  { %v3041_v26 = vadd.f32 -0.016096033, %v3039_v24  ;;  %v3203_v24 = vrot.slane %v9680_v22, %v10807_v17  ;;  %v3392_v22 = vld [vmem:[#allocation3 + $0xe8] sm:$0xff] }
 0xe30   :  { %v3060_v29 = vmul.f32 %v6375_v38, %v3042_v25  ;;  %v6376_v38 = vld [vmem:[%s11589_s17] ss:$0 sm:$0xff] }
 0xe31   :  { %v3059_v58 = vmul.f32 %v6374_v39, %v3041_v26 }
 0xe32   :  { %v9621_v61 = vpop.eup %9620 }
 0xe33   :  { %v9623_v34 = vpop.eup %9622  ;;  %v3064_v30 = vmul.f32 %v9621_v61, %v3060_v29 }
 0xe34   :  { %v3062_v36 = vmul.f32 %v9623_v34, %v3059_v58  ;;  %v6386_v58 = vld [vmem:[%s11619_s28 + $0x1] ss:$0 sm:$0xff]  ;;  %s11628_s28 = smov 64  }
 0xe35   :  { %v3066_v41 = vadd.f32 1.0, %v3064_v30 }
 0xe36   :  { %v3065_v44 = vadd.f32 1.0, %v3062_v36 }
 0xe37   :  { %v3068_v48 = vmul.f32 %v3066_v41, %v3010_v7 }
 0xe38   :  { %v3067_v46 = vmul.f32 %v3065_v44, %v3009_v43 }
 0xe3a   :  { %7883 = vmatprep.mubr.msk.f32.mxu0 %vm3084_vm5, %v3067_v46  ;;  %v10854_v46 = vld [vmem:[#allocation3 + $0x88] sm:$0xff] }
 0xe3b   :  { %7884 = vmatmul.mubr.msk.f32.vlgmr.msra.gmra.mrb[20].mxu0 %vm3084_vm5, %v3068_v48  ;;  %v3364_v48 = vld [vmem:[#allocation3 + $0x8] sm:$0xff] }
 0xe3c   :  { %7964 = vmatprep.mubr.msk.f32.mxu0 %vm9715_vm2, %v9710_v8 }
 0xf0e   :  { %v7885_v39 = vpop.f32.mrb[20].mxu0 }
 0xf0f   :  { %v3163_v40 = vadd.f32 %v7885_v39, %v6376_v38  ;;  %v3157_v19 = vpop.f32.mrb[21].mxu0 }
 0xf10   :  { %v3158_v45 = vadd.f32 %v6376_v38, %v3157_v19 }
 0xf11   :  { %v3167_v28 = vadd.f32 %v3163_v40, %v10746_v9 }
 0xf12   :  { %v3166_v49 = vadd.f32 %v3158_v45, %v10744_v4  ;;  %v6381_v4 = vld [vmem:[%s11617_s29 + $0x20] sm:$0xff]  ;;  %s9718_s29 = smov [#allocation7]  }
 0xf13   :  { %v3171_v5 = vsel %vm241_vm0, %v3167_v28, 0.0  ;;  %v9049_v59 = vpack.c.bf16 %v6382_v57, %v6381_v4  ;;  %v3386_v4 = vld [vmem:[#allocation3 + $0xb8] sm:$0xff]  ;;  %v3369_v57 = vld [vmem:[#allocation3 + $0x30] sm:$0xff]  ;;  %s6197_s4 = sshll.u32 %s9718_s29, 4  ;;  %s6198_s4 = int_to_ptr.vmem [resolvable:$true] %s6197_s4 }
 0xf14   :  { %3172 = vadd.xlane.f32.xlu0 %v3171_v5  ;;  %v3168_v35 = vsel %vm241_vm0, %v3166_v49, 0.0  ;;  %p9691_p1 = scmp.lt.s32.totalorder %s6198_s4, %s6198_s4 }
 0xf15   :  { %3169 = vadd.xlane.f32.xlu1 %v3168_v35  ;;  %9050 = vmatprep.subr.bf16.mxu1 %v9049_v59  ;;  %v3365_v35 = vld [vmem:[#allocation3 + $0x10] sm:$0xff] }
 0xf16   :  { %9052 = vmatpush3.bf16.msra.mxu1 %v9049_v59  ;;  %v3370_v59 = vld [vmem:[#allocation3 + $0x38] sm:$0xff] }
 0xf17   :  { %9054 = vmatprep.subr.bf16.mxu1 %v9053_v63  ;;  %v10891_v62 = vpack.c.bf16 %v3370_v59, %v3369_v57  ;;  %v3416_v57 = vld [vmem:[#allocation3 + $0x1a8] sm:$0xff]  ;;  %v3399_v59 = vld [vmem:[#allocation3 + $0x120] sm:$0xff] }
 0xf1a   :  { %9056 = vmatpush3.bf16.msra.mxu1 %v9053_v63  ;;  %v3387_v63 = vld [vmem:[#allocation3 + $0xc0] sm:$0xff] }
 0xf1b   :  { %9057 = vmatprep.subr.bf16.mxu1 %v9711_v11 }
 0xfa1   :  { %v3173_v33 = vpop.xlane.xlu0 %3172 }
 0xfa2   :  { %v3175_v50 = vmul.f32 0.03125, %v3173_v33  ;;  %v3170_v16 = vpop.xlane.xlu1 %3169  ;;  %v3366_v33 = vld [vmem:[#allocation3 + $0x18] sm:$0xff] }
 0xfa3   :  { %v3174_v51 = vmul.f32 0.03125, %v3170_v16  ;;  %v10867_v16 = vpack.c.bf16 %v3366_v33, %v3365_v35  ;;  %v3413_v33 = vld [vmem:[#allocation3 + $0x190] sm:$0xff] }
 0xfa4   :  { %v3177_v52 = vsub.f32 %v3167_v28, %v3175_v50  ;;  %v3381_v28 = vld [vmem:[#allocation3 + $0x90] sm:$0xff] }
 0xfa5   :  { %v3176_v53 = vsub.f32 %v3166_v49, %v3174_v51  ;;  %v3382_v49 = vld [vmem:[#allocation3 + $0x98] sm:$0xff]  ;;  %v3383_v51 = vld [vmem:[#allocation3 + $0xa0] sm:$0xff] }
 0xfa6   :  { %v3179_v54 = vmul.f32 %v3177_v52, %v3177_v52  ;;  %v10865_v50 = vpack.c.bf16 %v3382_v49, %v3381_v28 }
 0xfa7   :  { %v3178_v55 = vmul.f32 %v3176_v53, %v3176_v53 }
 0xfa8   :  { %v3183_v37 = vsel %vm241_vm0, %v3179_v54, 0.0  ;;  %v3368_v54 = vld [vmem:[#allocation3 + $0x28] sm:$0xff] }
 0xfa9   :  { %3184 = vadd.xlane.f32.xlu0 %v3183_v37  ;;  %v3180_v9 = vsel %vm241_vm0, %v3178_v55, 0.0 }
 0xfaa   :  { %3181 = vadd.xlane.f32.xlu1 %v3180_v9  ;;  %v3385_v9 = vld [vmem:[#allocation3 + $0xb0] sm:$0xff] }
 0xfab   :  { %v10889_v60 = vpack.c.bf16 %v3386_v4, %v3385_v9  ;;  %v3415_v4 = vld [vmem:[#allocation3 + $0x1a0] sm:$0xff] }
0x1036   :  { %v3185_v0 = vpop.xlane.xlu0 %3184 }
0x1037   :  { %v3187_v42 = vmul.f32 0.03125, %v3185_v0  ;;  %v3182_v1 = vpop.xlane.xlu1 %3181  ;;  %v3388_v0 = vld [vmem:[#allocation3 + $0xc8] sm:$0xff] }
0x1038   :  { %v3186_v2 = vmul.f32 0.03125, %v3182_v1  ;;  %v3372_v1 = vld [vmem:[#allocation3 + $0x48] sm:$0xff] }
0x1039   :  { %v3189_v56 = vadd.f32 1e-06, %v3187_v42  ;;  %v3371_v42 = vld [vmem:[#allocation3 + $0x40] sm:$0xff] }
0x103a   :  { %v3188_v12 = vadd.f32 1e-06, %v3186_v2  ;;  %v10901_v2 = vpack.c.bf16 %v3388_v0, %v3387_v63  ;;  %v3400_v63 = vld [vmem:[#allocation3 + $0x128] sm:$0xff]  ;;  %v9162_v0 = vpack.c.bf16 %v3416_v57, %v3415_v4  ;;  %v3410_v4 = vld [vmem:[#allocation3 + $0x178] sm:$0xff] }
0x103b   :  { %9624 = vrsqrt.f32 %v3189_v56  ;;  %v10903_v56 = vpack.c.bf16 %v3372_v1, %v3371_v42  ;;  %v10973_v42 = vpack.c.bf16 %v3400_v63, %v3399_v59  ;;  %v3417_v1 = vld [vmem:[#allocation3 + $0x1b0] sm:$0xff] }
0x103c   :  { %9626 = vrsqrt.f32 %v3188_v12  ;;  %v3389_v12 = vld [vmem:[#allocation3 + $0xd0] sm:$0xff] }
0x1045   :  { %v9625_v20 = vpop.eup %9624 }
0x1046   :  { %v9627_v47 = vpop.eup %9626  ;;  %v3193_v27 = vmul.f32 %v9625_v20, %v3177_v52  ;;  %v3384_v52 = vld [vmem:[#allocation3 + $0xa8] sm:$0xff]  ;;  %v3374_v20 = vld [vmem:[#allocation3 + $0x58] sm:$0xff] }
0x1047   :  { %v3192_v21 = vmul.f32 %v9627_v47, %v3176_v53  ;;  %v3367_v53 = vld [vmem:[#allocation3 + $0x20] sm:$0xff]  ;;  %v10877_v55 = vpack.c.bf16 %v3384_v52, %v3383_v51  ;;  %v10913_v47 = vpack.c.bf16 %v3390_v3, %v3389_v12  ;;  %v3414_v51 = vld [vmem:[#allocation3 + $0x198] sm:$0xff]  ;;  %v3397_v52 = vld [vmem:[#allocation3 + $0x110] sm:$0xff] }
0x1048   :  { %v3199_v25 = vmul.f32 %v3197_v13, %v3193_v27  ;;  %v10879_v37 = vpack.c.bf16 %v3368_v54, %v3367_v53  ;;  %v3398_v53 = vld [vmem:[#allocation3 + $0x118] sm:$0xff]  ;;  %v9158_v54 = vpack.c.bf16 %v3414_v51, %v3413_v33  ;;  %v3401_v3 = vld [vmem:[#allocation3 + $0x130] sm:$0xff] }
0x1049   :  { %v3198_v26 = vmul.f32 %v3197_v13, %v3192_v21  ;;  %v3373_v13 = vld [vmem:[#allocation3 + $0x50] sm:$0xff]  ;;  %v3391_v21 = vld [vmem:[#allocation3 + $0xe0] sm:$0xff]  ;;  %v10964_v9 = vpack.c.bf16 %v3398_v53, %v3397_v52  ;;  %v3418_v12 = vld [vmem:[#allocation3 + $0x1b8] sm:$0xff] }
0x104a   :  { %v10819_v29 = vadd.f32 %v3203_v24, %v3199_v25  ;;  %v10915_v27 = vpack.c.bf16 %v3374_v20, %v3373_v13  ;;  %v3376_v25 = vld [vmem:[#allocation3 + $0x68] sm:$0xff]  ;;  %v3402_v13 = vld [vmem:[#allocation3 + $0x138] sm:$0xff]  ;;  %v9166_v20 = vpack.c.bf16 %v3418_v12, %v3417_v1  ;;  %v3425_v52 = vld [vmem:[#allocation3 + $0x1f0] sm:$0xff] }
0x104b   :  { %v10817_v6 = vadd.f32 %v3203_v24, %v3198_v26  ;;  %v3375_v24 = vld [vmem:[#allocation3 + $0x60] sm:$0xff]  ;;  %v10925_v26 = vpack.c.bf16 %v3392_v22, %v3391_v21  ;;  %v10982_v21 = vpack.c.bf16 %v3402_v13, %v3401_v3  ;;  %v3426_v53 = vld [vmem:[#allocation3 + $0x1f8] sm:$0xff] }
0x104c   :  { %v3419_v22 = vld [vmem:[#allocation3 + $0x1c0] sm:$0xff]  ;;  %v9182_v57 = vpack.c.bf16 %v3426_v53, %v3425_v52  ;;  %v3428_v52 = vld [vmem:[#allocation4 + $0x8] sm:$0xff] }
0x104d   :  { %7894 = vmatprep.mubr.msk.f32.mxu1 %vm241_vm0, %v10817_v6 }
0x104e   :  { %7895 = vmatmul.mubr.msk.f32.vlgmr.msra.gmra.mrb[24].mxu1 %vm241_vm0, %v10819_v29 }
0x104f   :  { %7929 = vmatprep.mubr.msk.f32.mxu1 %vm9715_vm2, %v9710_v8 }
0x1121   :  { %v7896_v61 = vpop.f32.mrb[24].mxu1 }
0x1122   :  { %v10830_v34 = vadd.f32 %v7896_v61, %v6386_v58  ;;  %v3295_v30 = vpop.f32.mrb[25].mxu1  ;;  %v3393_v61 = vld [vmem:[#allocation3 + $0xf0] sm:$0xff] }
0x1123   :  { %v10832_v36 = vadd.f32 %v6386_v58, %v3295_v30  ;;  %v10927_v58 = vpack.c.bf16 %v3376_v25, %v3375_v24  ;;  %v3394_v30 = vld [vmem:[#allocation3 + $0xf8] sm:$0xff]  ;;  %v3420_v24 = vld [vmem:[#allocation3 + $0x1c8] sm:$0xff]  ;;  %v3403_v25 = vld [vmem:[#allocation3 + $0x140] sm:$0xff] }
0x1124   :  { %3312 = vst.msk [vmem:[#allocation2 + $0x8] sm:$0xff] %vm73_vm1, %v10830_v34  ;;  %3317 = vrot.lane.b32.xlu0 %v10830_v34, %s11626_s24 }
0x1125   :  { %3311 = vst.msk [vmem:[#allocation2] sm:$0xff] %vm73_vm1, %v10832_v36  ;;  %3315 = vrot.lane.b32.xlu1 %v10832_v36, %s11626_s24 }
0x1128   :  { %3331 = vrot.lane.b32.xlu0 %v10832_v36, %s9714_s0 }
0x1129   :  { %3339 = vrot.lane.b32.xlu1 %v10832_v36, %s11627_s30 }
0x112d   :  { %3341 = vrot.lane.b32.xlu1 %v10830_v34, %s11627_s30 }
0x1131   :  { %3333 = vrot.lane.b32.xlu1 %v10830_v34, %s9714_s0 }
0x1196   :  { %v3318_v41 = vpop.permute.xlu0 %3317 }
0x1197   :  { %3322 = vst.msk [vmem:[#allocation3 + $0x80] sm:$0xff] %vm73_vm1, %v3318_v41  ;;  %v3316_v43 = vpop.permute.xlu1 %3315  ;;  %v3377_v41 = vld [vmem:[#allocation3 + $0x70] sm:$0xff] }
0x1198   :  { %3321 = vst.msk [vmem:[#allocation3] sm:$0xff] %vm73_vm1, %v3316_v43  ;;  %v3378_v43 = vld [vmem:[#allocation3 + $0x78] sm:$0xff] }
0x119a   :  { %v3332_v44 = vpop.permute.xlu0 %3331 }
0x119b   :  { %3337 = vst.msk [vmem:[#allocation2 + $0x10] sm:$0xff] %vm73_vm1, %v3332_v44  ;;  %v3340_v7 = vpop.permute.xlu1 %3339  ;;  %v10937_v44 = vpack.c.bf16 %v3394_v30, %v3393_v61  ;;  %v3404_v61 = vld [vmem:[#allocation3 + $0x148] sm:$0xff]  ;;  %v9170_v30 = vpack.c.bf16 %v3420_v24, %v3419_v22 }
0x119c   :  { %3345 = vst.msk [vmem:[#allocation3 + $0x100] sm:$0xff] %vm73_vm1, %v3340_v7  ;;  %v10939_v7 = vpack.c.bf16 %v3378_v43, %v3377_v41  ;;  %v10991_v41 = vpack.c.bf16 %v3404_v61, %v3403_v25  ;;  %v3421_v43 = vld [vmem:[#allocation3 + $0x1d0] sm:$0xff] }
0x119e   :  { %v3379_v38 = vld [vmem:[#allocation3 + $0x80] sm:$0xff] }
0x119f   :  { %v3342_v39 = vpop.permute.xlu1 %3341  ;;  %v9090_v40 = vpack.c.bf16 %v10854_v46, %v3379_v38  ;;  %v3363_v19 = vld [vmem:[#allocation3] sm:$0xff] }
0x11a0   :  { %3346 = vst.msk [vmem:[#allocation3 + $0x180] sm:$0xff] %vm73_vm1, %v3342_v39  ;;  %v9058_v45 = vpack.c.bf16 %v3364_v48, %v3363_v19  ;;  %v3356_v48 = vld [vmem:[#allocation2 + $0x8] sm:$0xff]  ;;  %v3355_v38 = vld [vmem:[#allocation2] sm:$0xff] }
0x11a1   :  { %9092 = vmatpush3.bf16.xpose.msk.msra.mxu0 %vm10147_vm3, %v9090_v40  ;;  %v3412_v40 = vld [vmem:[#allocation3 + $0x188] sm:$0xff]  ;;  %v3360_v28 = vmul.f32 0.25, %v3356_v48  ;;  %v3359_v49 = vmul.f32 0.25, %v3355_v38  ;;  %v3422_v48 = vld [vmem:[#allocation3 + $0x1d8] sm:$0xff]  ;;  %v3405_v38 = vld [vmem:[#allocation3 + $0x150] sm:$0xff] }
0x11a2   :  { %9060 = vmatpush3.bf16.xpose.msk.msra.mxu1 %vm10147_vm3, %v9058_v45  ;;  %9093 = vmatprep.subr.bf16.mxu0 %v9711_v11  ;;  %v10949_v45 = vld [vmem:[#allocation3 + $0x108] sm:$0xff] }
0x11a3   :  { %v3334_v5 = vpop.permute.xlu1 %3333  ;;  %9061 = vmatprep.subr.bf16.mxu1 %v9711_v11  ;;  %v3395_v19 = vld [vmem:[#allocation3 + $0x100] sm:$0xff] }
0x11a4   :  { %3338 = vst.msk [vmem:[#allocation2 + $0x18] sm:$0xff] %vm73_vm1, %v3334_v5  ;;  %v9122_v35 = vpack.c.bf16 %v10949_v45, %v3395_v19 }
0x11a7   :  { %v3411_v39 = vld [vmem:[#allocation3 + $0x180] sm:$0xff] }
0x11a8   :  { %v9154_v5 = vpack.c.bf16 %v3412_v40, %v3411_v39  ;;  %v3406_v39 = vld [vmem:[#allocation3 + $0x158] sm:$0xff]  ;;  %v9174_v40 = vpack.c.bf16 %v3422_v48, %v3421_v43 }
0x11a9   :  { %9096 = vmatpush3.bf16.xpose.msk.msra.mxu0 %vm10147_vm3, %v10865_v50  ;;  %v11000_v19 = vpack.c.bf16 %v3406_v39, %v3405_v38 }
0x11aa   :  { %9064 = vmatpush3.bf16.xpose.msk.msra.mxu1 %vm10147_vm3, %v10867_v16  ;;  %9097 = vmatprep.subr.bf16.mxu0 %v9711_v11 }
0x11ab   :  { %9065 = vmatprep.subr.bf16.mxu1 %v9711_v11  ;;  %v3358_v63 = vld [vmem:[#allocation2 + $0x18] sm:$0xff] }
0x11ac   :  { %v3362_v1 = vmul.f32 0.25, %v3358_v63 }
0x11b1   :  { %9100 = vmatpush3.bf16.xpose.msk.msra.mxu0 %vm10147_vm3, %v10877_v55 }
0x11b2   :  { %9068 = vmatpush3.bf16.xpose.msk.msra.mxu1 %vm10147_vm3, %v10879_v37  ;;  %9101 = vmatprep.subr.bf16.mxu0 %v9711_v11 }
0x11b3   :  { %9069 = vmatprep.subr.bf16.mxu1 %v9711_v11 }
0x11b9   :  { %9104 = vmatpush3.bf16.xpose.msk.msra.mxu0 %vm10147_vm3, %v10889_v60 }
0x11ba   :  { %9072 = vmatpush3.bf16.xpose.msk.msra.mxu1 %vm10147_vm3, %v10891_v62  ;;  %9105 = vmatprep.subr.bf16.mxu0 %v9711_v11 }
0x11bb   :  { %9073 = vmatprep.subr.bf16.mxu1 %v9711_v11 }
0x11c1   :  { %9108 = vmatpush3.bf16.xpose.msk.msra.mxu0 %vm10147_vm3, %v10901_v2 }
0x11c2   :  { %9076 = vmatpush3.bf16.xpose.msk.msra.mxu1 %vm10147_vm3, %v10903_v56  ;;  %9109 = vmatprep.subr.bf16.mxu0 %v9711_v11 }
0x11c3   :  { %9077 = vmatprep.subr.bf16.mxu1 %v9711_v11 }
0x11c9   :  { %9112 = vmatpush3.bf16.xpose.msk.msra.mxu0 %vm10147_vm3, %v10913_v47 }
0x11ca   :  { %9080 = vmatpush3.bf16.xpose.msk.msra.mxu1 %vm10147_vm3, %v10915_v27  ;;  %9113 = vmatprep.subr.bf16.mxu0 %v9711_v11 }
0x11cb   :  { %9081 = vmatprep.subr.bf16.mxu1 %v9711_v11 }
0x11d1   :  { %9116 = vmatpush3.bf16.xpose.msk.msra.mxu0 %vm10147_vm3, %v10925_v26 }
0x11d2   :  { %9084 = vmatpush3.bf16.xpose.msk.msra.mxu1 %vm10147_vm3, %v10927_v58  ;;  %9117 = vmatprep.subr.bf16.mxu0 %v9711_v11 }
0x11d3   :  { %9085 = vmatprep.subr.bf16.mxu1 %v9711_v11 }
0x11d9   :  { %9120 = vmatpush3.bf16.xpose.msk.msra.mxu0 %vm10147_vm3, %v10937_v44 }
0x11da   :  { %9088 = vmatpush3.bf16.xpose.msk.msra.mxu1 %vm10147_vm3, %v10939_v7  ;;  %9153 = vmatprep.subr.bf16.mxu0 %v9711_v11 }
0x11db   :  { %9121 = vmatprep.subr.bf16.mxu1 %v9711_v11 }
0x11e0   :  { %7965 = vmatmul.mubr.msk.f32.vlgmr.msra.gmra.mrb[22].mxu0 %vm73_vm1, %v3360_v28  ;;  %v3423_v28 = vld [vmem:[#allocation3 + $0x1e0] sm:$0xff] }
0x11e1   :  { %7930 = vmatmul.mubr.msk.f32.vlgmr.msra.gmra.mrb[26].mxu1 %vm73_vm1, %v3359_v49  ;;  %9156 = vmatpush3.bf16.xpose.msk.msra.mxu0 %vm10147_vm3, %v9154_v5  ;;  %v3424_v49 = vld [vmem:[#allocation3 + $0x1e8] sm:$0xff]  ;;  %v3407_v5 = vld [vmem:[#allocation3 + $0x160] sm:$0xff] }
0x11e2   :  { %9124 = vmatpush3.bf16.xpose.msk.msra.mxu1 %vm10147_vm3, %v9122_v35  ;;  %9157 = vmatprep.subr.bf16.mxu0 %v9711_v11  ;;  %v3408_v35 = vld [vmem:[#allocation3 + $0x168] sm:$0xff]  ;;  %v9178_v33 = vpack.c.bf16 %v3424_v49, %v3423_v28 }
0x11e3   :  { %9125 = vmatprep.subr.bf16.mxu1 %v9711_v11  ;;  %8034 = vmatprep.mubr.msk.f32.mxu0 %vm9715_vm2, %v9710_v8  ;;  %v11009_v51 = vpack.c.bf16 %v3408_v35, %v3407_v5 }
0x11e4   :  { %7999 = vmatprep.mubr.msk.f32.mxu1 %vm9715_vm2, %v9710_v8 }
0x11e9   :  { %9160 = vmatpush3.bf16.xpose.msk.msra.mxu0 %vm10147_vm3, %v9158_v54  ;;  %v3409_v54 = vld [vmem:[#allocation3 + $0x170] sm:$0xff] }
0x11ea   :  { %9128 = vmatpush3.bf16.xpose.msk.msra.mxu1 %vm10147_vm3, %v10964_v9  ;;  %9161 = vmatprep.subr.bf16.mxu0 %v9711_v11  ;;  %v9150_v59 = vpack.c.bf16 %v3410_v4, %v3409_v54  ;;  %v3430_v54 = vld [vmem:[#allocation4 + $0x18] sm:$0xff] }
0x11eb   :  { %9129 = vmatprep.subr.bf16.mxu1 %v9711_v11 }
0x11f1   :  { %9164 = vmatpush3.bf16.xpose.msk.msra.mxu0 %vm10147_vm3, %v9162_v0  ;;  %v3357_v0 = vld [vmem:[#allocation2 + $0x10] sm:$0xff] }
0x11f2   :  { %9132 = vmatpush3.bf16.xpose.msk.msra.mxu1 %vm10147_vm3, %v10973_v42  ;;  %9165 = vmatprep.subr.bf16.mxu0 %v9711_v11  ;;  %v3361_v12 = vmul.f32 0.25, %v3357_v0  ;;  %v3431_v0 = vld [vmem:[#allocation4 + $0x20] sm:$0xff] }
0x11f3   :  { %9133 = vmatprep.subr.bf16.mxu1 %v9711_v11 }
0x11f9   :  { %9168 = vmatpush3.bf16.xpose.msk.msra.mxu0 %vm10147_vm3, %v9166_v20 }
0x11fa   :  { %9136 = vmatpush3.bf16.xpose.msk.msra.mxu1 %vm10147_vm3, %v10982_v21  ;;  %9169 = vmatprep.subr.bf16.mxu0 %v9711_v11 }
0x11fb   :  { %9137 = vmatprep.subr.bf16.mxu1 %v9711_v11 }
0x1201   :  { %9172 = vmatpush3.bf16.xpose.msk.msra.mxu0 %vm10147_vm3, %v9170_v30 }
0x1202   :  { %9140 = vmatpush3.bf16.xpose.msk.msra.mxu1 %vm10147_vm3, %v10991_v41  ;;  %9173 = vmatprep.subr.bf16.mxu0 %v9711_v11 }
0x1203   :  { %9141 = vmatprep.subr.bf16.mxu1 %v9711_v11 }
0x1209   :  { %9176 = vmatpush3.bf16.xpose.msk.msra.mxu0 %vm10147_vm3, %v9174_v40 }
0x120a   :  { %9144 = vmatpush3.bf16.xpose.msk.msra.mxu1 %vm10147_vm3, %v11000_v19  ;;  %9177 = vmatprep.subr.bf16.mxu0 %v9711_v11 }
0x120b   :  { %9145 = vmatprep.subr.bf16.mxu1 %v9711_v11 }
0x1211   :  { %9180 = vmatpush3.bf16.xpose.msk.msra.mxu0 %vm10147_vm3, %v9178_v33 }
0x1212   :  { %9148 = vmatpush3.bf16.xpose.msk.msra.mxu1 %vm10147_vm3, %v11009_v51  ;;  %9181 = vmatprep.subr.bf16.mxu0 %v9711_v11 }
0x1213   :  { %9149 = vmatprep.subr.bf16.mxu1 %v9711_v11 }
0x1219   :  { %9184 = vmatpush3.bf16.xpose.msk.msra.mxu0 %vm10147_vm3, %v9182_v57 }
0x121a   :  { %9152 = vmatpush3.bf16.xpose.msk.msra.mxu1 %vm10147_vm3, %v9150_v59  ;;  %9209 = vmatprep.subr.bf16.mxu0 %v9711_v11 }
0x121b   :  { %9185 = vmatprep.subr.bf16.mxu1 %v9711_v11 }
0x1220   :  { %8035 = vmatmul.mubr.msk.f32.vlgmr.msra.gmra.mrb[24].mxu0 %vm73_vm1, %v3362_v1  ;;  %v3432_v1 = vld [vmem:[#allocation4 + $0x28] sm:$0xff] }
0x1221   :  { %8000 = vmatmul.mubr.msk.f32.vlgmr.msra.gmra.mrb[28].mxu1 %vm73_vm1, %v3361_v12  ;;  %8104 = vmatprep.mubr.msk.f32.mxu0 %vm9715_vm2, %v9710_v8  ;;  %v11052_v12 = vpack.c.bf16 %v3432_v1, %v3431_v0  ;;  %v3445_v0 = vld [vmem:[#allocation4 + $0x90] sm:$0xff]  ;;  %v3446_v1 = vld [vmem:[#allocation4 + $0x98] sm:$0xff] }
0x1222   :  { %8069 = vmatprep.mubr.msk.f32.mxu1 %vm9715_vm2, %v9710_v8 }
0x12b3   :  { %v3733_v3 = vpop.f32.mrb[22].mxu0 }
0x12b4   :  { %v3734_v13 = vadd.f32 %v3733_v3, %v10276_v18  ;;  %v3612_v20 = vpop.f32.mrb[26].mxu1  ;;  %v7966_v22 = vpop.f32.mrb[23].mxu0  ;;  %v3433_v3 = vld [vmem:[#allocation4 + $0x30] sm:$0xff] }
0x12b5   :  { %v3613_v24 = vadd.f32 %v3612_v20, %v10272_v10  ;;  %v7931_v25 = vpop.f32.mrb[27].mxu1  ;;  %v3435_v22 = vld [vmem:[#allocation4 + $0x40] sm:$0xff] }
0x12b6   :  { %3981 = vmax.xlane.f32.xlu1 %v3734_v13 }
0x12b7   :  { %3979 = vmax.xlane.f32.xlu0 %v3613_v24 }
0x12c7   :  { %3323 = vrot.lane.b32.xlu1 %v10832_v36, %s11628_s28 }
0x12f3   :  { %v3975_v61 = vpop.f32.mrb[24].mxu0 }
0x12f4   :  { %v11035_v30 = vadd.f32 %v3975_v61, %v10276_v18  ;;  %v3854_v43 = vpop.f32.mrb[28].mxu1  ;;  %v8036_v48 = vpop.f32.mrb[25].mxu0  ;;  %v3437_v61 = vld [vmem:[#allocation4 + $0x50] sm:$0xff] }
0x12f5   :  { %v8001_v38 = vpop.f32.mrb[29].mxu1  ;;  %v11039_v39 = vadd.f32 %v3854_v43, %v10272_v10  ;;  %v3429_v10 = vld [vmem:[#allocation4 + $0x10] sm:$0xff]  ;;  %v3438_v43 = vld [vmem:[#allocation4 + $0x58] sm:$0xff] }
0x12f6   :  { %3985 = vmax.xlane.f32.xlu0 %v11035_v30  ;;  %v9189_v59 = vpack.c.bf16 %v3430_v54, %v3429_v10  ;;  %v11064_v48 = vpack.c.bf16 %v3438_v43, %v3437_v61  ;;  %v3439_v38 = vld [vmem:[#allocation4 + $0x60] sm:$0xff]  ;;  %v3444_v54 = vld [vmem:[#allocation4 + $0x88] sm:$0xff]  ;;  %v3449_v61 = vld [vmem:[#allocation4 + $0xb0] sm:$0xff] }
0x12f7   :  { %v3450_v43 = vld [vmem:[#allocation4 + $0xb8] sm:$0xff] }
0x12fa   :  { %3983 = vmax.xlane.f32.xlu0 %v11039_v39 }
0x1310   :  { %3325 = vrot.lane.b32.xlu0 %v10830_v34, %s11628_s28 }
0x1343   :  { %v3982_v40 = vpop.xlane.xlu1 %3981 }
0x1344   :  { %v3988_v28 = vsub.f32 %v3734_v13, %v3982_v40  ;;  %v3980_v49 = vpop.xlane.xlu0 %3979  ;;  %v3434_v13 = vld [vmem:[#allocation4 + $0x38] sm:$0xff]  ;;  %v3440_v40 = vld [vmem:[#allocation4 + $0x68] sm:$0xff] }
0x1345   :  { %v3987_v5 = vsub.f32 %v3613_v24, %v3980_v49  ;;  %v11056_v20 = vpack.c.bf16 %v3434_v13, %v3433_v3  ;;  %v3436_v24 = vld [vmem:[#allocation4 + $0x48] sm:$0xff]  ;;  %v3441_v49 = vld [vmem:[#allocation4 + $0x70] sm:$0xff]  ;;  %v9213_v13 = vpack.c.bf16 %v3446_v1, %v3445_v0 }
0x1346   :  { %v3993_v35 = vmul.f32 1.442695, %v3988_v28  ;;  %v11060_v25 = vpack.c.bf16 %v3436_v24, %v3435_v22  ;;  %v11070_v28 = vpack.c.bf16 %v3440_v40, %v3439_v38  ;;  %v3448_v22 = vld [vmem:[#allocation4 + $0xa8] sm:$0xff]  ;;  %v9219_v38 = vpack.c.bf16 %v3450_v43, %v3449_v61  ;;  %v3451_v40 = vld [vmem:[#allocation4 + $0xc0] sm:$0xff] }
0x1347   :  { %v3991_v18 = vmul.f32 1.442695, %v3987_v5  ;;  %v3324_v33 = vpop.permute.xlu1 %3323  ;;  %v3442_v5 = vld [vmem:[#allocation4 + $0x78] sm:$0xff] }
0x1348   :  { %9628 = vpow2.f32 %v3993_v35  ;;  %3329 = vst.msk [vmem:[#allocation4] sm:$0xff] %vm73_vm1, %v3324_v33  ;;  %v11076_v35 = vpack.c.bf16 %v3442_v5, %v3441_v49  ;;  %v3452_v49 = vld [vmem:[#allocation4 + $0xc8] sm:$0xff] }
0x1349   :  { %9630 = vpow2.f32 %v3991_v18  ;;  %v9222_v5 = vpack.c.bf16 %v3452_v49, %v3451_v40  ;;  %v3477_v40 = vld [vmem:[#allocation4 + $0x190] sm:$0xff]  ;;  %v3478_v49 = vld [vmem:[#allocation4 + $0x198] sm:$0xff] }
0x134f   :  { %v3427_v53 = vld [vmem:[#allocation4] sm:$0xff] }
0x1350   :  { %v9186_v4 = vpack.c.bf16 %v3428_v52, %v3427_v53 }
0x1352   :  { %v11045_v57 = vpop.eup %9628  ;;  %9187 = vmatpush3.bf16.msra.mxu1 %v9186_v4 }
0x1353   :  { %v11047_v63 = vpop.eup %9630  ;;  %4001 = vadd.xlane.f32.xlu0 %v11045_v57  ;;  %9188 = vmatprep.subr.bf16.mxu1 %v9711_v11 }
0x1354   :  { %3999 = vadd.xlane.f32.xlu1 %v11047_v63 }
0x1356   :  { %9190 = vmatpush3.bf16.msra.mxu1 %v9189_v59 }
0x1357   :  { %9191 = vmatprep.subr.bf16.mxu1 %v9711_v11 }
0x135a   :  { %9193 = vmatpush3.bf16.msra.mxu1 %v11052_v12 }
0x135b   :  { %9194 = vmatprep.subr.bf16.mxu1 %v9711_v11 }
0x135e   :  { %9196 = vmatpush3.bf16.msra.mxu1 %v11056_v20 }
0x135f   :  { %9197 = vmatprep.subr.bf16.mxu1 %v9711_v11 }
0x1362   :  { %9199 = vmatpush3.bf16.msra.mxu1 %v11060_v25 }
0x1363   :  { %9200 = vmatprep.subr.bf16.mxu1 %v9711_v11 }
0x1365   :  { %3347 = vrot.lane.b32.xlu1 %v10832_v36, %s11629_s2 }
0x1366   :  { %9202 = vmatpush3.bf16.msra.mxu1 %v11064_v48 }
0x1367   :  { %9203 = vmatprep.subr.bf16.mxu1 %v9711_v11 }
0x1369   :  { %3349 = vrot.lane.b32.xlu0 %v10830_v34, %s11629_s2 }
0x136a   :  { %9205 = vmatpush3.bf16.msra.mxu1 %v11070_v28 }
0x136b   :  { %9206 = vmatprep.subr.bf16.mxu1 %v9711_v11 }
0x136e   :  { %9208 = vmatpush3.bf16.msra.mxu1 %v11076_v35 }
0x136f   :  { %9233 = vmatprep.subr.bf16.mxu1 %v9711_v11 }
0x1383   :  { %v3986_v36 = vpop.xlane.xlu0 %3985 }
0x1384   :  { %v3990_v18 = vsub.f32 %v11035_v30, %v3986_v36  ;;  %v3453_v36 = vld [vmem:[#allocation4 + $0xd0] sm:$0xff] }
0x1386   :  { %v3997_v33 = vmul.f32 1.442695, %v3990_v18  ;;  %v3454_v18 = vld [vmem:[#allocation4 + $0xd8] sm:$0xff] }
0x1387   :  { %v3984_v52 = vpop.xlane.xlu0 %3983 }
0x1388   :  { %9632 = vpow2.f32 %v3997_v33  ;;  %v3989_v53 = vsub.f32 %v11039_v39, %v3984_v52  ;;  %v3447_v39 = vld [vmem:[#allocation4 + $0xa0] sm:$0xff]  ;;  %v9225_v33 = vpack.c.bf16 %v3454_v18, %v3453_v36 }
0x1389   :  { %v9216_v24 = vpack.c.bf16 %v3448_v22, %v3447_v39  ;;  %v3455_v52 = vld [vmem:[#allocation4 + $0xe0] sm:$0xff]  ;;  %v3476_v39 = vld [vmem:[#allocation4 + $0x188] sm:$0xff] }
0x138a   :  { %v3995_v10 = vmul.f32 1.442695, %v3989_v53  ;;  %v3456_v53 = vld [vmem:[#allocation4 + $0xe8] sm:$0xff] }
0x138b   :  { %v3326_v34 = vpop.permute.xlu0 %3325 }
0x138c   :  { %9634 = vpow2.f32 %v3995_v10  ;;  %3330 = vst.msk [vmem:[#allocation4 + $0x80] sm:$0xff] %vm73_vm1, %v3326_v34  ;;  %v9228_v10 = vpack.c.bf16 %v3456_v53, %v3455_v52  ;;  %v3457_v34 = vld [vmem:[#allocation4 + $0xf0] sm:$0xff]  ;;  %v3462_v52 = vld [vmem:[#allocation4 + $0x118] sm:$0xff] }
0x1392   :  { %v11084_v4 = vpop.eup %9632 }
0x1393   :  { %4005 = vadd.xlane.f32.xlu0 %v11084_v4  ;;  %v3443_v59 = vld [vmem:[#allocation4 + $0x80] sm:$0xff] }
0x1394   :  { %v9210_v3 = vpack.c.bf16 %v3444_v54, %v3443_v59  ;;  %v3458_v54 = vld [vmem:[#allocation4 + $0xf8] sm:$0xff] }
0x1395   :  { %v9231_v59 = vpack.c.bf16 %v3458_v54, %v3457_v34  ;;  %v3480_v34 = vld [vmem:[#allocation4 + $0x1a8] sm:$0xff]  ;;  %v3463_v54 = vld [vmem:[#allocation4 + $0x120] sm:$0xff] }
0x1396   :  { %v11087_v30 = vpop.eup %9634  ;;  %9211 = vmatpush3.bf16.msra.mxu0 %v9210_v3 }
0x1397   :  { %4003 = vadd.xlane.f32.xlu1 %v11087_v30  ;;  %9212 = vmatprep.subr.bf16.mxu0 %v9711_v11 }
0x139a   :  { %9214 = vmatpush3.bf16.msra.mxu0 %v9213_v13 }
0x139b   :  { %9215 = vmatprep.subr.bf16.mxu0 %v9711_v11 }
0x139e   :  { %9217 = vmatpush3.bf16.msra.mxu0 %v9216_v24  ;;  %v11100_v24 = vld [vmem:[#allocation4 + $0x108] sm:$0xff] }
0x139f   :  { %9218 = vmatprep.subr.bf16.mxu0 %v9711_v11 }
0x13a2   :  { %9220 = vmatpush3.bf16.msra.mxu0 %v9219_v38 }
0x13a3   :  { %9221 = vmatprep.subr.bf16.mxu0 %v9711_v11 }
0x13a6   :  { %9223 = vmatpush3.bf16.msra.mxu0 %v9222_v5 }
0x13a7   :  { %9224 = vmatprep.subr.bf16.mxu0 %v9711_v11 }
0x13aa   :  { %9226 = vmatpush3.bf16.msra.mxu0 %v9225_v33  ;;  %v3461_v33 = vld [vmem:[#allocation4 + $0x110] sm:$0xff] }
0x13ab   :  { %9227 = vmatprep.subr.bf16.mxu0 %v9711_v11 }
0x13ae   :  { %9229 = vmatpush3.bf16.msra.mxu0 %v9228_v10  ;;  %v3479_v10 = vld [vmem:[#allocation4 + $0x1a0] sm:$0xff] }
0x13af   :  { %9230 = vmatprep.subr.bf16.mxu0 %v9711_v11 }
0x13b2   :  { %9232 = vmatpush3.bf16.msra.mxu0 %v9231_v59  ;;  %v3464_v59 = vld [vmem:[#allocation4 + $0x128] sm:$0xff] }
0x13b3   :  { %9257 = vmatprep.subr.bf16.mxu0 %v9711_v11 }
0x13e0   :  { %v4002_v0 = vpop.xlane.xlu0 %4001 }
0x13e1   :  { %9636 = vrcp.f32 %v4002_v0  ;;  %v4000_v1 = vpop.xlane.xlu1 %3999  ;;  %v9264_v0 = vpack.c.bf16 %v3480_v34, %v3479_v10  ;;  %v3487_v34 = vld [vmem:[#allocation4 + $0x1e0] sm:$0xff] }
0x13e2   :  { %9638 = vrcp.f32 %v4000_v1  ;;  %v9240_v1 = vpack.c.bf16 %v3464_v59, %v3463_v54  ;;  %v3488_v54 = vld [vmem:[#allocation4 + $0x1e8] sm:$0xff]  ;;  %v3471_v59 = vld [vmem:[#allocation4 + $0x160] sm:$0xff] }
0x13e4   :  { %v3350_v3 = vpop.permute.xlu0 %3349 }
0x13e5   :  { %3354 = vst.msk [vmem:[#allocation4 + $0x180] sm:$0xff] %vm73_vm1, %v3350_v3  ;;  %v3348_v13 = vpop.permute.xlu1 %3347  ;;  %v3481_v3 = vld [vmem:[#allocation4 + $0x1b0] sm:$0xff] }
0x13e6   :  { %3353 = vst.msk [vmem:[#allocation4 + $0x100] sm:$0xff] %vm73_vm1, %v3348_v13  ;;  %v3482_v13 = vld [vmem:[#allocation4 + $0x1b8] sm:$0xff] }
0x13eb   :  { %v9637_v22 = vpop.eup %9636 }
0x13ec   :  { %v9639_v61 = vpop.eup %9638  ;;  %v4012_v43 = vmul.f32 %v9637_v22, %v11045_v57  ;;  %v3475_v38 = vld [vmem:[#allocation4 + $0x180] sm:$0xff]  ;;  %v9261_v57 = vpack.c.bf16 %v3478_v49, %v3477_v40  ;;  %v3466_v22 = vld [vmem:[#allocation4 + $0x138] sm:$0xff]  ;;  %v3484_v40 = vld [vmem:[#allocation4 + $0x1c8] sm:$0xff] }
0x13ed   :  { %v4011_v5 = vmul.f32 %v9639_v61, %v11047_v63  ;;  %v9258_v36 = vpack.c.bf16 %v3476_v39, %v3475_v38  ;;  %v3459_v18 = vld [vmem:[#allocation4 + $0x100] sm:$0xff]  ;;  %v9237_v63 = vpack.c.bf16 %v3462_v52, %v3461_v33  ;;  %v3465_v39 = vld [vmem:[#allocation4 + $0x130] sm:$0xff]  ;;  %v9267_v61 = vpack.c.bf16 %v3482_v13, %v3481_v3  ;;  %v3486_v52 = vld [vmem:[#allocation4 + $0x1d8] sm:$0xff] }
0x13ee   :  { %6463 = vst [vmem:[%s11593_s21 + $0x28] sm:$0xff] %v4012_v43  ;;  %8105 = vmatmul.mubr.f32.vlgmr.msra.gmra.mrb[26].mxu0 %v4012_v43  ;;  %v9234_v53 = vpack.c.bf16 %v11100_v24, %v3459_v18  ;;  %v9243_v43 = vpack.c.bf16 %v3466_v22, %v3465_v39  ;;  %v3483_v38 = vld [vmem:[#allocation4 + $0x1c0] sm:$0xff]  ;;  %v3485_v33 = vld [vmem:[#allocation4 + $0x1d0] sm:$0xff]  ;;  %v3490_v39 = vld [vmem:[#allocation4 + $0x1f8] sm:$0xff] }
0x13ef   :  { %6462 = vst [vmem:[%s11593_s21 + $0x20] sm:$0xff] %v4011_v5  ;;  %8070 = vmatmul.mubr.f32.vlgmr.msra.gmra.mrb[30].mxu1 %v4011_v5  ;;  %9259 = vmatpush3.bf16.msra.mxu0 %v9258_v36  ;;  %v3467_v49 = vld [vmem:[#allocation4 + $0x140] sm:$0xff]  ;;  %v3468_v5 = vld [vmem:[#allocation4 + $0x148] sm:$0xff]  ;;  %v9270_v36 = vpack.c.bf16 %v3484_v40, %v3483_v38  ;;  %v3489_v13 = vld [vmem:[#allocation4 + $0x1f0] sm:$0xff] }
0x13f0   :  { %9235 = vmatpush3.bf16.msra.mxu1 %v9234_v53  ;;  %9260 = vmatprep.subr.bf16.mxu0 %v9711_v11  ;;  %v9246_v18 = vpack.c.bf16 %v3468_v5, %v3467_v49  ;;  %v3469_v53 = vld [vmem:[#allocation4 + $0x150] sm:$0xff]  ;;  %v6390_v38 = vld [vmem:[%s11623_s1 + $0x28] sm:$0xff]  ;;  %v9279_v40 = vpack.c.bf16 %v3490_v39, %v3489_v13  ;;  %v9681_v39 = vld [vmem:[%s11624_s27] sm:$0xff] }
0x13f1   :  { %9236 = vmatprep.subr.bf16.mxu1 %v9711_v11  ;;  %8174 = vmatprep.mubr.msk.f32.mxu0 %vm9715_vm2, %v9710_v8  ;;  %v3473_v22 = vld [vmem:[#allocation4 + $0x170] sm:$0xff] }
0x13f2   :  { %8139 = vmatprep.mubr.msk.f32.mxu1 %vm9715_vm2, %v9710_v8 }
0x13f3   :  { %9262 = vmatpush3.bf16.msra.mxu0 %v9261_v57  ;;  %v3470_v57 = vld [vmem:[#allocation4 + $0x158] sm:$0xff] }
0x13f4   :  { %9263 = vmatprep.subr.bf16.mxu0 %v9711_v11  ;;  %9238 = vmatpush3.bf16.msra.mxu1 %v9237_v63  ;;  %v9273_v63 = vpack.c.bf16 %v3486_v52, %v3485_v33  ;;  %v9249_v10 = vpack.c.bf16 %v3470_v57, %v3469_v53 }
0x13f5   :  { %9239 = vmatprep.subr.bf16.mxu1 %v9711_v11 }
0x13f7   :  { %9265 = vmatpush3.bf16.msra.mxu0 %v9264_v0  ;;  %v3472_v0 = vld [vmem:[#allocation4 + $0x168] sm:$0xff] }
0x13f8   :  { %9266 = vmatprep.subr.bf16.mxu0 %v9711_v11  ;;  %9241 = vmatpush3.bf16.msra.mxu1 %v9240_v1  ;;  %v9276_v1 = vpack.c.bf16 %v3488_v54, %v3487_v34  ;;  %v9252_v3 = vpack.c.bf16 %v3472_v0, %v3471_v59 }
0x13f9   :  { %9242 = vmatprep.subr.bf16.mxu1 %v9711_v11 }
0x13fb   :  { %9268 = vmatpush3.bf16.msra.mxu0 %v9267_v61  ;;  %v3474_v61 = vld [vmem:[#allocation4 + $0x178] sm:$0xff] }
0x13fc   :  { %9269 = vmatprep.subr.bf16.mxu0 %v9711_v11  ;;  %9244 = vmatpush3.bf16.msra.mxu1 %v9243_v43  ;;  %v6389_v43 = vld [vmem:[%s11623_s1 + $0x20] sm:$0xff]  ;;  %v9255_v49 = vpack.c.bf16 %v3474_v61, %v3473_v22 }
0x13fd   :  { %9245 = vmatprep.subr.bf16.mxu1 %v9711_v11  ;;  %v9281_v5 = vpack.c.bf16 %v6390_v38, %v6389_v43  ;;  %v6470_v22 = vld [vmem:[%s11579_s7 + $0x1] ss:$0 sm:$0xff] }
0x13ff   :  { %9271 = vmatpush3.bf16.msra.mxu0 %v9270_v36 }
0x1400   :  { %9272 = vmatprep.subr.bf16.mxu0 %v9711_v11  ;;  %9247 = vmatpush3.bf16.msra.mxu1 %v9246_v18 }
0x1401   :  { %9248 = vmatprep.subr.bf16.mxu1 %v9711_v11 }
0x1403   :  { %9274 = vmatpush3.bf16.msra.mxu0 %v9273_v63  ;;  %v6391_v63 = vld [vmem:[%s11623_s1 + $0x30] sm:$0xff] }
0x1404   :  { %9275 = vmatprep.subr.bf16.mxu0 %v9711_v11  ;;  %9250 = vmatpush3.bf16.msra.mxu1 %v9249_v10 }
0x1405   :  { %9251 = vmatprep.subr.bf16.mxu1 %v9711_v11 }
0x1407   :  { %9277 = vmatpush3.bf16.msra.mxu0 %v9276_v1 }
0x1408   :  { %9278 = vmatprep.subr.bf16.mxu0 %v9711_v11  ;;  %9253 = vmatpush3.bf16.msra.mxu1 %v9252_v3 }
0x1409   :  { %9254 = vmatprep.subr.bf16.mxu1 %v9711_v11 }
0x140b   :  { %9280 = vmatpush3.bf16.msra.mxu0 %v9279_v40 }
0x140c   :  { %9256 = vmatpush3.bf16.msra.mxu1 %v9255_v49 }
0x140d   :  { %9282 = vmatprep.subr.bf16.mxu1 %v9281_v5 }
0x1420   :  { %v4006_v36 = vpop.xlane.xlu0 %4005 }
0x1421   :  { %9640 = vrcp.f32 %v4006_v36 }
0x1424   :  { %v4004_v18 = vpop.xlane.xlu1 %4003 }
0x1425   :  { %9642 = vrcp.f32 %v4004_v18 }
0x142b   :  { %v9641_v33 = vpop.eup %9640 }
0x142c   :  { %v4014_v52 = vmul.f32 %v9641_v33, %v11084_v4  ;;  %v6392_v4 = vld [vmem:[%s11623_s1 + $0x38] sm:$0xff]  ;;  %v6479_v33 = vld [vmem:[%s11582_s10 + $0x20] sm:$0xff] }
0x142d   :  { %v9285_v10 = vpack.c.bf16 %v6392_v4, %v6391_v63  ;;  %v9682_v63 = vld [vmem:[%s11624_s27 + $0x8] sm:$0xff] }
0x142e   :  { %6465 = vst [vmem:[%s11593_s21 + $0x38] sm:$0xff] %v4014_v52  ;;  %8175 = vmatmul.mubr.f32.vlgmr.msra.gmra.mrb[28].mxu0 %v4014_v52  ;;  %v6480_v52 = vld [vmem:[%s11582_s10 + $0x28] sm:$0xff] }
0x142f   :  { %v9643_v53 = vpop.eup %9642 }
0x1430   :  { %v4013_v57 = vmul.f32 %v9643_v53, %v11087_v30  ;;  %v9297_v53 = vpack.c.bf16 %v6480_v52, %v6479_v33 }
0x1432   :  { %6464 = vst [vmem:[%s11593_s21 + $0x30] sm:$0xff] %v4013_v57  ;;  %8140 = vmatmul.mubr.f32.vlgmr.msra.gmra.mrb[32].mxu1 %v4013_v57 }
0x1433   :  { %9284 = vmatpush3.bf16.msra.mxu1 %v9281_v5 }
0x1434   :  { %9286 = vmatprep.subr.bf16.mxu1 %v9285_v10 }
0x14c1   :  { %v4156_v34 = vpop.f32.mrb[26].mxu0 }
0x14c2   :  { %v4086_v54 = vpop.f32.mrb[30].mxu1  ;;  %v8106_v59 = vpop.f32.mrb[27].mxu0 }
0x14c3   :  { %v8071_v30 = vpop.f32.mrb[31].mxu1  ;;  %8181 = vmatprep.mubr.msk.f32.mxu1 %vm73_vm1, %v4086_v54 }
0x14c4   :  { %8182 = vmatmul.mubr.msk.f32.vlgmr.msra.gmra.mrb[34].mxu1 %vm73_vm1, %v4156_v34 }
0x14c5   :  { %9288 = vmatpush3.bf16.msra.mxu1 %v9285_v10 }
0x14c6   :  { %9298 = vmatprep.subr.bf16.mxu1 %v9297_v53 }
0x1501   :  { %v4296_v0 = vpop.f32.mrb[28].mxu0 }
0x1502   :  { %v8176_v1 = vpop.f32.mrb[29].mxu0 }
0x1505   :  { %v4226_v3 = vpop.f32.mrb[32].mxu1 }
0x1506   :  { %v8141_v13 = vpop.f32.mrb[33].mxu1  ;;  %8188 = vmatprep.mubr.msk.f32.mxu1 %vm73_vm1, %v4226_v3 }
0x1507   :  { %8189 = vmatmul.mubr.msk.f32.vlgmr.msra.gmra.mrb[34].mxu1 %vm73_vm1, %v4296_v0 }
0x1508   :  { %8210 = vmatprep.mubr.msk.f32.mxu1 %vm241_vm0, %v9681_v39  ;;  %9300 = vmatpush3.bf16.msra.mxu1 %v9297_v53  ;;  %v6471_v39 = vld [vmem:[%s11580_s8 + $0x20] sm:$0xff] }
0x15da   :  { %v8190_v61 = vpop.f32.mrb[34].mxu1 }
0x15db   :  { %v4471_v43 = vadd.f32 %v8190_v61, %v6470_v22  ;;  %v4453_v38 = vpop.f32.mrb[35].mxu1 }
0x15dc   :  { %v4470_v40 = vadd.f32 %v6470_v22, %v4453_v38  ;;  %v6472_v22 = vld [vmem:[%s11580_s8 + $0x28] sm:$0xff]  ;;  %v6474_v38 = vld [vmem:[%s11580_s8 + $0x38] sm:$0xff] }
0x15dd   :  { %v4473_v49 = vadd.f32 %v4471_v43, %v10819_v29  ;;  %v6481_v29 = vld [vmem:[%s11582_s10 + $0x30] sm:$0xff]  ;;  %v9289_v61 = vpack.c.bf16 %v6472_v22, %v6471_v39  ;;  %v9683_v39 = vld [vmem:[#allocation3 + $0x8] sm:$0xff] }
0x15de   :  { %v4472_v5 = vadd.f32 %v4470_v40, %v10817_v6  ;;  %v6482_v6 = vld [vmem:[%s11582_s10 + $0x38] sm:$0xff]  ;;  %v6473_v43 = vld [vmem:[%s11580_s8 + $0x30] sm:$0xff] }
0x15df   :  { %v4477_v36 = vsel %vm241_vm0, %v4473_v49, 0.0  ;;  %v9301_v57 = vpack.c.bf16 %v6482_v6, %v6481_v29  ;;  %9290 = vmatprep.subr.bf16.mxu0 %v9289_v61  ;;  %v9293_v40 = vpack.c.bf16 %v6474_v38, %v6473_v43 }
0x15e0   :  { %4478 = vadd.xlane.f32.xlu0 %v4477_v36  ;;  %v4474_v18 = vsel %vm241_vm0, %v4472_v5, 0.0  ;;  %9292 = vmatpush3.bf16.msra.mxu0 %v9289_v61 }
0x15e1   :  { %4475 = vadd.xlane.f32.xlu1 %v4474_v18  ;;  %9302 = vmatprep.subr.bf16.mxu1 %v9301_v57 }
0x15e2   :  { %9304 = vmatpush3.bf16.msra.mxu1 %v9301_v57  ;;  %9294 = vmatprep.subr.bf16.mxu0 %v9293_v40 }
0x15e3   :  { %9337 = vmatprep.subr.bf16.mxu1 %v9711_v11 }
0x15e4   :  { %9296 = vmatpush3.bf16.msra.mxu0 %v9293_v40 }
0x15e5   :  { %8211 = vmatmul.mubr.msk.f32.vlgmr.msra.gmra.mrb[36].mxu1 %vm241_vm0, %v9682_v63  ;;  %9305 = vmatprep.subr.bf16.mxu0 %v9711_v11 }
0x15e6   :  { %8280 = vmatprep.mubr.msk.f32.mxu1 %vm9715_vm2, %v9710_v8 }
0x166d   :  { %v4479_v4 = vpop.xlane.xlu0 %4478 }
0x166e   :  { %v4481_v10 = vmul.f32 0.03125, %v4479_v4  ;;  %v4476_v34 = vpop.xlane.xlu1 %4475 }
0x166f   :  { %v4480_v54 = vmul.f32 0.03125, %v4476_v34 }
0x1670   :  { %v4483_v59 = vsub.f32 %v4473_v49, %v4481_v10  ;;  %v6484_v49 = vld [vmem:[%s11583_s11 + $0x1] ss:$0 sm:$0xff] }
0x1671   :  { %v4482_v30 = vsub.f32 %v4472_v5, %v4480_v54 }
0x1672   :  { %v4485_v0 = vmul.f32 %v4483_v59, %v4483_v59 }
0x1673   :  { %v4484_v1 = vmul.f32 %v4482_v30, %v4482_v30 }
0x1674   :  { %v4489_v3 = vsel %vm241_vm0, %v4485_v0, 0.0 }
0x1675   :  { %4490 = vadd.xlane.f32.xlu0 %v4489_v3  ;;  %v4486_v13 = vsel %vm241_vm0, %v4484_v1, 0.0 }
0x1676   :  { %4487 = vadd.xlane.f32.xlu1 %v4486_v13 }
0x16b8   :  { %v8212_v5 = vpop.f32.mrb[36].mxu1 }
0x16b9   :  { %v11201_v36 = vadd.f32 %v8212_v5, %v6484_v49  ;;  %v4685_v18 = vpop.f32.mrb[37].mxu1  ;;  %v4799_v5 = vld [vmem:[#allocation3 + $0x190] sm:$0xff] }
0x16ba   :  { %v11203_v33 = vadd.f32 %v6484_v49, %v4685_v18  ;;  %v4800_v18 = vld [vmem:[#allocation3 + $0x198] sm:$0xff] }
0x16bb   :  { %4704 = vst.msk [vmem:[#allocation3 + $0x80] sm:$0xff] %vm73_vm1, %v11201_v36  ;;  %4727 = vrot.lane.b32.xlu0 %v11201_v36, %s9714_s0 }
0x16bc   :  { %4703 = vst.msk [vmem:[#allocation3] sm:$0xff] %vm73_vm1, %v11203_v33  ;;  %4725 = vrot.lane.b32.xlu1 %v11203_v33, %s9714_s0 }
0x16c2   :  { %v4765_v52 = vld [vmem:[#allocation3 + $0x80] sm:$0xff] }
0x16c3   :  { %v9338_v29 = vpack.c.bf16 %v10854_v46, %v4765_v52  ;;  %v4749_v1 = vld [vmem:[#allocation3] sm:$0xff] }
0x16c4   :  { %v9306_v22 = vpack.c.bf16 %v9683_v39, %v4749_v1  ;;  %v4801_v52 = vld [vmem:[#allocation3 + $0x1a0] sm:$0xff] }
0x16c5   :  { %9340 = vmatpush3.bf16.xpose.msk.msra.mxu1 %vm10147_vm3, %v9338_v29  ;;  %v4802_v29 = vld [vmem:[#allocation3 + $0x1a8] sm:$0xff] }
0x16c6   :  { %9341 = vmatprep.subr.bf16.mxu1 %v9711_v11 }
0x16cd   :  { %9344 = vmatpush3.bf16.xpose.msk.msra.mxu1 %vm10147_vm3, %v10865_v50 }
0x16ce   :  { %9345 = vmatprep.subr.bf16.mxu1 %v9711_v11 }
0x16d5   :  { %9348 = vmatpush3.bf16.xpose.msk.msra.mxu1 %vm10147_vm3, %v10877_v55 }
0x16d6   :  { %9349 = vmatprep.subr.bf16.mxu1 %v9711_v11 }
0x16dd   :  { %9352 = vmatpush3.bf16.xpose.msk.msra.mxu1 %vm10147_vm3, %v10889_v60  ;;  %v11240_v60 = vld [vmem:[%s11590_s18 + $0x4] sm:$0x7] }
0x16de   :  { %9353 = vmatprep.subr.bf16.mxu1 %v9711_v11  ;;  %v4503_v63 = vrot.slane %v11240_v60, %v10479_v15 }
0x16e5   :  { %9356 = vmatpush3.bf16.xpose.msk.msra.mxu1 %vm10147_vm3, %v10901_v2  ;;  %v11245_v2 = vld [vmem:[%s11591_s19 + $0x4] sm:$0x7] }
0x16e6   :  { %9357 = vmatprep.subr.bf16.mxu1 %v9711_v11  ;;  %v4509_v54 = vrot.slane %v11245_v2, %v10479_v15 }
0x16ed   :  { %9360 = vmatpush3.bf16.xpose.msk.msra.mxu1 %vm10147_vm3, %v10913_v47 }
0x16ee   :  { %9361 = vmatprep.subr.bf16.mxu1 %v9711_v11 }
0x16f5   :  { %9364 = vmatpush3.bf16.xpose.msk.msra.mxu1 %vm10147_vm3, %v10925_v26 }
0x16f6   :  { %9365 = vmatprep.subr.bf16.mxu1 %v9711_v11 }
0x16fd   :  { %9368 = vmatpush3.bf16.xpose.msk.msra.mxu1 %vm10147_vm3, %v10937_v44  ;;  %v4798_v44 = vld [vmem:[#allocation3 + $0x188] sm:$0xff] }
0x16fe   :  { %9401 = vmatprep.subr.bf16.mxu1 %v9711_v11 }
0x1702   :  { %v4491_v46 = vpop.xlane.xlu0 %4490 }
0x1703   :  { %v4493_v50 = vmul.f32 0.03125, %v4491_v46  ;;  %v4488_v53 = vpop.xlane.xlu1 %4487  ;;  %v9410_v46 = vpack.c.bf16 %v4802_v29, %v4801_v52  ;;  %v4815_v29 = vld [vmem:[#allocation4 + $0x10] sm:$0xff] }
0x1704   :  { %v4492_v6 = vmul.f32 0.03125, %v4488_v53  ;;  %v4804_v53 = vld [vmem:[#allocation3 + $0x1b8] sm:$0xff] }
0x1705   :  { %v4495_v57 = vadd.f32 1e-06, %v4493_v50  ;;  %v4803_v50 = vld [vmem:[#allocation3 + $0x1b0] sm:$0xff] }
0x1706   :  { %v4494_v55 = vadd.f32 1e-06, %v4492_v6  ;;  %v4805_v6 = vld [vmem:[#allocation3 + $0x1c0] sm:$0xff] }
0x1707   :  { %9644 = vrsqrt.f32 %v4495_v57  ;;  %v4806_v57 = vld [vmem:[#allocation3 + $0x1c8] sm:$0xff] }
0x1708   :  { %9646 = vrsqrt.f32 %v4494_v55  ;;  %v4807_v55 = vld [vmem:[#allocation3 + $0x1d0] sm:$0xff] }
0x1711   :  { %v9645_v4 = vpop.eup %9644 }
0x1712   :  { %v9647_v47 = vpop.eup %9646  ;;  %v4499_v10 = vmul.f32 %v9645_v4, %v4483_v59  ;;  %v4809_v4 = vld [vmem:[#allocation3 + $0x1e0] sm:$0xff] }
0x1713   :  { %v4498_v34 = vmul.f32 %v9647_v47, %v4482_v30  ;;  %v4810_v47 = vld [vmem:[#allocation3 + $0x1e8] sm:$0xff] }
0x1714   :  { %v4505_v0 = vmul.f32 %v4503_v63, %v4499_v10  ;;  %v4811_v10 = vld [vmem:[#allocation3 + $0x1f0] sm:$0xff] }
0x1715   :  { %v4504_v3 = vmul.f32 %v4503_v63, %v4498_v34  ;;  %v4808_v63 = vld [vmem:[#allocation3 + $0x1d8] sm:$0xff] }
0x1716   :  { %v11257_v61 = vadd.f32 %v4509_v54, %v4505_v0  ;;  %v4812_v34 = vld [vmem:[#allocation3 + $0x1f8] sm:$0xff] }
0x1717   :  { %v11255_v13 = vadd.f32 %v4509_v54, %v4504_v3  ;;  %v4796_v54 = vld [vmem:[#allocation3 + $0x178] sm:$0xff]  ;;  %v9430_v0 = vpack.c.bf16 %v4812_v34, %v4811_v10  ;;  %v4834_v10 = vld [vmem:[#allocation4 + $0xa8] sm:$0xff] }
0x1719   :  { %8199 = vmatprep.mubr.msk.f32.mxu0 %vm241_vm0, %v11255_v13 }
0x171a   :  { %8200 = vmatmul.mubr.msk.f32.vlgmr.msra.gmra.mrb[30].mxu0 %vm241_vm0, %v11257_v61 }
0x171b   :  { %9308 = vmatpush3.bf16.xpose.msk.msra.mxu0 %vm10147_vm3, %v9306_v22  ;;  %8245 = vmatprep.mubr.msk.f32.mxu0 %vm9715_vm2, %v9710_v8 }
0x171c   :  { %9309 = vmatprep.subr.bf16.mxu0 %v9711_v11 }
0x1723   :  { %9312 = vmatpush3.bf16.xpose.msk.msra.mxu0 %vm10147_vm3, %v10867_v16 }
0x1724   :  { %9313 = vmatprep.subr.bf16.mxu0 %v9711_v11 }
0x172b   :  { %9316 = vmatpush3.bf16.xpose.msk.msra.mxu0 %vm10147_vm3, %v10879_v37  ;;  %v6476_v37 = vld [vmem:[%s11581_s9 + $0x1] ss:$0 sm:$0xff] }
0x172c   :  { %9317 = vmatprep.subr.bf16.mxu0 %v9711_v11 }
0x172d   :  { %v4728_v16 = vpop.permute.xlu0 %4727 }
0x172e   :  { %v4726_v15 = vpop.permute.xlu1 %4725  ;;  %4732 = vst.msk [vmem:[#allocation3 + $0x180] sm:$0xff] %vm73_vm1, %v4728_v16 }
0x172f   :  { %4731 = vst.msk [vmem:[#allocation3 + $0x100] sm:$0xff] %vm73_vm1, %v4726_v15 }
0x1733   :  { %9320 = vmatpush3.bf16.xpose.msk.msra.mxu0 %vm10147_vm3, %v10891_v62 }
0x1734   :  { %9321 = vmatprep.subr.bf16.mxu0 %v9711_v11 }
0x173b   :  { %9324 = vmatpush3.bf16.xpose.msk.msra.mxu0 %vm10147_vm3, %v10903_v56 }
0x173c   :  { %9325 = vmatprep.subr.bf16.mxu0 %v9711_v11 }
0x1743   :  { %9328 = vmatpush3.bf16.xpose.msk.msra.mxu0 %vm10147_vm3, %v10915_v27 }
0x1744   :  { %9329 = vmatprep.subr.bf16.mxu0 %v9711_v11 }
0x174b   :  { %9332 = vmatpush3.bf16.xpose.msk.msra.mxu0 %vm10147_vm3, %v10927_v58  ;;  %v4797_v58 = vld [vmem:[#allocation3 + $0x180] sm:$0xff] }
0x174c   :  { %9333 = vmatprep.subr.bf16.mxu0 %v9711_v11  ;;  %v9402_v30 = vpack.c.bf16 %v4798_v44, %v4797_v58 }
0x1753   :  { %9336 = vmatpush3.bf16.xpose.msk.msra.mxu0 %vm10147_vm3, %v10939_v7  ;;  %v4781_v7 = vld [vmem:[#allocation3 + $0x100] sm:$0xff] }
0x1754   :  { %9369 = vmatprep.subr.bf16.mxu0 %v9711_v11  ;;  %v9370_v40 = vpack.c.bf16 %v10949_v45, %v4781_v7  ;;  %v9406_v45 = vpack.c.bf16 %v4800_v18, %v4799_v5 }
0x17ed   :  { %v8201_v62 = vpop.f32.mrb[30].mxu0 }
0x17ee   :  { %v4603_v56 = vadd.f32 %v8201_v62, %v6476_v37  ;;  %v4597_v27 = vpop.f32.mrb[31].mxu0 }
0x17ef   :  { %v4598_v26 = vadd.f32 %v6476_v37, %v4597_v27 }
0x17f0   :  { %4702 = vst.msk [vmem:[#allocation2 + $0x8] sm:$0xff] %vm73_vm1, %v4603_v56 }
0x17f1   :  { %4701 = vst.msk [vmem:[#allocation2] sm:$0xff] %vm73_vm1, %v4598_v26  ;;  %4717 = vrot.lane.b32.xlu1 %v4598_v26, %s9714_s0 }
0x17f5   :  { %4719 = vrot.lane.b32.xlu1 %v4603_v56, %s9714_s0 }
0x17f7   :  { %v4742_v59 = vld [vmem:[#allocation2 + $0x8] sm:$0xff] }
0x17f8   :  { %v4746_v43 = vmul.f32 0.25, %v4742_v59  ;;  %v4741_v38 = vld [vmem:[#allocation2] sm:$0xff] }
0x17f9   :  { %v4745_v49 = vmul.f32 0.25, %v4741_v38 }
0x17fa   :  { %8281 = vmatmul.mubr.msk.f32.vlgmr.msra.gmra.mrb[38].mxu1 %vm73_vm1, %v4746_v43 }
0x17fb   :  { %8246 = vmatmul.mubr.msk.f32.vlgmr.msra.gmra.mrb[32].mxu0 %vm73_vm1, %v4745_v49  ;;  %9404 = vmatpush3.bf16.xpose.msk.msra.mxu1 %vm10147_vm3, %v9402_v30 }
0x17fc   :  { %9372 = vmatpush3.bf16.xpose.msk.msra.mxu0 %vm10147_vm3, %v9370_v40  ;;  %9405 = vmatprep.subr.bf16.mxu1 %v9711_v11 }
0x17fd   :  { %9373 = vmatprep.subr.bf16.mxu0 %v9711_v11  ;;  %8315 = vmatprep.mubr.msk.f32.mxu0 %vm9715_vm2, %v9710_v8 }
0x17fe   :  { %8350 = vmatprep.mubr.msk.f32.mxu1 %vm9715_vm2, %v9710_v8 }
0x1803   :  { %9408 = vmatpush3.bf16.xpose.msk.msra.mxu1 %vm10147_vm3, %v9406_v45  ;;  %v4814_v45 = vld [vmem:[#allocation4 + $0x8] sm:$0xff] }
0x1804   :  { %9376 = vmatpush3.bf16.xpose.msk.msra.mxu0 %vm10147_vm3, %v10964_v9  ;;  %9409 = vmatprep.subr.bf16.mxu1 %v9711_v11  ;;  %v9414_v9 = vpack.c.bf16 %v4804_v53, %v4803_v50 }
0x1805   :  { %9377 = vmatprep.subr.bf16.mxu0 %v9711_v11 }
0x180b   :  { %9412 = vmatpush3.bf16.xpose.msk.msra.mxu1 %vm10147_vm3, %v9410_v46 }
0x180c   :  { %9380 = vmatpush3.bf16.xpose.msk.msra.mxu0 %vm10147_vm3, %v10973_v42  ;;  %9413 = vmatprep.subr.bf16.mxu1 %v9711_v11  ;;  %v9418_v42 = vpack.c.bf16 %v4806_v57, %v4805_v6 }
0x180d   :  { %9381 = vmatprep.subr.bf16.mxu0 %v9711_v11 }
0x1813   :  { %9416 = vmatpush3.bf16.xpose.msk.msra.mxu1 %vm10147_vm3, %v9414_v9 }
0x1814   :  { %9384 = vmatpush3.bf16.xpose.msk.msra.mxu0 %vm10147_vm3, %v10982_v21  ;;  %9417 = vmatprep.subr.bf16.mxu1 %v9711_v11  ;;  %v9422_v21 = vpack.c.bf16 %v4808_v63, %v4807_v55  ;;  %v4831_v63 = vld [vmem:[#allocation4 + $0x90] sm:$0xff] }
0x1815   :  { %9385 = vmatprep.subr.bf16.mxu0 %v9711_v11 }
0x181b   :  { %9420 = vmatpush3.bf16.xpose.msk.msra.mxu1 %vm10147_vm3, %v9418_v42 }
0x181c   :  { %9388 = vmatpush3.bf16.xpose.msk.msra.mxu0 %vm10147_vm3, %v10991_v41  ;;  %9421 = vmatprep.subr.bf16.mxu1 %v9711_v11  ;;  %v9426_v41 = vpack.c.bf16 %v4810_v47, %v4809_v4 }
0x181d   :  { %9389 = vmatprep.subr.bf16.mxu0 %v9711_v11 }
0x1823   :  { %9424 = vmatpush3.bf16.xpose.msk.msra.mxu1 %vm10147_vm3, %v9422_v21  ;;  %v4832_v21 = vld [vmem:[#allocation4 + $0x98] sm:$0xff] }
0x1824   :  { %9392 = vmatpush3.bf16.xpose.msk.msra.mxu0 %vm10147_vm3, %v11000_v19  ;;  %9425 = vmatprep.subr.bf16.mxu1 %v9711_v11  ;;  %v4795_v19 = vld [vmem:[#allocation3 + $0x170] sm:$0xff]  ;;  %v9461_v47 = vpack.c.bf16 %v4832_v21, %v4831_v63  ;;  %v4858_v63 = vld [vmem:[#allocation4 + $0x168] sm:$0xff] }
0x1825   :  { %9393 = vmatprep.subr.bf16.mxu0 %v9711_v11  ;;  %v9398_v1 = vpack.c.bf16 %v4796_v54, %v4795_v19  ;;  %v4835_v19 = vld [vmem:[#allocation4 + $0xb0] sm:$0xff]  ;;  %v4836_v54 = vld [vmem:[#allocation4 + $0xb8] sm:$0xff] }
0x182b   :  { %9428 = vmatpush3.bf16.xpose.msk.msra.mxu1 %vm10147_vm3, %v9426_v41  ;;  %v4833_v41 = vld [vmem:[#allocation4 + $0xa0] sm:$0xff] }
0x182c   :  { %9396 = vmatpush3.bf16.xpose.msk.msra.mxu0 %vm10147_vm3, %v11009_v51  ;;  %9429 = vmatprep.subr.bf16.mxu1 %v9711_v11  ;;  %v9464_v34 = vpack.c.bf16 %v4834_v10, %v4833_v41  ;;  %v4859_v41 = vld [vmem:[#allocation4 + $0x170] sm:$0xff]  ;;  %v4860_v10 = vld [vmem:[#allocation4 + $0x178] sm:$0xff] }
0x182d   :  { %9397 = vmatprep.subr.bf16.mxu0 %v9711_v11 }
0x1833   :  { %9432 = vmatpush3.bf16.xpose.msk.msra.mxu1 %vm10147_vm3, %v9430_v0  ;;  %v9467_v0 = vpack.c.bf16 %v4836_v54, %v4835_v19  ;;  %v4867_v19 = vld [vmem:[#allocation4 + $0x1b0] sm:$0xff]  ;;  %v4868_v54 = vld [vmem:[#allocation4 + $0x1b8] sm:$0xff] }
0x1834   :  { %9400 = vmatpush3.bf16.xpose.msk.msra.mxu0 %vm10147_vm3, %v9398_v1  ;;  %9457 = vmatprep.subr.bf16.mxu1 %v9711_v11  ;;  %v4837_v1 = vld [vmem:[#allocation4 + $0xc0] sm:$0xff] }
0x1835   :  { %9433 = vmatprep.subr.bf16.mxu0 %v9711_v11 }
0x1863   :  { %v4718_v51 = vpop.permute.xlu1 %4717 }
0x1864   :  { %4723 = vst.msk [vmem:[#allocation2 + $0x10] sm:$0xff] %vm73_vm1, %v4718_v51  ;;  %v4838_v51 = vld [vmem:[#allocation4 + $0xc8] sm:$0xff] }
0x1867   :  { %v4720_v3 = vpop.permute.xlu1 %4719 }
0x1868   :  { %4724 = vst.msk [vmem:[#allocation2 + $0x18] sm:$0xff] %vm73_vm1, %v4720_v3  ;;  %v9470_v3 = vpack.c.bf16 %v4838_v51, %v4837_v1  ;;  %v4869_v1 = vld [vmem:[#allocation4 + $0x1c0] sm:$0xff]  ;;  %v4870_v51 = vld [vmem:[#allocation4 + $0x1c8] sm:$0xff] }
0x186b   :  { %v4743_v39 = vld [vmem:[#allocation2 + $0x10] sm:$0xff] }
0x186c   :  { %v4747_v22 = vmul.f32 0.25, %v4743_v39  ;;  %v4839_v39 = vld [vmem:[#allocation4 + $0xd0] sm:$0xff] }
0x186e   :  { %8316 = vmatmul.mubr.msk.f32.vlgmr.msra.gmra.mrb[34].mxu0 %vm73_vm1, %v4747_v22  ;;  %v4840_v22 = vld [vmem:[#allocation4 + $0xd8] sm:$0xff] }
0x186f   :  { %v4744_v15 = vld [vmem:[#allocation2 + $0x18] sm:$0xff]  ;;  %8385 = vmatprep.mubr.msk.f32.mxu0 %vm9715_vm2, %v9710_v8 }
0x1870   :  { %v4748_v23 = vmul.f32 0.25, %v4744_v15  ;;  %v9473_v15 = vpack.c.bf16 %v4840_v22, %v4839_v39  ;;  %v4871_v39 = vld [vmem:[#allocation4 + $0x1d0] sm:$0xff]  ;;  %v4872_v22 = vld [vmem:[#allocation4 + $0x1d8] sm:$0xff] }
0x1872   :  { %8351 = vmatmul.mubr.msk.f32.vlgmr.msra.gmra.mrb[40].mxu1 %vm73_vm1, %v4748_v23  ;;  %v4841_v23 = vld [vmem:[#allocation4 + $0xe0] sm:$0xff] }
0x1873   :  { %8420 = vmatprep.mubr.msk.f32.mxu1 %vm9715_vm2, %v9710_v8 }
0x18cd   :  { %v5119_v16 = vpop.f32.mrb[38].mxu1 }
0x18ce   :  { %v5120_v37 = vadd.f32 %v5119_v16, %v10615_v31  ;;  %v4998_v62 = vpop.f32.mrb[32].mxu0  ;;  %v8282_v56 = vpop.f32.mrb[39].mxu1  ;;  %v4842_v16 = vld [vmem:[#allocation4 + $0xe8] sm:$0xff] }
0x18cf   :  { %v4999_v27 = vadd.f32 %v4998_v62, %v10618_v32  ;;  %v8247_v26 = vpop.f32.mrb[33].mxu0  ;;  %v9476_v62 = vpack.c.bf16 %v4842_v16, %v4841_v23  ;;  %v4843_v56 = vld [vmem:[#allocation4 + $0xf0] sm:$0xff]  ;;  %v4873_v23 = vld [vmem:[#allocation4 + $0x1e0] sm:$0xff]  ;;  %v4874_v16 = vld [vmem:[#allocation4 + $0x1e8] sm:$0xff] }
0x18d0   :  { %5367 = vmax.xlane.f32.xlu1 %v5120_v37 }
0x18d1   :  { %5365 = vmax.xlane.f32.xlu0 %v4999_v27 }
0x18e1   :  { %4707 = vrot.lane.b32.xlu1 %v11203_v33, %s11626_s24 }
0x1941   :  { %v5240_v58 = vpop.f32.mrb[34].mxu0 }
0x1942   :  { %v8317_v44 = vpop.f32.mrb[35].mxu0  ;;  %v5241_v43 = vadd.f32 %v5240_v58, %v10618_v32 }
0x1945   :  { %v5361_v7 = vpop.f32.mrb[40].mxu1 }
0x1946   :  { %v5362_v59 = vadd.f32 %v5361_v7, %v10615_v31  ;;  %v8352_v30 = vpop.f32.mrb[41].mxu1  ;;  %v4816_v31 = vld [vmem:[#allocation4 + $0x18] sm:$0xff] }
0x1947   :  { %v9437_v50 = vpack.c.bf16 %v4816_v31, %v4815_v29  ;;  %v4847_v30 = vld [vmem:[#allocation4 + $0x110] sm:$0xff] }
0x1948   :  { %5371 = vmax.xlane.f32.xlu0 %v5362_v59 }
0x194c   :  { %5369 = vmax.xlane.f32.xlu0 %v5241_v43 }
0x195d   :  { %v5368_v38 = vpop.xlane.xlu1 %5367 }
0x195e   :  { %v5366_v40 = vpop.xlane.xlu0 %5365  ;;  %v5374_v53 = vsub.f32 %v5120_v37, %v5368_v38 }
0x195f   :  { %v5373_v49 = vsub.f32 %v4999_v27, %v5366_v40  ;;  %v4844_v27 = vld [vmem:[#allocation4 + $0xf8] sm:$0xff] }
0x1960   :  { %v5379_v9 = vmul.f32 1.442695, %v5374_v53  ;;  %v9479_v58 = vpack.c.bf16 %v4844_v27, %v4843_v56  ;;  %v4855_v53 = vld [vmem:[#allocation4 + $0x150] sm:$0xff]  ;;  %v4876_v56 = vld [vmem:[#allocation4 + $0x1f8] sm:$0xff] }
0x1961   :  { %v5377_v5 = vmul.f32 1.442695, %v5373_v49  ;;  %v4708_v18 = vpop.permute.xlu1 %4707  ;;  %v4849_v49 = vld [vmem:[#allocation4 + $0x120] sm:$0xff] }
0x1962   :  { %4713 = vst.msk [vmem:[#allocation4] sm:$0xff] %vm73_vm1, %v4708_v18  ;;  %4709 = vrot.lane.b32.xlu0 %v11201_v36, %s11626_s24 }
0x1963   :  { %9648 = vpow2.f32 %v5377_v5  ;;  %v4850_v5 = vld [vmem:[#allocation4 + $0x128] sm:$0xff] }
0x1964   :  { %9650 = vpow2.f32 %v5379_v9  ;;  %v4856_v9 = vld [vmem:[#allocation4 + $0x158] sm:$0xff] }
0x1969   :  { %v4813_v52 = vld [vmem:[#allocation4] sm:$0xff] }
0x196a   :  { %v9434_v46 = vpack.c.bf16 %v4814_v45, %v4813_v52  ;;  %v9488_v45 = vpack.c.bf16 %v4850_v5, %v4849_v49  ;;  %v4852_v52 = vld [vmem:[#allocation4 + $0x138] sm:$0xff] }
0x196c   :  { %9435 = vmatpush3.bf16.msra.mxu0 %v9434_v46  ;;  %v4853_v46 = vld [vmem:[#allocation4 + $0x140] sm:$0xff] }
0x196d   :  { %v11387_v32 = vpop.eup %9648  ;;  %9436 = vmatprep.subr.bf16.mxu0 %v9711_v11 }
0x196e   :  { %5385 = vadd.xlane.f32.xlu1 %v11387_v32  ;;  %v11400_v6 = vpop.eup %9650 }
0x1970   :  { %9438 = vmatpush3.bf16.msra.mxu0 %v9437_v50  ;;  %v4854_v50 = vld [vmem:[#allocation4 + $0x148] sm:$0xff] }
0x1971   :  { %9439 = vmatprep.subr.bf16.mxu0 %v9711_v11 }
0x1974   :  { %9441 = vmatpush3.bf16.msra.mxu0 %v11052_v12 }
0x1975   :  { %9442 = vmatprep.subr.bf16.mxu0 %v9711_v11 }
0x1978   :  { %9444 = vmatpush3.bf16.msra.mxu0 %v11056_v20 }
0x1979   :  { %9445 = vmatprep.subr.bf16.mxu0 %v9711_v11 }
0x197c   :  { %9447 = vmatpush3.bf16.msra.mxu0 %v11060_v25 }
0x197d   :  { %9448 = vmatprep.subr.bf16.mxu0 %v9711_v11 }
0x197f   :  { %4733 = vrot.lane.b32.xlu1 %v11203_v33, %s11627_s30 }
0x1980   :  { %9450 = vmatpush3.bf16.msra.mxu0 %v11064_v48 }
0x1981   :  { %5387 = vadd.xlane.f32.xlu0 %v11400_v6  ;;  %9451 = vmatprep.subr.bf16.mxu0 %v9711_v11 }
0x1984   :  { %9453 = vmatpush3.bf16.msra.mxu0 %v11070_v28  ;;  %v4830_v28 = vld [vmem:[#allocation4 + $0x88] sm:$0xff] }
0x1985   :  { %9454 = vmatprep.subr.bf16.mxu0 %v9711_v11 }
0x1988   :  { %9456 = vmatpush3.bf16.msra.mxu0 %v11076_v35 }
0x1989   :  { %9481 = vmatprep.subr.bf16.mxu0 %v9711_v11 }
0x1997   :  { %4735 = vrot.lane.b32.xlu0 %v11201_v36, %s11627_s30 }
0x19d5   :  { %v5372_v12 = vpop.xlane.xlu0 %5371 }
0x19d6   :  { %v5376_v20 = vsub.f32 %v5362_v59, %v5372_v12  ;;  %v4862_v12 = vld [vmem:[#allocation4 + $0x188] sm:$0xff] }
0x19d8   :  { %v5383_v25 = vmul.f32 1.442695, %v5376_v20 }
0x19d9   :  { %v5370_v33 = vpop.xlane.xlu0 %5369 }
0x19da   :  { %9652 = vpow2.f32 %v5383_v25  ;;  %v5375_v48 = vsub.f32 %v5241_v43, %v5370_v33  ;;  %v4848_v43 = vld [vmem:[#allocation4 + $0x118] sm:$0xff] }
0x19db   :  { %v9485_v40 = vpack.c.bf16 %v4848_v43, %v4847_v30 }
0x19dc   :  { %v5381_v57 = vmul.f32 1.442695, %v5375_v48  ;;  %v4863_v48 = vld [vmem:[#allocation4 + $0x190] sm:$0xff] }
0x19dd   :  { %v4710_v42 = vpop.permute.xlu0 %4709 }
0x19de   :  { %9654 = vpow2.f32 %v5381_v57  ;;  %4714 = vst.msk [vmem:[#allocation4 + $0x80] sm:$0xff] %vm73_vm1, %v4710_v42  ;;  %v4864_v57 = vld [vmem:[#allocation4 + $0x198] sm:$0xff]  ;;  %v9497_v42 = vpack.c.bf16 %v4856_v9, %v4855_v53 }
0x19df   :  { %v9509_v21 = vpack.c.bf16 %v4864_v57, %v4863_v48 }
0x19e4   :  { %v11412_v55 = vpop.eup %9652 }
0x19e5   :  { %5391 = vadd.xlane.f32.xlu0 %v11412_v55  ;;  %v4829_v35 = vld [vmem:[#allocation4 + $0x80] sm:$0xff] }
0x19e6   :  { %v9458_v36 = vpack.c.bf16 %v4830_v28, %v4829_v35  ;;  %v4857_v35 = vld [vmem:[#allocation4 + $0x160] sm:$0xff] }
0x19e8   :  { %v11415_v4 = vpop.eup %9654  ;;  %9459 = vmatpush3.bf16.msra.mxu1 %v9458_v36  ;;  %v4866_v36 = vld [vmem:[#allocation4 + $0x1a8] sm:$0xff] }
0x19e9   :  { %5389 = vadd.xlane.f32.xlu1 %v11415_v4  ;;  %9460 = vmatprep.subr.bf16.mxu1 %v9711_v11 }
0x19ec   :  { %9462 = vmatpush3.bf16.msra.mxu1 %v9461_v47  ;;  %v9500_v47 = vpack.c.bf16 %v4858_v63, %v4857_v35 }
0x19ed   :  { %9463 = vmatprep.subr.bf16.mxu1 %v9711_v11 }
0x19f0   :  { %9465 = vmatpush3.bf16.msra.mxu1 %v9464_v34 }
0x19f1   :  { %9466 = vmatprep.subr.bf16.mxu1 %v9711_v11 }
0x19f4   :  { %9468 = vmatpush3.bf16.msra.mxu1 %v9467_v0  ;;  %v9503_v0 = vpack.c.bf16 %v4860_v10, %v4859_v41  ;;  %v6571_v10 = vld [vmem:[%s11586_s14 + $0x30] sm:$0xff] }
0x19f5   :  { %9469 = vmatprep.subr.bf16.mxu1 %v9711_v11 }
0x19f8   :  { %9471 = vmatpush3.bf16.msra.mxu1 %v9470_v3  ;;  %v9518_v3 = vpack.c.bf16 %v4870_v51, %v4869_v1 }
0x19f9   :  { %9472 = vmatprep.subr.bf16.mxu1 %v9711_v11 }
0x19fb   :  { %v5386_v37 = vpop.xlane.xlu1 %5385 }
0x19fc   :  { %9656 = vrcp.f32 %v5386_v37  ;;  %9474 = vmatpush3.bf16.msra.mxu1 %v9473_v15  ;;  %v9521_v15 = vpack.c.bf16 %v4872_v22, %v4871_v39  ;;  %v9524_v37 = vpack.c.bf16 %v4874_v16, %v4873_v23  ;;  %v5889_v39 = vrot.slane %v11240_v60, %v10738_v14  ;;  %v6579_v60 = vld [vmem:[%s11588_s16 + $0x40] sm:$0xff] }
0x19fd   :  { %9475 = vmatprep.subr.bf16.mxu1 %v9711_v11 }
0x19ff   :  { %v4734_v26 = vpop.permute.xlu1 %4733 }
0x1a00   :  { %4739 = vst.msk [vmem:[#allocation4 + $0x100] sm:$0xff] %vm73_vm1, %v4734_v26  ;;  %9477 = vmatpush3.bf16.msra.mxu1 %v9476_v62  ;;  %v4875_v62 = vld [vmem:[#allocation4 + $0x1f0] sm:$0xff]  ;;  %v6487_v26 = vld [vmem:[%s11584_s12 + $0x20] sm:$0xff] }
0x1a01   :  { %9478 = vmatprep.subr.bf16.mxu1 %v9711_v11  ;;  %v9527_v27 = vpack.c.bf16 %v4876_v56, %v4875_v62 }
0x1a04   :  { %9480 = vmatpush3.bf16.msra.mxu1 %v9479_v58  ;;  %v6488_v58 = vld [vmem:[%s11584_s12 + $0x28] sm:$0xff] }
0x1a05   :  { %9505 = vmatprep.subr.bf16.mxu1 %v9711_v11 }
0x1a06   :  { %v9657_v44 = vpop.eup %9656 }
0x1a07   :  { %v5397_v7 = vmul.f32 %v9657_v44, %v11387_v32  ;;  %v4845_v59 = vld [vmem:[#allocation4 + $0x100] sm:$0xff]  ;;  %v9494_v32 = vpack.c.bf16 %v4854_v50, %v4853_v46  ;;  %v9529_v44 = vpack.c.bf16 %v6488_v58, %v6487_v26  ;;  %v6581_v58 = vld [vmem:[%s11588_s16 + $0x50] sm:$0xff] }
0x1a08   :  { %v9482_v38 = vpack.c.bf16 %v11100_v24, %v4845_v59  ;;  %v4851_v24 = vld [vmem:[#allocation4 + $0x130] sm:$0xff]  ;;  %v6568_v46 = vld [vmem:[%s11585_s13 + $0x1] ss:$0 sm:$0xff] }
0x1a09   :  { %6560 = vst [vmem:[%s11594_s22 + $0x20] sm:$0xff] %v5397_v7  ;;  %8386 = vmatmul.mubr.f32.vlgmr.msra.gmra.mrb[36].mxu0 %v5397_v7  ;;  %v9491_v31 = vpack.c.bf16 %v4852_v52, %v4851_v24 }
0x1a0a   :  { %9483 = vmatpush3.bf16.msra.mxu0 %v9482_v38  ;;  %8455 = vmatprep.mubr.msk.f32.mxu0 %vm9715_vm2, %v9710_v8  ;;  %v6490_v38 = vld [vmem:[%s11584_s12 + $0x38] sm:$0xff] }
0x1a0b   :  { %9484 = vmatprep.subr.bf16.mxu0 %v9711_v11 }
0x1a0e   :  { %v5388_v18 = vpop.xlane.xlu0 %5387  ;;  %9486 = vmatpush3.bf16.msra.mxu0 %v9485_v40 }
0x1a0f   :  { %9658 = vrcp.f32 %v5388_v18  ;;  %9487 = vmatprep.subr.bf16.mxu0 %v9711_v11 }
0x1a12   :  { %v4736_v29 = vpop.permute.xlu0 %4735  ;;  %9489 = vmatpush3.bf16.msra.mxu0 %v9488_v45 }
0x1a13   :  { %4740 = vst.msk [vmem:[#allocation4 + $0x180] sm:$0xff] %vm73_vm1, %v4736_v29  ;;  %9490 = vmatprep.subr.bf16.mxu0 %v9711_v11 }
0x1a16   :  { %9492 = vmatpush3.bf16.msra.mxu0 %v9491_v31 }
0x1a17   :  { %9493 = vmatprep.subr.bf16.mxu0 %v9711_v11 }
0x1a19   :  { %v9659_v20 = vpop.eup %9658 }
0x1a1a   :  { %v5398_v25 = vmul.f32 %v9659_v20, %v11400_v6  ;;  %v4861_v33 = vld [vmem:[#allocation4 + $0x180] sm:$0xff]  ;;  %9495 = vmatpush3.bf16.msra.mxu0 %v9494_v32 }
0x1a1b   :  { %v9506_v28 = vpack.c.bf16 %v4862_v12, %v4861_v33  ;;  %9496 = vmatprep.subr.bf16.mxu0 %v9711_v11  ;;  %v4865_v6 = vld [vmem:[#allocation4 + $0x1a0] sm:$0xff] }
0x1a1c   :  { %6561 = vst [vmem:[%s11594_s22 + $0x28] sm:$0xff] %v5398_v25  ;;  %8421 = vmatmul.mubr.f32.vlgmr.msra.gmra.mrb[42].mxu1 %v5398_v25  ;;  %v9512_v34 = vpack.c.bf16 %v4866_v36, %v4865_v6 }
0x1a1d   :  { %9507 = vmatpush3.bf16.msra.mxu1 %v9506_v28  ;;  %8490 = vmatprep.mubr.msk.f32.mxu1 %vm9715_vm2, %v9710_v8  ;;  %v9515_v8 = vpack.c.bf16 %v4868_v54, %v4867_v19 }
0x1a1e   :  { %9508 = vmatprep.subr.bf16.mxu1 %v9711_v11  ;;  %9498 = vmatpush3.bf16.msra.mxu0 %v9497_v42 }
0x1a1f   :  { %9499 = vmatprep.subr.bf16.mxu0 %v9711_v11 }
0x1a21   :  { %9510 = vmatpush3.bf16.msra.mxu1 %v9509_v21 }
0x1a22   :  { %9511 = vmatprep.subr.bf16.mxu1 %v9711_v11  ;;  %9501 = vmatpush3.bf16.msra.mxu0 %v9500_v47  ;;  %v6570_v47 = vld [vmem:[%s11586_s14 + $0x28] sm:$0xff] }
0x1a23   :  { %9502 = vmatprep.subr.bf16.mxu0 %v9711_v11 }
0x1a25   :  { %9513 = vmatpush3.bf16.msra.mxu1 %v9512_v34  ;;  %v6572_v34 = vld [vmem:[%s11586_s14 + $0x38] sm:$0xff] }
0x1a26   :  { %9514 = vmatprep.subr.bf16.mxu1 %v9711_v11  ;;  %9504 = vmatpush3.bf16.msra.mxu0 %v9503_v0  ;;  %v9541_v19 = vpack.c.bf16 %v6572_v34, %v6571_v10 }
0x1a27   :  { %9530 = vmatprep.subr.bf16.mxu0 %v9529_v44 }
0x1a29   :  { %9516 = vmatpush3.bf16.msra.mxu1 %v9515_v8 }
0x1a2a   :  { %9517 = vmatprep.subr.bf16.mxu1 %v9711_v11 }
0x1a2d   :  { %9519 = vmatpush3.bf16.msra.mxu1 %v9518_v3 }
0x1a2e   :  { %9520 = vmatprep.subr.bf16.mxu1 %v9711_v11 }
0x1a31   :  { %9522 = vmatpush3.bf16.msra.mxu1 %v9521_v15 }
0x1a32   :  { %9523 = vmatprep.subr.bf16.mxu1 %v9711_v11 }
0x1a35   :  { %9525 = vmatpush3.bf16.msra.mxu1 %v9524_v37  ;;  %v5895_v37 = vrot.slane %v11245_v2, %v10738_v14  ;;  %v6580_v14 = vld [vmem:[%s11588_s16 + $0x48] sm:$0xff] }
0x1a36   :  { %9526 = vmatprep.subr.bf16.mxu1 %v9711_v11  ;;  %v6489_v11 = vld [vmem:[%s11584_s12 + $0x30] sm:$0xff]  ;;  %v9545_v2 = vpack.c.bf16 %v6580_v14, %v6579_v60 }
0x1a37   :  { %v9533_v5 = vpack.c.bf16 %v6490_v38, %v6489_v11  ;;  %v6585_v11 = vld [vmem:[%s11588_s16 + $0x70] sm:$0xff]  ;;  %v6586_v38 = vld [vmem:[%s11588_s16 + $0x78] sm:$0xff] }
0x1a39   :  { %9528 = vmatpush3.bf16.msra.mxu1 %v9527_v27 }
0x1a72   :  { %v5392_v7 = vpop.xlane.xlu0 %5391 }
0x1a73   :  { %9660 = vrcp.f32 %v5392_v7 }
0x1a76   :  { %v5390_v59 = vpop.xlane.xlu1 %5389 }
0x1a77   :  { %9662 = vrcp.f32 %v5390_v59  ;;  %v6583_v59 = vld [vmem:[%s11588_s16 + $0x60] sm:$0xff] }
0x1a7d   :  { %v9661_v30 = vpop.eup %9660 }
0x1a7e   :  { %v5400_v43 = vmul.f32 %v9661_v30, %v11412_v55  ;;  %v6584_v30 = vld [vmem:[%s11588_s16 + $0x68] sm:$0xff] }
0x1a80   :  { %6563 = vst [vmem:[%s11594_s22 + $0x38] sm:$0xff] %v5400_v43  ;;  %8491 = vmatmul.mubr.f32.vlgmr.msra.gmra.mrb[44].mxu1 %v5400_v43  ;;  %v9553_v43 = vpack.c.bf16 %v6584_v30, %v6583_v59 }
0x1a81   :  { %v9663_v40 = vpop.eup %9662 }
0x1a82   :  { %v5399_v49 = vmul.f32 %v9663_v40, %v11415_v4  ;;  %v9557_v40 = vpack.c.bf16 %v6586_v38, %v6585_v11 }
0x1a84   :  { %6562 = vst [vmem:[%s11594_s22 + $0x30] sm:$0xff] %v5399_v49  ;;  %8456 = vmatmul.mubr.f32.vlgmr.msra.gmra.mrb[38].mxu0 %v5399_v49  ;;  %v6574_v49 = vld [vmem:[%s11587_s15 + $0x1] ss:$0 sm:$0xff] }
0x1a85   :  { %9532 = vmatpush3.bf16.msra.mxu0 %v9529_v44  ;;  %v6582_v44 = vld [vmem:[%s11588_s16 + $0x58] sm:$0xff] }
0x1a86   :  { %9534 = vmatprep.subr.bf16.mxu0 %v9533_v5  ;;  %v9549_v7 = vpack.c.bf16 %v6582_v44, %v6581_v58 }
0x1adc   :  { %v5472_v55 = vpop.f32.mrb[36].mxu0 }
0x1add   :  { %v8387_v18 = vpop.f32.mrb[37].mxu0  ;;  %8497 = vmatprep.mubr.msk.f32.mxu0 %vm73_vm1, %v5472_v55 }
0x1aef   :  { %v5542_v45 = vpop.f32.mrb[42].mxu1 }
0x1af0   :  { %v8422_v24 = vpop.f32.mrb[43].mxu1  ;;  %8498 = vmatmul.mubr.msk.f32.vlgmr.msra.gmra.mrb[40].mxu0 %vm73_vm1, %v5542_v45 }
0x1af1   :  { %9536 = vmatpush3.bf16.msra.mxu0 %v9533_v5 }
0x1af2   :  { %9546 = vmatprep.subr.bf16.mxu0 %v9545_v2 }
0x1b53   :  { %v5682_v52 = vpop.f32.mrb[44].mxu1 }
0x1b54   :  { %v8492_v29 = vpop.f32.mrb[45].mxu1 }
0x1b57   :  { %v5612_v4 = vpop.f32.mrb[38].mxu0 }
0x1b58   :  { %v8457_v31 = vpop.f32.mrb[39].mxu0  ;;  %8504 = vmatprep.mubr.msk.f32.mxu0 %vm73_vm1, %v5612_v4 }
0x1b59   :  { %8505 = vmatmul.mubr.msk.f32.vlgmr.msra.gmra.mrb[40].mxu0 %vm73_vm1, %v5682_v52 }
0x1b5a   :  { %9548 = vmatpush3.bf16.msra.mxu0 %v9545_v2 }
0x1b5b   :  { %9550 = vmatprep.subr.bf16.mxu0 %v9549_v7 }
0x1b5e   :  { %9552 = vmatpush3.bf16.msra.mxu0 %v9549_v7 }
0x1b5f   :  { %9554 = vmatprep.subr.bf16.mxu0 %v9553_v43 }
0x1b62   :  { %9556 = vmatpush3.bf16.msra.mxu0 %v9553_v43 }
0x1b63   :  { %9558 = vmatprep.subr.bf16.mxu0 %v9557_v40 }
0x1b66   :  { %9560 = vmatpush3.bf16.msra.mxu0 %v9557_v40 }
0x1c2c   :  { %v8506_v50 = vpop.f32.mrb[40].mxu0 }
0x1c2d   :  { %v5857_v32 = vadd.f32 %v8506_v50, %v6568_v46  ;;  %v5839_v53 = vpop.f32.mrb[41].mxu0 }
0x1c2e   :  { %v5856_v9 = vadd.f32 %v6568_v46, %v5839_v53 }
0x1c2f   :  { %v5859_v12 = vadd.f32 %v5857_v32, %v11257_v61 }
0x1c30   :  { %v5858_v20 = vadd.f32 %v5856_v9, %v11255_v13  ;;  %v6569_v13 = vld [vmem:[%s11586_s14 + $0x20] sm:$0xff] }
0x1c31   :  { %v5863_v25 = vsel %vm241_vm0, %v5859_v12, 0.0  ;;  %v9537_v41 = vpack.c.bf16 %v6570_v47, %v6569_v13 }
0x1c32   :  { %5864 = vadd.xlane.f32.xlu0 %v5863_v25  ;;  %v5860_v33 = vsel %vm241_vm0, %v5858_v20, 0.0 }
0x1c33   :  { %5861 = vadd.xlane.f32.xlu1 %v5860_v33  ;;  %9538 = vmatprep.subr.bf16.mxu1 %v9537_v41 }
0x1c34   :  { %9540 = vmatpush3.bf16.msra.mxu1 %v9537_v41 }
0x1c35   :  { %9542 = vmatprep.subr.bf16.mxu1 %v9541_v19 }
0x1c38   :  { %9544 = vmatpush3.bf16.msra.mxu1 %v9541_v19 }
0x1cbf   :  { %v5865_v48 = vpop.xlane.xlu0 %5864 }
0x1cc0   :  { %v5867_v57 = vmul.f32 0.03125, %v5865_v48  ;;  %v5862_v42 = vpop.xlane.xlu1 %5861 }
0x1cc1   :  { %v5866_v28 = vmul.f32 0.03125, %v5862_v42 }
0x1cc2   :  { %v5869_v35 = vsub.f32 %v5859_v12, %v5867_v57 }
0x1cc3   :  { %v5868_v63 = vsub.f32 %v5858_v20, %v5866_v28 }
0x1cc4   :  { %v5871_v21 = vmul.f32 %v5869_v35, %v5869_v35 }
0x1cc5   :  { %v5870_v6 = vmul.f32 %v5868_v63, %v5868_v63 }
0x1cc6   :  { %v5875_v36 = vsel %vm241_vm0, %v5871_v21, 0.0 }
0x1cc7   :  { %5876 = vadd.xlane.f32.xlu0 %v5875_v36  ;;  %v5872_v61 = vsel %vm241_vm0, %v5870_v6, 0.0 }
0x1cc8   :  { %5873 = vadd.xlane.f32.xlu1 %v5872_v61 }
0x1d54   :  { %v5877_v54 = vpop.xlane.xlu0 %5876 }
0x1d55   :  { %v5879_v0 = vmul.f32 0.03125, %v5877_v54  ;;  %v5874_v8 = vpop.xlane.xlu1 %5873 }
0x1d56   :  { %v5878_v1 = vmul.f32 0.03125, %v5874_v8 }
0x1d57   :  { %v5881_v51 = vadd.f32 1e-06, %v5879_v0 }
0x1d58   :  { %v5880_v3 = vadd.f32 1e-06, %v5878_v1 }
0x1d59   :  { %9664 = vrsqrt.f32 %v5881_v51 }
0x1d5a   :  { %9666 = vrsqrt.f32 %v5880_v3 }
0x1d63   :  { %v9665_v22 = vpop.eup %9664 }
0x1d64   :  { %v9667_v15 = vpop.eup %9666  ;;  %v5885_v23 = vmul.f32 %v9665_v22, %v5869_v35 }
0x1d65   :  { %v5884_v16 = vmul.f32 %v9667_v15, %v5868_v63 }
0x1d66   :  { %v5891_v62 = vmul.f32 %v5889_v39, %v5885_v23 }
0x1d67   :  { %v5890_v56 = vmul.f32 %v5889_v39, %v5884_v16 }
0x1d68   :  { %v11506_v26 = vadd.f32 %v5895_v37, %v5891_v62 }
0x1d69   :  { %v11504_v27 = vadd.f32 %v5895_v37, %v5890_v56 }
0x1d6b   :  { %8515 = vmatprep.mubr.msk.f32.mxu1 %vm241_vm0, %v11504_v27 }
0x1d6c   :  { %8516 = vmatmul.mubr.msk.f32.vlgmr.msra.gmra.mrb[46].mxu1 %vm241_vm0, %v11506_v26 }
0x1e3f   :  { %v8517_v5 = vpop.f32.mrb[46].mxu1 }
0x1e40   :  { %v5989_v55 = vadd.f32 %v8517_v5, %v6574_v49  ;;  %v5983_v18 = vpop.f32.mrb[47].mxu1 }
0x1e41   :  { %v5984_v45 = vadd.f32 %v6574_v49, %v5983_v18  ;;  %v6588_v18 = vld [vmem:[%s11589_s17 + $0x1] ss:$0 sm:$0xff] }
0x1e42   :  { %v5995_v24 = vmul.f32 0.70710677, %v5989_v55  ;;  %v5993_v40 = vmul.f32 0.5, %v5989_v55 }
0x1e43   :  { %v5994_v52 = vmul.f32 0.70710677, %v5984_v45  ;;  %v5992_v11 = vmul.f32 0.5, %v5984_v45 }
0x1e44   :  { %v6578_v29 = vclamps-f32 %v5995_v24, 4.0 }
0x1e45   :  { %v6577_v4 = vclamps-f32 %v5994_v52, 4.0 }
0x1e46   :  { %v6001_v31 = vmul.f32 %v6578_v29, %v6578_v29 }
0x1e47   :  { %v6000_v46 = vmul.f32 %v6577_v4, %v6577_v4 }
0x1e48   :  { %v6003_v50 = vmul.f32 -2.7261424e-10, %v6001_v31  ;;  %v6027_v32 = vmul.f32 -1.45660715e-05, %v6001_v31 }
0x1e49   :  { %v6002_v53 = vmul.f32 -2.7261424e-10, %v6000_v46  ;;  %v6026_v9 = vmul.f32 -1.45660715e-05, %v6000_v46 }
0x1e4a   :  { %v6005_v12 = vadd.f32 2.7706815e-08, %v6003_v50  ;;  %v6029_v20 = vadd.f32 -0.00021337405, %v6027_v32 }
0x1e4b   :  { %v6004_v25 = vadd.f32 2.7706815e-08, %v6002_v53  ;;  %v6028_v33 = vadd.f32 -0.00021337405, %v6026_v9 }
0x1e4c   :  { %v6007_v48 = vmul.f32 %v6005_v12, %v6001_v31  ;;  %v6031_v57 = vmul.f32 %v6029_v20, %v6001_v31 }
0x1e4d   :  { %v6006_v42 = vmul.f32 %v6004_v25, %v6000_v46  ;;  %v6030_v28 = vmul.f32 %v6028_v33, %v6000_v46 }
0x1e4e   :  { %v6009_v35 = vadd.f32 -2.101024e-06, %v6007_v48  ;;  %v6033_v63 = vadd.f32 -0.001682827, %v6031_v57 }
0x1e4f   :  { %v6008_v21 = vadd.f32 -2.101024e-06, %v6006_v42  ;;  %v6032_v6 = vadd.f32 -0.001682827, %v6030_v28 }
0x1e50   :  { %v6011_v36 = vmul.f32 %v6009_v35, %v6001_v31  ;;  %v6035_v61 = vmul.f32 %v6033_v63, %v6001_v31 }
0x1e51   :  { %v6010_v13 = vmul.f32 %v6008_v21, %v6000_v46  ;;  %v6034_v47 = vmul.f32 %v6032_v6, %v6000_v46  ;;  %v9684_v21 = vld [vmem:[%s11590_s18 + $0x4] sm:$0x7]  ;;  %s9686_s18 = scalar_lea.vmem %s6198_s4, 256 }
0x1e52   :  { %v6013_v41 = vadd.f32 -5.6925062e-05, %v6011_v36  ;;  %v6037_v10 = vadd.f32 -0.0073733293, %v6035_v61  ;;  %v6181_v6 = vrot.slane %v9684_v21, %v10807_v17  ;;  %p9687_p0 = scmp.ne.s32.totalorder %s6198_s4, %s9686_s18  ;;  %p9692_p2 = scmp.lt.s32.totalorder %s9686_s18, %s9686_s18 }
0x1e53   :  { %v6012_v34 = vadd.f32 -5.6925062e-05, %v6010_v13  ;;  %v6036_v19 = vadd.f32 -0.0073733293, %v6034_v47  ;;  %v9685_v47 = vld [vmem:[%s11591_s19 + $0x4] sm:$0x7] }
0x1e54   :  { %v6015_v54 = vmul.f32 %v6013_v41, %v6001_v31  ;;  %v6039_v0 = vmul.f32 %v6037_v10, %v6001_v31  ;;  %v6187_v41 = vrot.slane %v9685_v47, %v10807_v17  ;;  %p9693_p3 = por %p9692_p2, %p9691_p1 }
0x1e55   :  { %v6014_v8 = vmul.f32 %v6012_v34, %v6000_v46  ;;  %v6038_v1 = vmul.f32 %v6036_v19, %v6000_v46 }
0x1e56   :  { %v6017_v51 = vadd.f32 -0.00073499064, %v6015_v54  ;;  %v6041_v3 = vadd.f32 -0.014264739, %v6039_v0  ;;  %p9694_p4 = pnand %p9693_p3, %p9687_p0 }
0x1e57   :  { %v6016_v39 = vadd.f32 -0.00073499064, %v6014_v8  ;;  %v6040_v22 = vadd.f32 -0.014264739, %v6038_v1 }
0x1e58   :  { %v6019_v15 = vmul.f32 %v6017_v51, %v6001_v31  ;;  %9668 = vrcp.f32 %v6041_v3 }
0x1e59   :  { %v6018_v23 = vmul.f32 %v6016_v39, %v6000_v46  ;;  %9670 = vrcp.f32 %v6040_v22 }
0x1e5a   :  { %v6021_v16 = vadd.f32 -0.0029546, %v6019_v15 }
0x1e5b   :  { %v6020_v37 = vadd.f32 -0.0029546, %v6018_v23 }
0x1e5c   :  { %v6023_v62 = vmul.f32 %v6021_v16, %v6001_v31 }
0x1e5d   :  { %v6022_v56 = vmul.f32 %v6020_v37, %v6000_v46 }
0x1e5e   :  { %v6025_v60 = vadd.f32 -0.016096033, %v6023_v62 }
0x1e5f   :  { %v6024_v14 = vadd.f32 -0.016096033, %v6022_v56 }
0x1e60   :  { %v6043_v2 = vmul.f32 %v6578_v29, %v6025_v60 }
0x1e61   :  { %v6042_v58 = vmul.f32 %v6577_v4, %v6024_v14 }
0x1e62   :  { %v9669_v44 = vpop.eup %9668 }
0x1e63   :  { %v9671_v7 = vpop.eup %9670  ;;  %v6047_v59 = vmul.f32 %v9669_v44, %v6043_v2 }
0x1e64   :  { %v6045_v30 = vmul.f32 %v9671_v7, %v6042_v58 }
0x1e65   :  { %v6049_v43 = vadd.f32 1.0, %v6047_v59 }
0x1e66   :  { %v6048_v38 = vadd.f32 1.0, %v6045_v30 }
0x1e67   :  { %v6051_v5 = vmul.f32 %v6049_v43, %v5993_v40 }
0x1e68   :  { %v6050_v49 = vmul.f32 %v6048_v38, %v5992_v11 }
0x1e6a   :  { %8534 = vmatprep.mubr.msk.f32.mxu0 %vm3084_vm5, %v6050_v49 }
0x1e6b   :  { %8535 = vmatmul.mubr.msk.f32.vlgmr.msra.gmra.mrb[42].mxu0 %vm3084_vm5, %v6051_v5 }
0x1f3e   :  { %v8536_v24 = vpop.f32.mrb[42].mxu0 }
0x1f3f   :  { %v6147_v52 = vadd.f32 %v8536_v24, %v6588_v18  ;;  %v6141_v29 = vpop.f32.mrb[43].mxu0 }
0x1f40   :  { %v6142_v4 = vadd.f32 %v6588_v18, %v6141_v29 }
0x1f41   :  { %v6151_v31 = vadd.f32 %v6147_v52, %v11506_v26 }
0x1f42   :  { %v6150_v45 = vadd.f32 %v6142_v4, %v11504_v27 }
0x1f43   :  { %v6155_v55 = vsel %vm241_vm0, %v6151_v31, 0.0 }
0x1f44   :  { %6156 = vadd.xlane.f32.xlu0 %v6155_v55  ;;  %v6152_v46 = vsel %vm241_vm0, %v6150_v45, 0.0 }
0x1f45   :  { %6153 = vadd.xlane.f32.xlu1 %v6152_v46 }
0x1fd1   :  { %v6157_v50 = vpop.xlane.xlu0 %6156 }
0x1fd2   :  { %v6159_v32 = vmul.f32 0.03125, %v6157_v50  ;;  %v6154_v53 = vpop.xlane.xlu1 %6153 }
0x1fd3   :  { %v6158_v9 = vmul.f32 0.03125, %v6154_v53 }
0x1fd4   :  { %v6161_v12 = vsub.f32 %v6151_v31, %v6159_v32 }
0x1fd5   :  { %v6160_v20 = vsub.f32 %v6150_v45, %v6158_v9 }
0x1fd6   :  { %v6163_v25 = vmul.f32 %v6161_v12, %v6161_v12 }
0x1fd7   :  { %v6162_v33 = vmul.f32 %v6160_v20, %v6160_v20 }
0x1fd8   :  { %v6167_v48 = vsel %vm241_vm0, %v6163_v25, 0.0 }
0x1fd9   :  { %6168 = vadd.xlane.f32.xlu0 %v6167_v48  ;;  %v6164_v26 = vsel %vm241_vm0, %v6162_v33, 0.0 }
0x1fda   :  { %6165 = vadd.xlane.f32.xlu1 %v6164_v26 }
0x2066   :  { %v6169_v27 = vpop.xlane.xlu0 %6168 }
0x2067   :  { %v6171_v57 = vmul.f32 0.03125, %v6169_v27  ;;  %v6166_v42 = vpop.xlane.xlu1 %6165 }
0x2068   :  { %v6170_v28 = vmul.f32 0.03125, %v6166_v42 }
0x2069   :  { %v6173_v35 = vadd.f32 1e-06, %v6171_v57 }
0x206a   :  { %v6172_v63 = vadd.f32 1e-06, %v6170_v28 }
0x206b   :  { %9672 = vrsqrt.f32 %v6173_v35 }
0x206c   :  { %9674 = vrsqrt.f32 %v6172_v63 }
0x2075   :  { %v9673_v36 = vpop.eup %9672 }
0x2076   :  { %v9675_v61 = vpop.eup %9674  ;;  %v6177_v13 = vmul.f32 %v9673_v36, %v6161_v12 }
0x2077   :  { %v6176_v10 = vmul.f32 %v9675_v61, %v6160_v20 }
0x2078   :  { %v6183_v34 = vmul.f32 %v6181_v6, %v6177_v13 }
0x2079   :  { %v6182_v19 = vmul.f32 %v6181_v6, %v6176_v10 }
0x207a   :  { %v6189_v54 = vadd.f32 %v6187_v41, %v6183_v34 }
0x207b   :  { %v6188_v0 = vadd.f32 %v6187_v41, %v6182_v19 }
0x207c   :  { %6191 = vst.msk [vmem:[#allocation7 + $0x8] sm:$0xff] %vm241_vm0, %v6189_v54 }
0x207d   :  { %6190 = vst.msk [vmem:[#allocation7] sm:$0xff] %vm241_vm0, %v6188_v0 }
0x207e   :  { %9697 = shalt.err (!%p9694_p4)
}
0x207f   :  { %s9698_s0 = scalar_lea.hbm %s11592_s20, 256 }
0x2080   :  { %p9699_p5 = scmp.ne.s32.totalorder %s11592_s20, %s9698_s0  ;;  %p9702_p6 = scmp.lt.u32.totalorder %s9698_s0, %s11592_s20 }
0x2082   :  { %p9704_p7 = pnand %p9702_p6, %p9699_p5 }
0x2084   :  { %9707 = shalt.err (!%p9704_p7)
}
0x2085   :  { %s9719_s10 = smov 128   ;;  %s9720_s27 = smov 8  }
0x2086   :  { %6203 = dma.vmem_to_hbm [thread:$0]  %s6198_s4, 256, %s11592_s20, [#allocation8], %s9719_s10, %s9719_s10, %s9720_s27  }
0x2087   :  { %9708 = dma.done.wait [#allocation8], 256  }
0x2088   :  { %9709 = vsyncadd [#allocation8], 4294967040 }
0x2089   :  { %6215 = vsyncpa [#allocation8], 1 }

</bundles_post_ra>
